<compile_context>
chip_gen: v7x
topology: tpu7x:2x2x1
jax: 0.10.0
libtpu: 0.0.40
codegen_flags: <defaults>
</compile_context>

<pallas_src>
import functools

import jax
import jax.numpy as jnp
from jax.experimental import pallas as pl
from jax.experimental.pallas import tpu as pltpu


def _mednext_kernel(x_ref, mask_ref, wdw_ref, gng_ref, gnb_ref,
                    w2_ref, b2_ref, w3_ref, b3_ref, grn_g_ref, grn_b_ref,
                    o_ref, *, H, W, Wp, kernel_size, do_res, grn, sp_chunk):
    # Block shapes (grid step = one image):
    #   x_ref:    (C, S)   zero-padded image flattened onto the lane axis
    #   mask_ref: (1, S)   1.0 where the flat index is a valid output pixel
    #   wdw_ref:  (C, K*K) depthwise weights
    #   gng/gnb:  (C, 1)   GroupNorm affine
    #   w2_ref:   (Ce, C)  b2_ref: (Ce, 1)    1x1 expansion
    #   w3_ref:   (Co, Ce) b3_ref: (Co, 1)    1x1 projection
    #   grn_*:    (Ce, 1)
    #   o_ref:    (Co, S)  lane-dense output slab (wrapper crops the halo)
    K = kernel_size
    p = K // 2
    C, S = x_ref.shape

    x = x_ref[...].astype(jnp.float32)               # (C, S), lane-dense
    maskf = mask_ref[...].astype(jnp.float32)        # (1, S)
    wdw = wdw_ref[...].astype(jnp.float32)           # (C, K*K)  hoisted load

    # --- depthwise KxK conv: K*K lane rolls (XLU) + fma (VPU) ---------------
    # acc[c, h*Wp + w] = sum_{ky,kx} wdw[c, ky*K+kx] * xpad[c, h+ky, w+kx];
    # positions with h >= H or w >= W are garbage and get masked below.
    acc = jnp.zeros((C, S), jnp.float32)
    x_center = None
    for ky in range(K):
        for kx in range(K):
            d = ky * Wp + kx
            shifted = x if d == 0 else pltpu.roll(x, S - d, axis=1)
            if do_res and ky == p and kx == p:
                x_center = shifted                   # residual = original pixels
            t = ky * K + kx
            acc = acc + shifted * wdw[:, t:t + 1]
    # NOTE: the conv1 bias is deliberately skipped -- it is exactly cancelled
    # by the per-channel GroupNorm mean subtraction below.

    # --- GroupNorm (num_groups == C): per-channel stats over valid pixels ---
    inv_hw = jnp.float32(1.0 / (H * W))
    accm = acc * maskf                               # zero the padded positions
    mean = jnp.sum(accm, axis=1, keepdims=True) * inv_hw            # (C, 1)
    diff = (accm - mean) * maskf
    var = jnp.sum(diff * diff, axis=1, keepdims=True) * inv_hw      # (C, 1)
    h = (accm - mean) * jax.lax.rsqrt(var + 1e-5)
    h = h * gng_ref[...].astype(jnp.float32) + gnb_ref[...].astype(jnp.float32)

    w2 = w2_ref[...].astype(jnp.float32)
    b2 = b2_ref[...].astype(jnp.float32)
    w3 = w3_ref[...].astype(jnp.float32)
    b3 = b3_ref[...].astype(jnp.float32)
    inv_sqrt2 = jnp.float32(0.7071067811865476)

    # --- expansion -> GELU -> [GRN] -> projection -> residual ---------------
    # Chunked along the lane (spatial) axis to bound VMEM for large images.
    # GRN needs global spatial stats, so it forces a single chunk.
    # TODO(synk): two-pass chunked GRN if grn=True is used with large images.
    # NOTE: matmul operands kept in f32 to preserve exact fp32 fidelity with
    # the PyTorch reference; cast to bf16 here for large channel counts.
    chunk = S if grn else min(sp_chunk, S)
    for c0 in range(0, S, chunk):
        c1 = min(c0 + chunk, S)
        hc = h[:, c0:c1]                                             # (C, sc)
        h2 = jnp.dot(w2, hc, preferred_element_type=jnp.float32) + b2  # (Ce, sc)
        h2 = 0.5 * h2 * (1.0 + jax.lax.erf(h2 * inv_sqrt2))          # exact GELU
        if grn:
            mc = maskf[:, c0:c1]
            gx = jnp.sqrt(jnp.sum(h2 * h2 * mc, axis=1, keepdims=True))  # (Ce,1)
            nx = gx / (jnp.mean(gx, axis=0, keepdims=True) + 1e-6)
            h2 = grn_g_ref[...] * (h2 * nx) + grn_b_ref[...] + h2
        h3 = jnp.dot(w3, h2, preferred_element_type=jnp.float32) + b3   # (Co, sc)
        if do_res:
            h3 = h3 + x_center[:, c0:c1]
        o_ref[:, c0:c1] = h3.astype(o_ref.dtype)


def mednext_block_forward(x_nchw, params, *, kernel_size=7, do_res=True,
                          grn=False, sp_chunk=4096):
    """x_nchw: (N, C, H, W) float32. Returns (N, Cout, H, W)."""
    N, C, H, W = x_nchw.shape
    K = kernel_size
    assert K % 2 == 1
    p = K // 2
    Hp, Wp = H + 2 * p, W + 2 * p
    S = Hp * Wp
    SP = ((S + 127) // 128) * 128          # lane-align the flat spatial axis

    # Re-layout parameters so the channel axis sits on sublanes.
    w_dw = params["w_dw"].T                # (C, K*K)
    gn_g = params["gn_g"].T                # (C, 1)
    gn_b = params["gn_b"].T                # (C, 1)
    w2 = params["w2"].T                    # (Ce, C)
    b2 = params["b2"].T                    # (Ce, 1)
    w3 = params["w3"].T                    # (Co, Ce)
    b3 = params["b3"].T                    # (Co, 1)
    grn_g = params["grn_g"].T              # (Ce, 1)
    grn_b = params["grn_b"].T              # (Ce, 1)
    Ce, Co = w2.shape[0], w3.shape[0]
    if do_res:
        assert Co == C, "residual requires out_channels == in_channels"

    # Lane-dense layout: flatten the zero-padded spatial dims onto lanes.
    x_pad = jnp.pad(x_nchw, ((0, 0), (0, 0), (p, p), (p, p)))
    x_flat = jnp.pad(x_pad.reshape(N, C, S), ((0, 0), (0, 0), (0, SP - S)))
    # Validity mask in the padded-flat index space (h < H and w < W).
    mask = (jnp.arange(Hp)[:, None] < H) & (jnp.arange(Wp)[None, :] < W)
    mask = jnp.pad(mask.reshape(1, S).astype(jnp.float32), ((0, 0), (0, SP - S)))

    kern = functools.partial(_mednext_kernel, H=H, W=W, Wp=Wp, kernel_size=K,
                             do_res=do_res, grn=grn, sp_chunk=sp_chunk)

    out_flat = pl.pallas_call(
        kern,
        out_shape=jax.ShapeDtypeStruct((N, Co, SP), x_nchw.dtype),
        grid_spec=pltpu.PrefetchScalarGridSpec(
            num_scalar_prefetch=0,
            grid=(N,),
            in_specs=[
                pl.BlockSpec((None, C, SP), lambda n: (n, 0, 0)),   # padded image
                pl.BlockSpec((1, SP), lambda n: (0, 0)),            # validity mask
                pl.BlockSpec((C, K * K), lambda n: (0, 0)),         # depthwise w
                pl.BlockSpec((C, 1), lambda n: (0, 0)),             # GN gamma
                pl.BlockSpec((C, 1), lambda n: (0, 0)),             # GN beta
                pl.BlockSpec((Ce, C), lambda n: (0, 0)),            # 1x1 expand w
                pl.BlockSpec((Ce, 1), lambda n: (0, 0)),            # 1x1 expand b
                pl.BlockSpec((Co, Ce), lambda n: (0, 0)),           # 1x1 project w
                pl.BlockSpec((Co, 1), lambda n: (0, 0)),            # 1x1 project b
                pl.BlockSpec((Ce, 1), lambda n: (0, 0)),            # GRN gamma
                pl.BlockSpec((Ce, 1), lambda n: (0, 0)),            # GRN beta
            ],
            out_specs=pl.BlockSpec((None, Co, SP), lambda n: (n, 0, 0)),
        ),
        compiler_params=pltpu.CompilerParams(
            # Batch axis is parallel (megacore/multi-TC shards it when N > 1).
            dimension_semantics=("parallel",),
            # Explicit scoped-VMEM budget (re-derive for v7x's 64 MiB VMEM).
            vmem_limit_bytes=64 * 1024 * 1024,
        ),
    )(x_flat, mask, w_dw, gn_g, gn_b, w2, b2, w3, b3, grn_g, grn_b)

    # Crop halo + lane padding back to (N, Co, H, W) on the wrapper side
    # (cheap XLA slice; keeps the in-kernel store lane-dense).
    return out_flat[:, :, :S].reshape(N, Co, Hp, Wp)[:, :, :H, :W]


def _reference(x_nchw, params, *, kernel_size=7, do_res=True, grn=False):
    """Independent pure-JAX reference (NCHW, mirrors the PyTorch module)."""
    N, C, H, W = x_nchw.shape
    K = kernel_size
    w_dw = params["w_dw"].reshape(K, K, C).transpose(2, 0, 1)[:, None]  # (C,1,K,K)
    y = jax.lax.conv_general_dilated(
        x_nchw, w_dw, (1, 1), [(K // 2, K // 2)] * 2,
        dimension_numbers=("NCHW", "OIHW", "NCHW"), feature_group_count=C)
    y = y + params["b_dw"][0][None, :, None, None]
    mean = y.mean(axis=(2, 3), keepdims=True)
    var = ((y - mean) ** 2).mean(axis=(2, 3), keepdims=True)
    y = (y - mean) / jnp.sqrt(var + 1e-5)
    y = y * params["gn_g"][0][None, :, None, None] + params["gn_b"][0][None, :, None, None]
    y = jnp.einsum("nchw,ce->nehw", y, params["w2"]) + params["b2"][0][None, :, None, None]
    y = 0.5 * y * (1.0 + jax.lax.erf(y * 0.7071067811865476))
    if grn:
        gx = jnp.sqrt(jnp.sum(y * y, axis=(2, 3), keepdims=True))
        nx = gx / (gx.mean(axis=1, keepdims=True) + 1e-6)
        y = params["grn_g"][0][None, :, None, None] * (y * nx) \
            + params["grn_b"][0][None, :, None, None] + y
    y = jnp.einsum("nehw,eo->nohw", y, params["w3"]) + params["b3"][0][None, :, None, None]
    if do_res:
        y = y + x_nchw
    return y


def init_params(key, in_channels, out_channels, exp_r, kernel_size):
    C, Ce, Co, K = in_channels, exp_r * in_channels, out_channels, kernel_size
    keys = jax.random.split(key, 8)
    params = {
        "w_dw": 0.1 * jax.random.normal(keys[0], (K * K, C), jnp.float32),
        "b_dw": 0.1 * jax.random.normal(keys[1], (1, C), jnp.float32),
        "gn_g": 1.0 + 0.1 * jax.random.normal(keys[2], (1, C), jnp.float32),
        "gn_b": 0.1 * jax.random.normal(keys[3], (1, C), jnp.float32),
        "w2": 0.1 * jax.random.normal(keys[4], (C, Ce), jnp.float32),
        "b2": 0.1 * jax.random.normal(keys[5], (1, Ce), jnp.float32),
        "w3": 0.1 * jax.random.normal(keys[6], (Ce, Co), jnp.float32),
        "b3": 0.1 * jax.random.normal(keys[7], (1, Co), jnp.float32),
        # GRN params are zero-initialized in the PyTorch module.
        "grn_g": jnp.zeros((1, Ce), jnp.float32),
        "grn_b": jnp.zeros((1, Ce), jnp.float32),
    }
    return params


if __name__ == "__main__":
    # Small config consistent with the module: 2d, in=out=8 channels, exp_r=4,
    # kernel_size=7, do_res=True, norm_type='group', grn=False.
    N, C, H, W = 2, 8, 16, 16
    exp_r, K = 4, 7
    out_channels = C

    key = jax.random.PRNGKey(0)
    k_x, k_p = jax.random.split(key)
    x = jax.random.normal(k_x, (N, C, H, W), jnp.float32)
    params = init_params(k_p, C, out_channels, exp_r, K)

    # sp_chunk=256 exercises the chunked expansion/projection path (2 chunks).
    out = mednext_block_forward(x, params, kernel_size=K, do_res=True,
                                grn=False, sp_chunk=256)
    out = jax.block_until_ready(out)

    ref = _reference(x, params, kernel_size=K, do_res=True, grn=False)
    assert out.shape == (N, out_channels, H, W)
    max_err = float(jnp.max(jnp.abs(out - ref)))
    assert jnp.allclose(out, ref, atol=1e-4, rtol=1e-4), max_err

    print("KERNEL_OK")
</pallas_src>

<mosaic_0001>
module attributes {stable_mosaic.version = 11 : i64} {
  func.func @_mednext_kernel(%arg0: i32, %arg1: memref<1x8x512xf32, #tpu.memory_space<vmem>>, %arg2: memref<1x512xf32, #tpu.memory_space<vmem>>, %arg3: memref<8x49xf32, #tpu.memory_space<vmem>>, %arg4: memref<8x1xf32, #tpu.memory_space<vmem>>, %arg5: memref<8x1xf32, #tpu.memory_space<vmem>>, %arg6: memref<32x8xf32, #tpu.memory_space<vmem>>, %arg7: memref<32x1xf32, #tpu.memory_space<vmem>>, %arg8: memref<8x32xf32, #tpu.memory_space<vmem>>, %arg9: memref<8x1xf32, #tpu.memory_space<vmem>>, %arg10: memref<32x1xf32, #tpu.memory_space<vmem>>, %arg11: memref<32x1xf32, #tpu.memory_space<vmem>>, %arg12: memref<1x8x512xf32, #tpu.memory_space<vmem>>) attributes {dimension_semantics = [#tpu.dimension_semantics<parallel>], iteration_bounds = array<i64: 2>, scalar_prefetch = 0 : i64, scratch_operands = 0 : i64, tpu.core_type = #tpu.core_type<tc>, window_params = [{transform_indices = @transform_0, window_bounds = array<i64: 1, 8, 512>}, {pipeline_mode = #tpu.pipeline_mode<synchronous>, transform_indices = @transform_1, window_bounds = array<i64: 1, 512>}, {pipeline_mode = #tpu.pipeline_mode<synchronous>, transform_indices = @transform_2, window_bounds = array<i64: 8, 49>}, {pipeline_mode = #tpu.pipeline_mode<synchronous>, transform_indices = @transform_3, window_bounds = array<i64: 8, 1>}, {pipeline_mode = #tpu.pipeline_mode<synchronous>, transform_indices = @transform_4, window_bounds = array<i64: 8, 1>}, {pipeline_mode = #tpu.pipeline_mode<synchronous>, transform_indices = @transform_5, window_bounds = array<i64: 32, 8>}, {pipeline_mode = #tpu.pipeline_mode<synchronous>, transform_indices = @transform_6, window_bounds = array<i64: 32, 1>}, {pipeline_mode = #tpu.pipeline_mode<synchronous>, transform_indices = @transform_7, window_bounds = array<i64: 8, 32>}, {pipeline_mode = #tpu.pipeline_mode<synchronous>, transform_indices = @transform_8, window_bounds = array<i64: 8, 1>}, {pipeline_mode = #tpu.pipeline_mode<synchronous>, transform_indices = @transform_9, window_bounds = array<i64: 32, 1>}, {pipeline_mode = #tpu.pipeline_mode<synchronous>, transform_indices = @transform_10, window_bounds = array<i64: 32, 1>}, {transform_indices = @transform_11, window_bounds = array<i64: 1, 8, 512>}]} {
    %c0 = arith.constant 0 : index
    %c0_0 = arith.constant 0 : index
    %c0_1 = arith.constant 0 : index
    %0 = vector.load %arg1[%c0, %c0_0, %c0_1] : memref<1x8x512xf32, #tpu.memory_space<vmem>>, vector<1x8x512xf32>
    %1 = vector.shape_cast %0 : vector<1x8x512xf32> to vector<8x512xf32>
    %c0_2 = arith.constant 0 : index
    %c0_3 = arith.constant 0 : index
    %2 = vector.load %arg2[%c0_2, %c0_3] : memref<1x512xf32, #tpu.memory_space<vmem>>, vector<1x512xf32>
    %c0_4 = arith.constant 0 : index
    %c0_5 = arith.constant 0 : index
    %3 = vector.load %arg3[%c0_4, %c0_5] : memref<8x49xf32, #tpu.memory_space<vmem>>, vector<8x49xf32>
    %cst = arith.constant 0.000000e+00 : f32
    %4 = vector.broadcast %cst : f32 to vector<8x512xf32>
    %5 = vector.extract_strided_slice %3 {offsets = [0, 0], sizes = [8, 1], strides = [1, 1]} : vector<8x49xf32> to vector<8x1xf32>
    %6 = vector.broadcast %5 : vector<8x1xf32> to vector<8x512xf32>
    %7 = arith.mulf %1, %6 : vector<8x512xf32>
    %8 = arith.addf %4, %7 : vector<8x512xf32>
    %c511_i32 = arith.constant 511 : i32
    %9 = tpu.dynamic_rotate %1 by %c511_i32 dim 1 : vector<8x512xf32>, i32 -> vector<8x512xf32>
    %10 = vector.extract_strided_slice %3 {offsets = [0, 1], sizes = [8, 1], strides = [1, 1]} : vector<8x49xf32> to vector<8x1xf32>
    %11 = vector.broadcast %10 : vector<8x1xf32> to vector<8x512xf32>
    %12 = arith.mulf %9, %11 : vector<8x512xf32>
    %13 = arith.addf %8, %12 : vector<8x512xf32>
    %c510_i32 = arith.constant 510 : i32
    %14 = tpu.dynamic_rotate %1 by %c510_i32 dim 1 : vector<8x512xf32>, i32 -> vector<8x512xf32>
    %15 = vector.extract_strided_slice %3 {offsets = [0, 2], sizes = [8, 1], strides = [1, 1]} : vector<8x49xf32> to vector<8x1xf32>
    %16 = vector.broadcast %15 : vector<8x1xf32> to vector<8x512xf32>
    %17 = arith.mulf %14, %16 : vector<8x512xf32>
    %18 = arith.addf %13, %17 : vector<8x512xf32>
    %c509_i32 = arith.constant 509 : i32
    %19 = tpu.dynamic_rotate %1 by %c509_i32 dim 1 : vector<8x512xf32>, i32 -> vector<8x512xf32>
    %20 = vector.extract_strided_slice %3 {offsets = [0, 3], sizes = [8, 1], strides = [1, 1]} : vector<8x49xf32> to vector<8x1xf32>
    %21 = vector.broadcast %20 : vector<8x1xf32> to vector<8x512xf32>
    %22 = arith.mulf %19, %21 : vector<8x512xf32>
    %23 = arith.addf %18, %22 : vector<8x512xf32>
    %c508_i32 = arith.constant 508 : i32
    %24 = tpu.dynamic_rotate %1 by %c508_i32 dim 1 : vector<8x512xf32>, i32 -> vector<8x512xf32>
    %25 = vector.extract_strided_slice %3 {offsets = [0, 4], sizes = [8, 1], strides = [1, 1]} : vector<8x49xf32> to vector<8x1xf32>
    %26 = vector.broadcast %25 : vector<8x1xf32> to vector<8x512xf32>
    %27 = arith.mulf %24, %26 : vector<8x512xf32>
    %28 = arith.addf %23, %27 : vector<8x512xf32>
    %c507_i32 = arith.constant 507 : i32
    %29 = tpu.dynamic_rotate %1 by %c507_i32 dim 1 : vector<8x512xf32>, i32 -> vector<8x512xf32>
    %30 = vector.extract_strided_slice %3 {offsets = [0, 5], sizes = [8, 1], strides = [1, 1]} : vector<8x49xf32> to vector<8x1xf32>
    %31 = vector.broadcast %30 : vector<8x1xf32> to vector<8x512xf32>
    %32 = arith.mulf %29, %31 : vector<8x512xf32>
    %33 = arith.addf %28, %32 : vector<8x512xf32>
    %c506_i32 = arith.constant 506 : i32
    %34 = tpu.dynamic_rotate %1 by %c506_i32 dim 1 : vector<8x512xf32>, i32 -> vector<8x512xf32>
    %35 = vector.extract_strided_slice %3 {offsets = [0, 6], sizes = [8, 1], strides = [1, 1]} : vector<8x49xf32> to vector<8x1xf32>
    %36 = vector.broadcast %35 : vector<8x1xf32> to vector<8x512xf32>
    %37 = arith.mulf %34, %36 : vector<8x512xf32>
    %38 = arith.addf %33, %37 : vector<8x512xf32>
    %c490_i32 = arith.constant 490 : i32
    %39 = tpu.dynamic_rotate %1 by %c490_i32 dim 1 : vector<8x512xf32>, i32 -> vector<8x512xf32>
    %40 = vector.extract_strided_slice %3 {offsets = [0, 7], sizes = [8, 1], strides = [1, 1]} : vector<8x49xf32> to vector<8x1xf32>
    %41 = vector.broadcast %40 : vector<8x1xf32> to vector<8x512xf32>
    %42 = arith.mulf %39, %41 : vector<8x512xf32>
    %43 = arith.addf %38, %42 : vector<8x512xf32>
    %c489_i32 = arith.constant 489 : i32
    %44 = tpu.dynamic_rotate %1 by %c489_i32 dim 1 : vector<8x512xf32>, i32 -> vector<8x512xf32>
    %45 = vector.extract_strided_slice %3 {offsets = [0, 8], sizes = [8, 1], strides = [1, 1]} : vector<8x49xf32> to vector<8x1xf32>
    %46 = vector.broadcast %45 : vector<8x1xf32> to vector<8x512xf32>
    %47 = arith.mulf %44, %46 : vector<8x512xf32>
    %48 = arith.addf %43, %47 : vector<8x512xf32>
    %c488_i32 = arith.constant 488 : i32
    %49 = tpu.dynamic_rotate %1 by %c488_i32 dim 1 : vector<8x512xf32>, i32 -> vector<8x512xf32>
    %50 = vector.extract_strided_slice %3 {offsets = [0, 9], sizes = [8, 1], strides = [1, 1]} : vector<8x49xf32> to vector<8x1xf32>
    %51 = vector.broadcast %50 : vector<8x1xf32> to vector<8x512xf32>
    %52 = arith.mulf %49, %51 : vector<8x512xf32>
    %53 = arith.addf %48, %52 : vector<8x512xf32>
    %c487_i32 = arith.constant 487 : i32
    %54 = tpu.dynamic_rotate %1 by %c487_i32 dim 1 : vector<8x512xf32>, i32 -> vector<8x512xf32>
    %55 = vector.extract_strided_slice %3 {offsets = [0, 10], sizes = [8, 1], strides = [1, 1]} : vector<8x49xf32> to vector<8x1xf32>
    %56 = vector.broadcast %55 : vector<8x1xf32> to vector<8x512xf32>
    %57 = arith.mulf %54, %56 : vector<8x512xf32>
    %58 = arith.addf %53, %57 : vector<8x512xf32>
    %c486_i32 = arith.constant 486 : i32
    %59 = tpu.dynamic_rotate %1 by %c486_i32 dim 1 : vector<8x512xf32>, i32 -> vector<8x512xf32>
    %60 = vector.extract_strided_slice %3 {offsets = [0, 11], sizes = [8, 1], strides = [1, 1]} : vector<8x49xf32> to vector<8x1xf32>
    %61 = vector.broadcast %60 : vector<8x1xf32> to vector<8x512xf32>
    %62 = arith.mulf %59, %61 : vector<8x512xf32>
    %63 = arith.addf %58, %62 : vector<8x512xf32>
    %c485_i32 = arith.constant 485 : i32
    %64 = tpu.dynamic_rotate %1 by %c485_i32 dim 1 : vector<8x512xf32>, i32 -> vector<8x512xf32>
    %65 = vector.extract_strided_slice %3 {offsets = [0, 12], sizes = [8, 1], strides = [1, 1]} : vector<8x49xf32> to vector<8x1xf32>
    %66 = vector.broadcast %65 : vector<8x1xf32> to vector<8x512xf32>
    %67 = arith.mulf %64, %66 : vector<8x512xf32>
    %68 = arith.addf %63, %67 : vector<8x512xf32>
    %c484_i32 = arith.constant 484 : i32
    %69 = tpu.dynamic_rotate %1 by %c484_i32 dim 1 : vector<8x512xf32>, i32 -> vector<8x512xf32>
    %70 = vector.extract_strided_slice %3 {offsets = [0, 13], sizes = [8, 1], strides = [1, 1]} : vector<8x49xf32> to vector<8x1xf32>
    %71 = vector.broadcast %70 : vector<8x1xf32> to vector<8x512xf32>
    %72 = arith.mulf %69, %71 : vector<8x512xf32>
    %73 = arith.addf %68, %72 : vector<8x512xf32>
    %c468_i32 = arith.constant 468 : i32
    %74 = tpu.dynamic_rotate %1 by %c468_i32 dim 1 : vector<8x512xf32>, i32 -> vector<8x512xf32>
    %75 = vector.extract_strided_slice %3 {offsets = [0, 14], sizes = [8, 1], strides = [1, 1]} : vector<8x49xf32> to vector<8x1xf32>
    %76 = vector.broadcast %75 : vector<8x1xf32> to vector<8x512xf32>
    %77 = arith.mulf %74, %76 : vector<8x512xf32>
    %78 = arith.addf %73, %77 : vector<8x512xf32>
    %c467_i32 = arith.constant 467 : i32
    %79 = tpu.dynamic_rotate %1 by %c467_i32 dim 1 : vector<8x512xf32>, i32 -> vector<8x512xf32>
    %80 = vector.extract_strided_slice %3 {offsets = [0, 15], sizes = [8, 1], strides = [1, 1]} : vector<8x49xf32> to vector<8x1xf32>
    %81 = vector.broadcast %80 : vector<8x1xf32> to vector<8x512xf32>
    %82 = arith.mulf %79, %81 : vector<8x512xf32>
    %83 = arith.addf %78, %82 : vector<8x512xf32>
    %c466_i32 = arith.constant 466 : i32
    %84 = tpu.dynamic_rotate %1 by %c466_i32 dim 1 : vector<8x512xf32>, i32 -> vector<8x512xf32>
    %85 = vector.extract_strided_slice %3 {offsets = [0, 16], sizes = [8, 1], strides = [1, 1]} : vector<8x49xf32> to vector<8x1xf32>
    %86 = vector.broadcast %85 : vector<8x1xf32> to vector<8x512xf32>
    %87 = arith.mulf %84, %86 : vector<8x512xf32>
    %88 = arith.addf %83, %87 : vector<8x512xf32>
    %c465_i32 = arith.constant 465 : i32
    %89 = tpu.dynamic_rotate %1 by %c465_i32 dim 1 : vector<8x512xf32>, i32 -> vector<8x512xf32>
    %90 = vector.extract_strided_slice %3 {offsets = [0, 17], sizes = [8, 1], strides = [1, 1]} : vector<8x49xf32> to vector<8x1xf32>
    %91 = vector.broadcast %90 : vector<8x1xf32> to vector<8x512xf32>
    %92 = arith.mulf %89, %91 : vector<8x512xf32>
    %93 = arith.addf %88, %92 : vector<8x512xf32>
    %c464_i32 = arith.constant 464 : i32
    %94 = tpu.dynamic_rotate %1 by %c464_i32 dim 1 : vector<8x512xf32>, i32 -> vector<8x512xf32>
    %95 = vector.extract_strided_slice %3 {offsets = [0, 18], sizes = [8, 1], strides = [1, 1]} : vector<8x49xf32> to vector<8x1xf32>
    %96 = vector.broadcast %95 : vector<8x1xf32> to vector<8x512xf32>
    %97 = arith.mulf %94, %96 : vector<8x512xf32>
    %98 = arith.addf %93, %97 : vector<8x512xf32>
    %c463_i32 = arith.constant 463 : i32
    %99 = tpu.dynamic_rotate %1 by %c463_i32 dim 1 : vector<8x512xf32>, i32 -> vector<8x512xf32>
    %100 = vector.extract_strided_slice %3 {offsets = [0, 19], sizes = [8, 1], strides = [1, 1]} : vector<8x49xf32> to vector<8x1xf32>
    %101 = vector.broadcast %100 : vector<8x1xf32> to vector<8x512xf32>
    %102 = arith.mulf %99, %101 : vector<8x512xf32>
    %103 = arith.addf %98, %102 : vector<8x512xf32>
    %c462_i32 = arith.constant 462 : i32
    %104 = tpu.dynamic_rotate %1 by %c462_i32 dim 1 : vector<8x512xf32>, i32 -> vector<8x512xf32>
    %105 = vector.extract_strided_slice %3 {offsets = [0, 20], sizes = [8, 1], strides = [1, 1]} : vector<8x49xf32> to vector<8x1xf32>
    %106 = vector.broadcast %105 : vector<8x1xf32> to vector<8x512xf32>
    %107 = arith.mulf %104, %106 : vector<8x512xf32>
    %108 = arith.addf %103, %107 : vector<8x512xf32>
    %c446_i32 = arith.constant 446 : i32
    %109 = tpu.dynamic_rotate %1 by %c446_i32 dim 1 : vector<8x512xf32>, i32 -> vector<8x512xf32>
    %110 = vector.extract_strided_slice %3 {offsets = [0, 21], sizes = [8, 1], strides = [1, 1]} : vector<8x49xf32> to vector<8x1xf32>
    %111 = vector.broadcast %110 : vector<8x1xf32> to vector<8x512xf32>
    %112 = arith.mulf %109, %111 : vector<8x512xf32>
    %113 = arith.addf %108, %112 : vector<8x512xf32>
    %c445_i32 = arith.constant 445 : i32
    %114 = tpu.dynamic_rotate %1 by %c445_i32 dim 1 : vector<8x512xf32>, i32 -> vector<8x512xf32>
    %115 = vector.extract_strided_slice %3 {offsets = [0, 22], sizes = [8, 1], strides = [1, 1]} : vector<8x49xf32> to vector<8x1xf32>
    %116 = vector.broadcast %115 : vector<8x1xf32> to vector<8x512xf32>
    %117 = arith.mulf %114, %116 : vector<8x512xf32>
    %118 = arith.addf %113, %117 : vector<8x512xf32>
    %c444_i32 = arith.constant 444 : i32
    %119 = tpu.dynamic_rotate %1 by %c444_i32 dim 1 : vector<8x512xf32>, i32 -> vector<8x512xf32>
    %120 = vector.extract_strided_slice %3 {offsets = [0, 23], sizes = [8, 1], strides = [1, 1]} : vector<8x49xf32> to vector<8x1xf32>
    %121 = vector.broadcast %120 : vector<8x1xf32> to vector<8x512xf32>
    %122 = arith.mulf %119, %121 : vector<8x512xf32>
    %123 = arith.addf %118, %122 : vector<8x512xf32>
    %c443_i32 = arith.constant 443 : i32
    %124 = tpu.dynamic_rotate %1 by %c443_i32 dim 1 : vector<8x512xf32>, i32 -> vector<8x512xf32>
    %125 = vector.extract_strided_slice %3 {offsets = [0, 24], sizes = [8, 1], strides = [1, 1]} : vector<8x49xf32> to vector<8x1xf32>
    %126 = vector.broadcast %125 : vector<8x1xf32> to vector<8x512xf32>
    %127 = arith.mulf %124, %126 : vector<8x512xf32>
    %128 = arith.addf %123, %127 : vector<8x512xf32>
    %c442_i32 = arith.constant 442 : i32
    %129 = tpu.dynamic_rotate %1 by %c442_i32 dim 1 : vector<8x512xf32>, i32 -> vector<8x512xf32>
    %130 = vector.extract_strided_slice %3 {offsets = [0, 25], sizes = [8, 1], strides = [1, 1]} : vector<8x49xf32> to vector<8x1xf32>
    %131 = vector.broadcast %130 : vector<8x1xf32> to vector<8x512xf32>
    %132 = arith.mulf %129, %131 : vector<8x512xf32>
    %133 = arith.addf %128, %132 : vector<8x512xf32>
    %c441_i32 = arith.constant 441 : i32
    %134 = tpu.dynamic_rotate %1 by %c441_i32 dim 1 : vector<8x512xf32>, i32 -> vector<8x512xf32>
    %135 = vector.extract_strided_slice %3 {offsets = [0, 26], sizes = [8, 1], strides = [1, 1]} : vector<8x49xf32> to vector<8x1xf32>
    %136 = vector.broadcast %135 : vector<8x1xf32> to vector<8x512xf32>
    %137 = arith.mulf %134, %136 : vector<8x512xf32>
    %138 = arith.addf %133, %137 : vector<8x512xf32>
    %c440_i32 = arith.constant 440 : i32
    %139 = tpu.dynamic_rotate %1 by %c440_i32 dim 1 : vector<8x512xf32>, i32 -> vector<8x512xf32>
    %140 = vector.extract_strided_slice %3 {offsets = [0, 27], sizes = [8, 1], strides = [1, 1]} : vector<8x49xf32> to vector<8x1xf32>
    %141 = vector.broadcast %140 : vector<8x1xf32> to vector<8x512xf32>
    %142 = arith.mulf %139, %141 : vector<8x512xf32>
    %143 = arith.addf %138, %142 : vector<8x512xf32>
    %c424_i32 = arith.constant 424 : i32
    %144 = tpu.dynamic_rotate %1 by %c424_i32 dim 1 : vector<8x512xf32>, i32 -> vector<8x512xf32>
    %145 = vector.extract_strided_slice %3 {offsets = [0, 28], sizes = [8, 1], strides = [1, 1]} : vector<8x49xf32> to vector<8x1xf32>
    %146 = vector.broadcast %145 : vector<8x1xf32> to vector<8x512xf32>
    %147 = arith.mulf %144, %146 : vector<8x512xf32>
    %148 = arith.addf %143, %147 : vector<8x512xf32>
    %c423_i32 = arith.constant 423 : i32
    %149 = tpu.dynamic_rotate %1 by %c423_i32 dim 1 : vector<8x512xf32>, i32 -> vector<8x512xf32>
    %150 = vector.extract_strided_slice %3 {offsets = [0, 29], sizes = [8, 1], strides = [1, 1]} : vector<8x49xf32> to vector<8x1xf32>
    %151 = vector.broadcast %150 : vector<8x1xf32> to vector<8x512xf32>
    %152 = arith.mulf %149, %151 : vector<8x512xf32>
    %153 = arith.addf %148, %152 : vector<8x512xf32>
    %c422_i32 = arith.constant 422 : i32
    %154 = tpu.dynamic_rotate %1 by %c422_i32 dim 1 : vector<8x512xf32>, i32 -> vector<8x512xf32>
    %155 = vector.extract_strided_slice %3 {offsets = [0, 30], sizes = [8, 1], strides = [1, 1]} : vector<8x49xf32> to vector<8x1xf32>
    %156 = vector.broadcast %155 : vector<8x1xf32> to vector<8x512xf32>
    %157 = arith.mulf %154, %156 : vector<8x512xf32>
    %158 = arith.addf %153, %157 : vector<8x512xf32>
    %c421_i32 = arith.constant 421 : i32
    %159 = tpu.dynamic_rotate %1 by %c421_i32 dim 1 : vector<8x512xf32>, i32 -> vector<8x512xf32>
    %160 = vector.extract_strided_slice %3 {offsets = [0, 31], sizes = [8, 1], strides = [1, 1]} : vector<8x49xf32> to vector<8x1xf32>
    %161 = vector.broadcast %160 : vector<8x1xf32> to vector<8x512xf32>
    %162 = arith.mulf %159, %161 : vector<8x512xf32>
    %163 = arith.addf %158, %162 : vector<8x512xf32>
    %c420_i32 = arith.constant 420 : i32
    %164 = tpu.dynamic_rotate %1 by %c420_i32 dim 1 : vector<8x512xf32>, i32 -> vector<8x512xf32>
    %165 = vector.extract_strided_slice %3 {offsets = [0, 32], sizes = [8, 1], strides = [1, 1]} : vector<8x49xf32> to vector<8x1xf32>
    %166 = vector.broadcast %165 : vector<8x1xf32> to vector<8x512xf32>
    %167 = arith.mulf %164, %166 : vector<8x512xf32>
    %168 = arith.addf %163, %167 : vector<8x512xf32>
    %c419_i32 = arith.constant 419 : i32
    %169 = tpu.dynamic_rotate %1 by %c419_i32 dim 1 : vector<8x512xf32>, i32 -> vector<8x512xf32>
    %170 = vector.extract_strided_slice %3 {offsets = [0, 33], sizes = [8, 1], strides = [1, 1]} : vector<8x49xf32> to vector<8x1xf32>
    %171 = vector.broadcast %170 : vector<8x1xf32> to vector<8x512xf32>
    %172 = arith.mulf %169, %171 : vector<8x512xf32>
    %173 = arith.addf %168, %172 : vector<8x512xf32>
    %c418_i32 = arith.constant 418 : i32
    %174 = tpu.dynamic_rotate %1 by %c418_i32 dim 1 : vector<8x512xf32>, i32 -> vector<8x512xf32>
    %175 = vector.extract_strided_slice %3 {offsets = [0, 34], sizes = [8, 1], strides = [1, 1]} : vector<8x49xf32> to vector<8x1xf32>
    %176 = vector.broadcast %175 : vector<8x1xf32> to vector<8x512xf32>
    %177 = arith.mulf %174, %176 : vector<8x512xf32>
    %178 = arith.addf %173, %177 : vector<8x512xf32>
    %c402_i32 = arith.constant 402 : i32
    %179 = tpu.dynamic_rotate %1 by %c402_i32 dim 1 : vector<8x512xf32>, i32 -> vector<8x512xf32>
    %180 = vector.extract_strided_slice %3 {offsets = [0, 35], sizes = [8, 1], strides = [1, 1]} : vector<8x49xf32> to vector<8x1xf32>
    %181 = vector.broadcast %180 : vector<8x1xf32> to vector<8x512xf32>
    %182 = arith.mulf %179, %181 : vector<8x512xf32>
    %183 = arith.addf %178, %182 : vector<8x512xf32>
    %c401_i32 = arith.constant 401 : i32
    %184 = tpu.dynamic_rotate %1 by %c401_i32 dim 1 : vector<8x512xf32>, i32 -> vector<8x512xf32>
    %185 = vector.extract_strided_slice %3 {offsets = [0, 36], sizes = [8, 1], strides = [1, 1]} : vector<8x49xf32> to vector<8x1xf32>
    %186 = vector.broadcast %185 : vector<8x1xf32> to vector<8x512xf32>
    %187 = arith.mulf %184, %186 : vector<8x512xf32>
    %188 = arith.addf %183, %187 : vector<8x512xf32>
    %c400_i32 = arith.constant 400 : i32
    %189 = tpu.dynamic_rotate %1 by %c400_i32 dim 1 : vector<8x512xf32>, i32 -> vector<8x512xf32>
    %190 = vector.extract_strided_slice %3 {offsets = [0, 37], sizes = [8, 1], strides = [1, 1]} : vector<8x49xf32> to vector<8x1xf32>
    %191 = vector.broadcast %190 : vector<8x1xf32> to vector<8x512xf32>
    %192 = arith.mulf %189, %191 : vector<8x512xf32>
    %193 = arith.addf %188, %192 : vector<8x512xf32>
    %c399_i32 = arith.constant 399 : i32
    %194 = tpu.dynamic_rotate %1 by %c399_i32 dim 1 : vector<8x512xf32>, i32 -> vector<8x512xf32>
    %195 = vector.extract_strided_slice %3 {offsets = [0, 38], sizes = [8, 1], strides = [1, 1]} : vector<8x49xf32> to vector<8x1xf32>
    %196 = vector.broadcast %195 : vector<8x1xf32> to vector<8x512xf32>
    %197 = arith.mulf %194, %196 : vector<8x512xf32>
    %198 = arith.addf %193, %197 : vector<8x512xf32>
    %c398_i32 = arith.constant 398 : i32
    %199 = tpu.dynamic_rotate %1 by %c398_i32 dim 1 : vector<8x512xf32>, i32 -> vector<8x512xf32>
    %200 = vector.extract_strided_slice %3 {offsets = [0, 39], sizes = [8, 1], strides = [1, 1]} : vector<8x49xf32> to vector<8x1xf32>
    %201 = vector.broadcast %200 : vector<8x1xf32> to vector<8x512xf32>
    %202 = arith.mulf %199, %201 : vector<8x512xf32>
    %203 = arith.addf %198, %202 : vector<8x512xf32>
    %c397_i32 = arith.constant 397 : i32
    %204 = tpu.dynamic_rotate %1 by %c397_i32 dim 1 : vector<8x512xf32>, i32 -> vector<8x512xf32>
    %205 = vector.extract_strided_slice %3 {offsets = [0, 40], sizes = [8, 1], strides = [1, 1]} : vector<8x49xf32> to vector<8x1xf32>
    %206 = vector.broadcast %205 : vector<8x1xf32> to vector<8x512xf32>
    %207 = arith.mulf %204, %206 : vector<8x512xf32>
    %208 = arith.addf %203, %207 : vector<8x512xf32>
    %c396_i32 = arith.constant 396 : i32
    %209 = tpu.dynamic_rotate %1 by %c396_i32 dim 1 : vector<8x512xf32>, i32 -> vector<8x512xf32>
    %210 = vector.extract_strided_slice %3 {offsets = [0, 41], sizes = [8, 1], strides = [1, 1]} : vector<8x49xf32> to vector<8x1xf32>
    %211 = vector.broadcast %210 : vector<8x1xf32> to vector<8x512xf32>
    %212 = arith.mulf %209, %211 : vector<8x512xf32>
    %213 = arith.addf %208, %212 : vector<8x512xf32>
    %c380_i32 = arith.constant 380 : i32
    %214 = tpu.dynamic_rotate %1 by %c380_i32 dim 1 : vector<8x512xf32>, i32 -> vector<8x512xf32>
    %215 = vector.extract_strided_slice %3 {offsets = [0, 42], sizes = [8, 1], strides = [1, 1]} : vector<8x49xf32> to vector<8x1xf32>
    %216 = vector.broadcast %215 : vector<8x1xf32> to vector<8x512xf32>
    %217 = arith.mulf %214, %216 : vector<8x512xf32>
    %218 = arith.addf %213, %217 : vector<8x512xf32>
    %c379_i32 = arith.constant 379 : i32
    %219 = tpu.dynamic_rotate %1 by %c379_i32 dim 1 : vector<8x512xf32>, i32 -> vector<8x512xf32>
    %220 = vector.extract_strided_slice %3 {offsets = [0, 43], sizes = [8, 1], strides = [1, 1]} : vector<8x49xf32> to vector<8x1xf32>
    %221 = vector.broadcast %220 : vector<8x1xf32> to vector<8x512xf32>
    %222 = arith.mulf %219, %221 : vector<8x512xf32>
    %223 = arith.addf %218, %222 : vector<8x512xf32>
    %c378_i32 = arith.constant 378 : i32
    %224 = tpu.dynamic_rotate %1 by %c378_i32 dim 1 : vector<8x512xf32>, i32 -> vector<8x512xf32>
    %225 = vector.extract_strided_slice %3 {offsets = [0, 44], sizes = [8, 1], strides = [1, 1]} : vector<8x49xf32> to vector<8x1xf32>
    %226 = vector.broadcast %225 : vector<8x1xf32> to vector<8x512xf32>
    %227 = arith.mulf %224, %226 : vector<8x512xf32>
    %228 = arith.addf %223, %227 : vector<8x512xf32>
    %c377_i32 = arith.constant 377 : i32
    %229 = tpu.dynamic_rotate %1 by %c377_i32 dim 1 : vector<8x512xf32>, i32 -> vector<8x512xf32>
    %230 = vector.extract_strided_slice %3 {offsets = [0, 45], sizes = [8, 1], strides = [1, 1]} : vector<8x49xf32> to vector<8x1xf32>
    %231 = vector.broadcast %230 : vector<8x1xf32> to vector<8x512xf32>
    %232 = arith.mulf %229, %231 : vector<8x512xf32>
    %233 = arith.addf %228, %232 : vector<8x512xf32>
    %c376_i32 = arith.constant 376 : i32
    %234 = tpu.dynamic_rotate %1 by %c376_i32 dim 1 : vector<8x512xf32>, i32 -> vector<8x512xf32>
    %235 = vector.extract_strided_slice %3 {offsets = [0, 46], sizes = [8, 1], strides = [1, 1]} : vector<8x49xf32> to vector<8x1xf32>
    %236 = vector.broadcast %235 : vector<8x1xf32> to vector<8x512xf32>
    %237 = arith.mulf %234, %236 : vector<8x512xf32>
    %238 = arith.addf %233, %237 : vector<8x512xf32>
    %c375_i32 = arith.constant 375 : i32
    %239 = tpu.dynamic_rotate %1 by %c375_i32 dim 1 : vector<8x512xf32>, i32 -> vector<8x512xf32>
    %240 = vector.extract_strided_slice %3 {offsets = [0, 47], sizes = [8, 1], strides = [1, 1]} : vector<8x49xf32> to vector<8x1xf32>
    %241 = vector.broadcast %240 : vector<8x1xf32> to vector<8x512xf32>
    %242 = arith.mulf %239, %241 : vector<8x512xf32>
    %243 = arith.addf %238, %242 : vector<8x512xf32>
    %c374_i32 = arith.constant 374 : i32
    %244 = tpu.dynamic_rotate %1 by %c374_i32 dim 1 : vector<8x512xf32>, i32 -> vector<8x512xf32>
    %245 = vector.extract_strided_slice %3 {offsets = [0, 48], sizes = [8, 1], strides = [1, 1]} : vector<8x49xf32> to vector<8x1xf32>
    %246 = vector.broadcast %245 : vector<8x1xf32> to vector<8x512xf32>
    %247 = arith.mulf %244, %246 : vector<8x512xf32>
    %248 = arith.addf %243, %247 : vector<8x512xf32>
    %249 = vector.broadcast %2 : vector<1x512xf32> to vector<8x512xf32>
    %250 = arith.mulf %248, %249 : vector<8x512xf32>
    %cst_6 = arith.constant dense<0.000000e+00> : vector<8xf32>
    %251 = vector.multi_reduction <add>, %250, %cst_6 [1] : vector<8x512xf32> to vector<8xf32>
    %252 = vector.shape_cast %251 : vector<8xf32> to vector<8x1xf32>
    %cst_7 = arith.constant 3.906250e-03 : f32
    %253 = vector.broadcast %cst_7 : f32 to vector<8x1xf32>
    %254 = arith.mulf %252, %253 : vector<8x1xf32>
    %255 = vector.broadcast %254 : vector<8x1xf32> to vector<8x512xf32>
    %256 = arith.subf %250, %255 : vector<8x512xf32>
    %257 = vector.broadcast %2 : vector<1x512xf32> to vector<8x512xf32>
    %258 = arith.mulf %256, %257 : vector<8x512xf32>
    %259 = arith.mulf %258, %258 : vector<8x512xf32>
    %cst_8 = arith.constant dense<0.000000e+00> : vector<8xf32>
    %260 = vector.multi_reduction <add>, %259, %cst_8 [1] : vector<8x512xf32> to vector<8xf32>
    %261 = vector.shape_cast %260 : vector<8xf32> to vector<8x1xf32>
    %cst_9 = arith.constant 3.906250e-03 : f32
    %262 = vector.broadcast %cst_9 : f32 to vector<8x1xf32>
    %263 = arith.mulf %261, %262 : vector<8x1xf32>
    %264 = vector.broadcast %254 : vector<8x1xf32> to vector<8x512xf32>
    %265 = arith.subf %250, %264 : vector<8x512xf32>
    %cst_10 = arith.constant 9.99999974E-6 : f32
    %266 = vector.broadcast %cst_10 : f32 to vector<8x1xf32>
    %267 = arith.addf %263, %266 : vector<8x1xf32>
    %268 = math.rsqrt %267 : vector<8x1xf32>
    %269 = vector.broadcast %268 : vector<8x1xf32> to vector<8x512xf32>
    %270 = arith.mulf %265, %269 : vector<8x512xf32>
    %c0_11 = arith.constant 0 : index
    %c0_12 = arith.constant 0 : index
    %271 = vector.load %arg4[%c0_11, %c0_12] : memref<8x1xf32, #tpu.memory_space<vmem>>, vector<8x1xf32>
    %272 = vector.broadcast %271 : vector<8x1xf32> to vector<8x512xf32>
    %273 = arith.mulf %270, %272 : vector<8x512xf32>
    %c0_13 = arith.constant 0 : index
    %c0_14 = arith.constant 0 : index
    %274 = vector.load %arg5[%c0_13, %c0_14] : memref<8x1xf32, #tpu.memory_space<vmem>>, vector<8x1xf32>
    %275 = vector.broadcast %274 : vector<8x1xf32> to vector<8x512xf32>
    %276 = arith.addf %273, %275 : vector<8x512xf32>
    %c0_15 = arith.constant 0 : index
    %c0_16 = arith.constant 0 : index
    %277 = vector.load %arg6[%c0_15, %c0_16] : memref<32x8xf32, #tpu.memory_space<vmem>>, vector<32x8xf32>
    %c0_17 = arith.constant 0 : index
    %c0_18 = arith.constant 0 : index
    %278 = vector.load %arg7[%c0_17, %c0_18] : memref<32x1xf32, #tpu.memory_space<vmem>>, vector<32x1xf32>
    %c0_19 = arith.constant 0 : index
    %c0_20 = arith.constant 0 : index
    %279 = vector.load %arg8[%c0_19, %c0_20] : memref<8x32xf32, #tpu.memory_space<vmem>>, vector<8x32xf32>
    %c0_21 = arith.constant 0 : index
    %c0_22 = arith.constant 0 : index
    %280 = vector.load %arg9[%c0_21, %c0_22] : memref<8x1xf32, #tpu.memory_space<vmem>>, vector<8x1xf32>
    %281 = vector.extract_strided_slice %276 {offsets = [0, 0], sizes = [8, 256], strides = [1, 1]} : vector<8x512xf32> to vector<8x256xf32>
    %cst_23 = arith.constant dense<0.000000e+00> : vector<32x256xf32>
    %282 = tpu.matmul %277, %281, %cst_23 {dimension_numbers = #tpu.dot_dimension_numbers<[1], [0], [0], [1], [0, 0, 1, 1], [], []>} : vector<32x8xf32>, vector<8x256xf32>, vector<32x256xf32> -> vector<32x256xf32>
    %283 = vector.broadcast %278 : vector<32x1xf32> to vector<32x256xf32>
    %284 = arith.addf %282, %283 : vector<32x256xf32>
    %cst_24 = arith.constant 5.000000e-01 : f32
    %285 = vector.broadcast %cst_24 : f32 to vector<32x256xf32>
    %286 = arith.mulf %285, %284 : vector<32x256xf32>
    %cst_25 = arith.constant 0.707106769 : f32
    %287 = vector.broadcast %cst_25 : f32 to vector<32x256xf32>
    %288 = arith.mulf %284, %287 : vector<32x256xf32>
    %289 = math.erf %288 : vector<32x256xf32>
    %cst_26 = arith.constant 1.000000e+00 : f32
    %290 = vector.broadcast %cst_26 : f32 to vector<32x256xf32>
    %291 = arith.addf %290, %289 : vector<32x256xf32>
    %292 = arith.mulf %286, %291 : vector<32x256xf32>
    %cst_27 = arith.constant dense<0.000000e+00> : vector<8x256xf32>
    %293 = tpu.matmul %279, %292, %cst_27 {dimension_numbers = #tpu.dot_dimension_numbers<[1], [0], [0], [1], [0, 0, 1, 1], [], []>} : vector<8x32xf32>, vector<32x256xf32>, vector<8x256xf32> -> vector<8x256xf32>
    %294 = vector.broadcast %280 : vector<8x1xf32> to vector<8x256xf32>
    %295 = arith.addf %293, %294 : vector<8x256xf32>
    %296 = vector.extract_strided_slice %124 {offsets = [0, 0], sizes = [8, 256], strides = [1, 1]} : vector<8x512xf32> to vector<8x256xf32>
    %297 = arith.addf %295, %296 : vector<8x256xf32>
    %c0_28 = arith.constant 0 : index
    %c0_29 = arith.constant 0 : index
    %c0_30 = arith.constant 0 : index
    %298 = vector.load %arg12[%c0_28, %c0_29, %c0_30] : memref<1x8x512xf32, #tpu.memory_space<vmem>>, vector<1x8x256xf32>
    %299 = vector.shape_cast %298 : vector<1x8x256xf32> to vector<8x256xf32>
    %300 = vector.shape_cast %297 : vector<8x256xf32> to vector<1x8x256xf32>
    tpu.vector_store %arg12[%c0_28, %c0_29, %c0_30], %300 {strides = array<i32>} : memref<1x8x512xf32, #tpu.memory_space<vmem>>, vector<1x8x256xf32>,
    %301 = vector.extract_strided_slice %276 {offsets = [0, 256], sizes = [8, 256], strides = [1, 1]} : vector<8x512xf32> to vector<8x256xf32>
    %cst_31 = arith.constant dense<0.000000e+00> : vector<32x256xf32>
    %302 = tpu.matmul %277, %301, %cst_31 {dimension_numbers = #tpu.dot_dimension_numbers<[1], [0], [0], [1], [0, 0, 1, 1], [], []>} : vector<32x8xf32>, vector<8x256xf32>, vector<32x256xf32> -> vector<32x256xf32>
    %303 = vector.broadcast %278 : vector<32x1xf32> to vector<32x256xf32>
    %304 = arith.addf %302, %303 : vector<32x256xf32>
    %cst_32 = arith.constant 5.000000e-01 : f32
    %305 = vector.broadcast %cst_32 : f32 to vector<32x256xf32>
    %306 = arith.mulf %305, %304 : vector<32x256xf32>
    %cst_33 = arith.constant 0.707106769 : f32
    %307 = vector.broadcast %cst_33 : f32 to vector<32x256xf32>
    %308 = arith.mulf %304, %307 : vector<32x256xf32>
    %309 = math.erf %308 : vector<32x256xf32>
    %cst_34 = arith.constant 1.000000e+00 : f32
    %310 = vector.broadcast %cst_34 : f32 to vector<32x256xf32>
    %311 = arith.addf %310, %309 : vector<32x256xf32>
    %312 = arith.mulf %306, %311 : vector<32x256xf32>
    %cst_35 = arith.constant dense<0.000000e+00> : vector<8x256xf32>
    %313 = tpu.matmul %279, %312, %cst_35 {dimension_numbers = #tpu.dot_dimension_numbers<[1], [0], [0], [1], [0, 0, 1, 1], [], []>} : vector<8x32xf32>, vector<32x256xf32>, vector<8x256xf32> -> vector<8x256xf32>
    %314 = vector.broadcast %280 : vector<8x1xf32> to vector<8x256xf32>
    %315 = arith.addf %313, %314 : vector<8x256xf32>
    %316 = vector.extract_strided_slice %124 {offsets = [0, 256], sizes = [8, 256], strides = [1, 1]} : vector<8x512xf32> to vector<8x256xf32>
    %317 = arith.addf %315, %316 : vector<8x256xf32>
    %c0_36 = arith.constant 0 : index
    %c0_37 = arith.constant 0 : index
    %c256 = arith.constant 256 : index
    %318 = vector.load %arg12[%c0_36, %c0_37, %c256] : memref<1x8x512xf32, #tpu.memory_space<vmem>>, vector<1x8x256xf32>
    %319 = vector.shape_cast %318 : vector<1x8x256xf32> to vector<8x256xf32>
    %320 = vector.shape_cast %317 : vector<8x256xf32> to vector<1x8x256xf32>
    tpu.vector_store %arg12[%c0_36, %c0_37, %c256], %320 {strides = array<i32>} : memref<1x8x512xf32, #tpu.memory_space<vmem>>, vector<1x8x256xf32>,
    return
  }
  func.func @transform_0(%arg0: i32) -> (i32, i32, i32) {
    %c0_i32 = arith.constant 0 : i32
    %c0_i32_0 = arith.constant 0 : i32
    %c0_i32_1 = arith.constant 0 : i32
    return %arg0, %c0_i32, %c0_i32_0 : i32, i32, i32
  }
  func.func @transform_1(%arg0: i32) -> (i32, i32) {
    %c0_i32 = arith.constant 0 : i32
    %c0_i32_0 = arith.constant 0 : i32
    %c0_i32_1 = arith.constant 0 : i32
    return %c0_i32, %c0_i32_0 : i32, i32
  }
  func.func @transform_2(%arg0: i32) -> (i32, i32) {
    %c0_i32 = arith.constant 0 : i32
    %c0_i32_0 = arith.constant 0 : i32
    %c0_i32_1 = arith.constant 0 : i32
    return %c0_i32, %c0_i32_0 : i32, i32
  }
  func.func @transform_3(%arg0: i32) -> (i32, i32) {
    %c0_i32 = arith.constant 0 : i32
    %c0_i32_0 = arith.constant 0 : i32
    %c0_i32_1 = arith.constant 0 : i32
    return %c0_i32, %c0_i32_0 : i32, i32
  }
  func.func @transform_4(%arg0: i32) -> (i32, i32) {
    %c0_i32 = arith.constant 0 : i32
    %c0_i32_0 = arith.constant 0 : i32
    %c0_i32_1 = arith.constant 0 : i32
    return %c0_i32, %c0_i32_0 : i32, i32
  }
  func.func @transform_5(%arg0: i32) -> (i32, i32) {
    %c0_i32 = arith.constant 0 : i32
    %c0_i32_0 = arith.constant 0 : i32
    %c0_i32_1 = arith.constant 0 : i32
    return %c0_i32, %c0_i32_0 : i32, i32
  }
  func.func @transform_6(%arg0: i32) -> (i32, i32) {
    %c0_i32 = arith.constant 0 : i32
    %c0_i32_0 = arith.constant 0 : i32
    %c0_i32_1 = arith.constant 0 : i32
    return %c0_i32, %c0_i32_0 : i32, i32
  }
  func.func @transform_7(%arg0: i32) -> (i32, i32) {
    %c0_i32 = arith.constant 0 : i32
    %c0_i32_0 = arith.constant 0 : i32
    %c0_i32_1 = arith.constant 0 : i32
    return %c0_i32, %c0_i32_0 : i32, i32
  }
  func.func @transform_8(%arg0: i32) -> (i32, i32) {
    %c0_i32 = arith.constant 0 : i32
    %c0_i32_0 = arith.constant 0 : i32
    %c0_i32_1 = arith.constant 0 : i32
    return %c0_i32, %c0_i32_0 : i32, i32
  }
  func.func @transform_9(%arg0: i32) -> (i32, i32) {
    %c0_i32 = arith.constant 0 : i32
    %c0_i32_0 = arith.constant 0 : i32
    %c0_i32_1 = arith.constant 0 : i32
    return %c0_i32, %c0_i32_0 : i32, i32
  }
  func.func @transform_10(%arg0: i32) -> (i32, i32) {
    %c0_i32 = arith.constant 0 : i32
    %c0_i32_0 = arith.constant 0 : i32
    %c0_i32_1 = arith.constant 0 : i32
    return %c0_i32, %c0_i32_0 : i32, i32
  }
  func.func @transform_11(%arg0: i32) -> (i32, i32, i32) {
    %c0_i32 = arith.constant 0 : i32
    %c0_i32_0 = arith.constant 0 : i32
    %c0_i32_1 = arith.constant 0 : i32
    return %arg0, %c0_i32, %c0_i32_0 : i32, i32, i32
  }
}

</mosaic_0001>

<bundles_post_ra>
// kernel: tpu_custom_call.1
= control target key start
LH: loop header
LB: loop body
LE: loop exit
PB: predicated region body
PF: predicated region fallthrough
CT: control target
= control target key end

     0   :  { %s5557_s0 = inlined_call_operand.hbm [shape: f32[2,8,512], index: 0, kind: input, shape index: {}]   ;;  %s5558_s1 = inlined_call_operand.hbm [shape: f32[1,512], index: 1, kind: input, shape index: {}]   ;;  %s5559_s2 = inlined_call_operand.hbm [shape: f32[8,49], index: 2, kind: input, shape index: {}]   ;;  %s5560_s3 = inlined_call_operand.hbm [shape: f32[8,1], index: 3, kind: input, shape index: {}]   ;;  %s5561_s4 = inlined_call_operand.hbm [shape: f32[8,1], index: 4, kind: input, shape index: {}]   ;;  %s5562_s5 = inlined_call_operand.hbm [shape: f32[32,8], index: 5, kind: input, shape index: {}]   ;;  %s5563_s6 = inlined_call_operand.hbm [shape: f32[32,1], index: 6, kind: input, shape index: {}]   ;;  %s5564_s7 = inlined_call_operand.hbm [shape: f32[8,32], index: 7, kind: input, shape index: {}]   ;;  %s5565_s8 = inlined_call_operand.hbm [shape: f32[8,1], index: 8, kind: input, shape index: {}]   ;;  %s5566_s9 = inlined_call_operand.hbm [shape: f32[32,1], index: 9, kind: input, shape index: {}]   ;;  %s5567_s10 = inlined_call_operand.hbm [shape: f32[32,1], index: 10, kind: input, shape index: {}]   ;;  %s5568_s11 = inlined_call_operand.hbm [shape: f32[2,8,512], index: 11, kind: output, shape index: {}]  }
   0x1   :  { %5674 = sst [smem:[#allocation114_spill]] %s5557_s0 }
   0x2   :  { %5675 = sst [smem:[#allocation115_spill]] %s5558_s1 }
   0x3   :  { %5676 = sst [smem:[#allocation116_spill]] %s5560_s3 }
   0x4   :  { %5677 = sst [smem:[#allocation117_spill]] %s5568_s11 }
   0x5   :  { %16 = vsyncpa [#allocation3], 0 }
   0x6   :  { %18 = vsyncpa [#allocation3 + $0x1], 0 }
   0x7   :  { %19 = vsyncpa [#allocation6], 0 }
   0x8   :  { %20 = vsyncpa [#allocation9], 0 }
   0x9   :  { %21 = vsyncpa [#allocation12], 0 }
   0xa   :  { %22 = vsyncpa [#allocation15], 0 }
   0xb   :  { %23 = vsyncpa [#allocation18], 0 }
   0xc   :  { %24 = vsyncpa [#allocation4], 0 }
   0xd   :  { %26 = vsyncpa [#allocation4 + $0x1], 0  ;;  %s3396_s17 = smov 0   ;;  %s3398_s18 = smov 0  }
   0xe   :  { %s3400_s19 = smov 0   ;;  %s3402_s20 = smov 0  }
   0xf LB: > { %s3227_s21 = smov [#allocation5]   ;;  %s3417_s23 = sadd.s32 4294967295, %s3225_s20   ;;  %s3225_s20 = sphi %s3402_s20, %s5889_s20   ;;  %s3221_s19 = sphi %s3400_s19, %s5888_s19   ;;  %s3217_s18 = sphi %s3398_s18, %s5887_s18   ;;  %s3213_s17 = sphi %s3396_s17, %s5886_s17  }
  0x10   : > { %s312_s22 = sshll.u32 %s3227_s21, 4  ;;  %p2434_p0 = scmp.ge.s32.totalorder %s3225_s20, 1  ;;  %s313_s22 = int_to_ptr.vmem [resolvable:$true] %s312_s22 }
  0x11   : > { %p5569_p1 = scmp.eq.s32.totalorder %s3417_s23, 0  ;;  %p299_p2 = scmp.lt.s32.totalorder %s3225_s20, 3 }
  0x12   : > { %s3228_s25 = smov [#allocation8]   ;;  %s3229_s27 = smov [#allocation11]  }
  0x13   : > { %p3422_p3 = pnand %p2434_p0, %p299_p2  ;;  %s334_s26 = sshll.u32 %s3228_s25, 4  ;;  %s3429_s26 = int_to_ptr.vmem [resolvable:$true] %s334_s26 }
  0x14   : > { %s355_s28 = sshll.u32 %s3229_s27, 4  ;;  %s5681_s1 = sld [smem:[#allocation115_spill]]  ;;  %s3437_s28 = int_to_ptr.vmem [resolvable:$true] %s355_s28 }
  0x15   : > { %s5678_s24 = scalar_select %p3422_p3, 1, 0 }
  0x16   : > { %p2539_p5 = pneg %p3422_p3 }
  0x17   : > { %5679 = sst [smem:[#allocation28_spill]] %s5678_s24 }
  0x18   : > { %p3433_p6 = pnand %p2539_p5, %p5569_p1 }
  0x1a   : > { %s2829_s13 = scalar_lea.hbm %s5681_s1, 64  ;;  %p3447_p8 = pneg %p3433_p6 }
  0x1b   : > { %p2830_p7 = scmp.ne.s32.totalorder %s5681_s1, %s2829_s13  ;;  %p2836_p11 = scmp.lt.u32.totalorder %s2829_s13, %s5681_s1 }
  0x1d   : > { %p2832_p9 = pnand %p3447_p8, %p2830_p7 }
  0x1f   : > { %p2833_p10 = pneg %p2832_p9 }
  0x21   : > { %p2838_p12 = pnand %p2836_p11, %p2833_p10 }
  0x23   : > { %2841 = shalt.err (!%p2838_p12)
}
  0x24   : > { %s2842_s27 = scalar_lea.vmem %s313_s22, 64  ;;  %p2850_p5 = scmp.lt.s32.totalorder %s313_s22, %s313_s22 }
  0x25   : > { %p2843_p13 = scmp.ne.s32.totalorder %s313_s22, %s2842_s27  ;;  %p2851_p4 = scmp.lt.s32.totalorder %s2842_s27, %s2842_s27 }
  0x27   : > { %p2845_p0 = pnand %p2843_p13, %p3447_p8  ;;  %p2852_p1 = por %p2851_p4, %p2850_p5 }
  0x29   : > { %p2846_p2 = pneg %p2845_p0 }
  0x2b   : > { %p2853_p3 = pnand %p2852_p1, %p2846_p2 }
  0x2d   : > { %2856 = shalt.err (!%p2853_p3)
}
  0x2e   : > { %2542 = dma.hbm_to_vmem [thread:$0]  (!%p3433_p6), %s5681_s1, 64, %s313_s22, [#allocation6]  }
  0x2f   : > { %s5683_s3 = sld [smem:[#allocation116_spill]] }
  0x35   : > { %s2857_s15 = scalar_lea.hbm %s5683_s3, 128 }
  0x36   : > { %p2858_p7 = scmp.ne.s32.totalorder %s5683_s3, %s2857_s15  ;;  %p2864_p1 = scmp.lt.u32.totalorder %s2857_s15, %s5683_s3 }
  0x38   : > { %p2860_p9 = pnand %p2858_p7, %p3447_p8 }
  0x3a   : > { %p2861_p4 = pneg %p2860_p9 }
  0x3c   : > { %p2866_p3 = pnand %p2864_p1, %p2861_p4 }
  0x3e   : > { %2869 = shalt.err (!%p2866_p3)
}
  0x3f   : > { %s2870_s22 = scalar_lea.vmem %s3429_s26, 128  ;;  %p2878_p13 = scmp.lt.s32.totalorder %s3429_s26, %s3429_s26 }
  0x40   : > { %p2871_p10 = scmp.ne.s32.totalorder %s3429_s26, %s2870_s22  ;;  %p2879_p0 = scmp.lt.s32.totalorder %s2870_s22, %s2870_s22 }
  0x42   : > { %p2873_p11 = pnand %p2871_p10, %p3447_p8  ;;  %p2880_p2 = por %p2879_p0, %p2878_p13 }
  0x44   : > { %p2874_p12 = pneg %p2873_p11 }
  0x46   : > { %p2881_p5 = pnand %p2880_p2, %p2874_p12 }
  0x48   : > { %2884 = shalt.err (!%p2881_p5)
}
  0x49   : > { %2548 = dma.hbm_to_vmem [thread:$0]  (!%p3433_p6), %s5683_s3, 128, %s3429_s26, [#allocation9]  }
  0x4a   : > { %s2885_s14 = scalar_lea.hbm %s5562_s5, 512 }
  0x4b   : > { %p2886_p7 = scmp.ne.s32.totalorder %s5562_s5, %s2885_s14  ;;  %p2892_p1 = scmp.lt.u32.totalorder %s2885_s14, %s5562_s5 }
  0x4d   : > { %p2888_p9 = pnand %p2886_p7, %p3447_p8 }
  0x4f   : > { %p2889_p4 = pneg %p2888_p9 }
  0x51   : > { %p2894_p3 = pnand %p2892_p1, %p2889_p4 }
  0x53   : > { %2897 = shalt.err (!%p2894_p3)
}
  0x54   : > { %s2898_s26 = scalar_lea.vmem %s3437_s28, 512  ;;  %p2906_p13 = scmp.lt.s32.totalorder %s3437_s28, %s3437_s28 }
  0x55   : > { %p2899_p10 = scmp.ne.s32.totalorder %s3437_s28, %s2898_s26  ;;  %p2907_p0 = scmp.lt.s32.totalorder %s2898_s26, %s2898_s26 }
  0x57   : > { %p2901_p11 = pnand %p2899_p10, %p3447_p8  ;;  %p2908_p2 = por %p2907_p0, %p2906_p13 }
  0x59   : > { %p2902_p12 = pneg %p2901_p11 }
  0x5b   : > { %p2909_p5 = pnand %p2908_p2, %p2902_p12 }
  0x5d   : > { %2912 = shalt.err (!%p2909_p5)
}
  0x5e   : > { %s3230_s22 = smov 128   ;;  %s3231_s11 = smov 8  }
  0x5f   : > { %2554 = dma.hbm_to_vmem [thread:$0]  (!%p3433_p6), %s5562_s5, 512, %s3437_s28, [#allocation12], %s3230_s22, %s3230_s22, %s3231_s11  }
  0x60   : > { %s3232_s13 = smov [#allocation14]   ;;  %s3233_s15 = smov [#allocation17]  }
  0x61   : > { %s382_s14 = sshll.u32 %s3232_s13, 4  ;;  %s403_s21 = sshll.u32 %s3233_s15, 4  ;;  %s383_s14 = int_to_ptr.vmem [resolvable:$true] %s382_s14  ;;  %s404_s21 = int_to_ptr.vmem [resolvable:$true] %s403_s21 }
  0x62   : > { %s2913_s26 = scalar_lea.hbm %s5564_s7, 128 }
  0x63   : > { %p2914_p7 = scmp.ne.s32.totalorder %s5564_s7, %s2913_s26  ;;  %p2920_p1 = scmp.lt.u32.totalorder %s2913_s26, %s5564_s7 }
  0x65   : > { %p2916_p9 = pnand %p2914_p7, %p3447_p8 }
  0x67   : > { %p2917_p4 = pneg %p2916_p9 }
  0x69   : > { %p2922_p3 = pnand %p2920_p1, %p2917_p4 }
  0x6b   : > { %2925 = shalt.err (!%p2922_p3)
}
  0x6c   : > { %s2926_s28 = scalar_lea.vmem %s383_s14, 128  ;;  %p2934_p13 = scmp.lt.s32.totalorder %s383_s14, %s383_s14 }
  0x6d   : > { %p2927_p10 = scmp.ne.s32.totalorder %s383_s14, %s2926_s28  ;;  %p2935_p0 = scmp.lt.s32.totalorder %s2926_s28, %s2926_s28 }
  0x6f   : > { %p2929_p11 = pnand %p2927_p10, %p3447_p8  ;;  %p2936_p2 = por %p2935_p0, %p2934_p13 }
  0x71   : > { %p2930_p12 = pneg %p2929_p11 }
  0x73   : > { %p2937_p5 = pnand %p2936_p2, %p2930_p12 }
  0x75   : > { %2940 = shalt.err (!%p2937_p5)
}
  0x76   : > { %2560 = dma.hbm_to_vmem [thread:$0]  (!%p3433_p6), %s5564_s7, 128, %s383_s14, [#allocation15]  }
  0x77   : > { %s2941_s30 = scalar_lea.hbm %s5566_s9, 512 }
  0x78   : > { %p2942_p7 = scmp.ne.s32.totalorder %s5566_s9, %s2941_s30  ;;  %p2948_p1 = scmp.lt.u32.totalorder %s2941_s30, %s5566_s9 }
  0x7a   : > { %p2944_p9 = pnand %p2942_p7, %p3447_p8 }
  0x7c   : > { %p2945_p4 = pneg %p2944_p9 }
  0x7e   : > { %p2950_p3 = pnand %p2948_p1, %p2945_p4 }
  0x80   : > { %2953 = shalt.err (!%p2950_p3)
}
  0x81   : > { %s2954_s27 = scalar_lea.vmem %s404_s21, 512  ;;  %p2962_p13 = scmp.lt.s32.totalorder %s404_s21, %s404_s21 }
  0x82   : > { %p2955_p10 = scmp.ne.s32.totalorder %s404_s21, %s2954_s27  ;;  %p2963_p0 = scmp.lt.s32.totalorder %s2954_s27, %s2954_s27 }
  0x84   : > { %p2957_p11 = pnand %p2955_p10, %p3447_p8  ;;  %p2964_p2 = por %p2963_p0, %p2962_p13 }
  0x86   : > { %p2958_p12 = pneg %p2957_p11 }
  0x88   : > { %p2965_p5 = pnand %p2964_p2, %p2958_p12 }
  0x8a   : > { %2968 = shalt.err (!%p2965_p5)
}
  0x8b   : > { %2566 = dma.hbm_to_vmem [thread:$0]  (!%p3433_p6), %s5566_s9, 512, %s404_s21, [#allocation18], %s3230_s22, %s3230_s22, %s3231_s11  }
  0x8c   : > { %s3234_s28 = smov [#allocation7]   ;;  %s3235_s3 = smov [#allocation10]  }
  0x8d   : > { %s323_s1 = sshll.u32 %s3234_s28, 4  ;;  %s345_s0 = sshll.u32 %s3235_s3, 4  ;;  %s324_s1 = int_to_ptr.vmem [resolvable:$true] %s323_s1  ;;  %s346_s0 = int_to_ptr.vmem [resolvable:$true] %s345_s0 }
  0x8e   : > { %s2969_s12 = scalar_lea.hbm %s5559_s2, 128 }
  0x8f   : > { %p2970_p7 = scmp.ne.s32.totalorder %s5559_s2, %s2969_s12  ;;  %p2976_p1 = scmp.lt.u32.totalorder %s2969_s12, %s5559_s2 }
  0x91   : > { %p2972_p9 = pnand %p2970_p7, %p3447_p8 }
  0x93   : > { %p2973_p4 = pneg %p2972_p9 }
  0x95   : > { %p2978_p3 = pnand %p2976_p1, %p2973_p4 }
  0x97   : > { %2981 = shalt.err (!%p2978_p3)
}
  0x98   : > { %s2982_s21 = scalar_lea.vmem %s324_s1, 128  ;;  %p2990_p13 = scmp.lt.s32.totalorder %s324_s1, %s324_s1 }
  0x99   : > { %p2983_p10 = scmp.ne.s32.totalorder %s324_s1, %s2982_s21  ;;  %p2991_p0 = scmp.lt.s32.totalorder %s2982_s21, %s2982_s21 }
  0x9b   : > { %p2985_p11 = pnand %p2983_p10, %p3447_p8  ;;  %p2992_p2 = por %p2991_p0, %p2990_p13 }
  0x9d   : > { %p2986_p12 = pneg %p2985_p11 }
  0x9f   : > { %p2993_p5 = pnand %p2992_p2, %p2986_p12 }
  0xa1   : > { %2996 = shalt.err (!%p2993_p5)
}
  0xa2   : > { %2545 = dma.hbm_to_vmem [thread:$0]  (!%p3433_p6), %s5559_s2, 128, %s324_s1, [#allocation6]  }
  0xa3   : > { %s2997_s24 = scalar_lea.hbm %s5561_s4, 128 }
  0xa4   : > { %p2998_p7 = scmp.ne.s32.totalorder %s5561_s4, %s2997_s24  ;;  %p3004_p1 = scmp.lt.u32.totalorder %s2997_s24, %s5561_s4 }
  0xa6   : > { %p3000_p9 = pnand %p2998_p7, %p3447_p8 }
  0xa8   : > { %p3001_p4 = pneg %p3000_p9 }
  0xaa   : > { %p3006_p3 = pnand %p3004_p1, %p3001_p4 }
  0xac   : > { %3009 = shalt.err (!%p3006_p3)
}
  0xad   : > { %s3010_s25 = scalar_lea.vmem %s346_s0, 128  ;;  %p3018_p13 = scmp.lt.s32.totalorder %s346_s0, %s346_s0 }
  0xae   : > { %p3011_p10 = scmp.ne.s32.totalorder %s346_s0, %s3010_s25  ;;  %p3019_p0 = scmp.lt.s32.totalorder %s3010_s25, %s3010_s25 }
  0xb0   : > { %p3013_p11 = pnand %p3011_p10, %p3447_p8  ;;  %p3020_p2 = por %p3019_p0, %p3018_p13 }
  0xb2   : > { %p3014_p12 = pneg %p3013_p11 }
  0xb4   : > { %p3021_p5 = pnand %p3020_p2, %p3014_p12 }
  0xb6   : > { %3024 = shalt.err (!%p3021_p5)
}
  0xb7   : > { %2551 = dma.hbm_to_vmem [thread:$0]  (!%p3433_p6), %s5561_s4, 128, %s346_s0, [#allocation9]  }
  0xb8   : > { %s3236_s21 = smov [#allocation13]   ;;  %s3237_s26 = smov [#allocation16]  }
  0xb9   : > { %s368_s14 = sshll.u32 %s3236_s21, 4  ;;  %s393_s28 = sshll.u32 %s3237_s26, 4  ;;  %s369_s14 = int_to_ptr.vmem [resolvable:$true] %s368_s14  ;;  %s394_s28 = int_to_ptr.vmem [resolvable:$true] %s393_s28 }
  0xba   : > { %s3025_s30 = scalar_lea.hbm %s5563_s6, 512 }
  0xbb   : > { %p3026_p7 = scmp.ne.s32.totalorder %s5563_s6, %s3025_s30  ;;  %p3032_p1 = scmp.lt.u32.totalorder %s3025_s30, %s5563_s6 }
  0xbd   : > { %p3028_p9 = pnand %p3026_p7, %p3447_p8 }
  0xbf   : > { %p3029_p4 = pneg %p3028_p9 }
  0xc1   : > { %p3034_p3 = pnand %p3032_p1, %p3029_p4 }
  0xc3   : > { %3037 = shalt.err (!%p3034_p3)
}
  0xc4   : > { %s3038_s0 = scalar_lea.vmem %s369_s14, 512  ;;  %p3046_p13 = scmp.lt.s32.totalorder %s369_s14, %s369_s14 }
  0xc5   : > { %p3039_p10 = scmp.ne.s32.totalorder %s369_s14, %s3038_s0  ;;  %p3047_p0 = scmp.lt.s32.totalorder %s3038_s0, %s3038_s0 }
  0xc7   : > { %p3041_p11 = pnand %p3039_p10, %p3447_p8  ;;  %p3048_p2 = por %p3047_p0, %p3046_p13 }
  0xc9   : > { %p3042_p12 = pneg %p3041_p11 }
  0xcb   : > { %p3049_p5 = pnand %p3048_p2, %p3042_p12 }
  0xcd   : > { %3052 = shalt.err (!%p3049_p5)
}
  0xce   : > { %2557 = dma.hbm_to_vmem [thread:$0]  (!%p3433_p6), %s5563_s6, 512, %s369_s14, [#allocation12], %s3230_s22, %s3230_s22, %s3231_s11  }
  0xcf   : > { %s3053_s3 = scalar_lea.hbm %s5565_s8, 128 }
  0xd0   : > { %p3054_p7 = scmp.ne.s32.totalorder %s5565_s8, %s3053_s3  ;;  %p3060_p1 = scmp.lt.u32.totalorder %s3053_s3, %s5565_s8 }
  0xd2   : > { %p3056_p9 = pnand %p3054_p7, %p3447_p8 }
  0xd4   : > { %p3057_p4 = pneg %p3056_p9 }
  0xd6   : > { %p3062_p3 = pnand %p3060_p1, %p3057_p4 }
  0xd8   : > { %3065 = shalt.err (!%p3062_p3)
}
  0xd9   : > { %s3066_s15 = scalar_lea.vmem %s394_s28, 128  ;;  %p3074_p13 = scmp.lt.s32.totalorder %s394_s28, %s394_s28 }
  0xda   : > { %p3067_p10 = scmp.ne.s32.totalorder %s394_s28, %s3066_s15  ;;  %p3075_p0 = scmp.lt.s32.totalorder %s3066_s15, %s3066_s15 }
  0xdc   : > { %p3069_p11 = pnand %p3067_p10, %p3447_p8  ;;  %p3076_p2 = por %p3075_p0, %p3074_p13 }
  0xde   : > { %p3070_p12 = pneg %p3069_p11 }
  0xe0   : > { %p3077_p5 = pnand %p3076_p2, %p3070_p12 }
  0xe2   : > { %3080 = shalt.err (!%p3077_p5)
}
  0xe3   : > { %2563 = dma.hbm_to_vmem [thread:$0]  (!%p3433_p6), %s5565_s8, 128, %s394_s28, [#allocation15]  }
  0xe4   : > { %s3238_s0 = smov [#allocation19]   ;;  %s3081_s26 = scalar_lea.hbm %s5567_s10, 512 }
  0xe5   : > { %s416_s1 = sshll.u32 %s3238_s0, 4  ;;  %p3082_p7 = scmp.ne.s32.totalorder %s5567_s10, %s3081_s26  ;;  %s417_s1 = int_to_ptr.vmem [resolvable:$true] %s416_s1 }
  0xe6   : > { %p3088_p1 = scmp.lt.u32.totalorder %s3081_s26, %s5567_s10 }
  0xe7   : > { %p3084_p9 = pnand %p3082_p7, %p3447_p8 }
  0xe9   : > { %p3085_p4 = pneg %p3084_p9 }
  0xeb   : > { %p3090_p3 = pnand %p3088_p1, %p3085_p4 }
  0xed   : > { %3093 = shalt.err (!%p3090_p3)
}
  0xee   : > { %s3094_s28 = scalar_lea.vmem %s417_s1, 512  ;;  %p3102_p13 = scmp.lt.s32.totalorder %s417_s1, %s417_s1 }
  0xef   : > { %p3095_p10 = scmp.ne.s32.totalorder %s417_s1, %s3094_s28  ;;  %p3103_p0 = scmp.lt.s32.totalorder %s3094_s28, %s3094_s28 }
  0xf1   : > { %p3097_p11 = pnand %p3095_p10, %p3447_p8  ;;  %p3104_p2 = por %p3103_p0, %p3102_p13 }
  0xf3   : > { %p3098_p12 = pneg %p3097_p11 }
  0xf5   : > { %p3105_p5 = pnand %p3104_p2, %p3098_p12 }
  0xf7   : > { %3108 = shalt.err (!%p3105_p5)
}
  0xf8   : > { %2569 = dma.hbm_to_vmem [thread:$0]  (!%p3433_p6), %s5567_s10, 512, %s417_s1, [#allocation18], %s3230_s22, %s3230_s22, %s3231_s11  }
  0xf9   : > { %s2433_s29 = sadd.s32 4294967294, %s3225_s20   ;;  %s3649_s16 = sadd.s32 1, %s3225_s20  }
  0xfa   : > { %s36_s14 = ssub.s32 %s3225_s20, %s3649_s16  ;;  %s39_s25 = sadd.s32 1, %s3221_s19 }
  0xfb   : > { %p37_p8 = scmp.eq.s32.totalorder %s36_s14, 0  ;;  %p46_p7 = scmp.ne.s32.totalorder %s3221_s19, %s3217_s18 }
  0xfc   : > { %p47_p9 = scmp.eq.s32.totalorder %s3225_s20, 0  ;;  %p52_p4 = scmp.ne.s32.totalorder %s3217_s18, %s3213_s17 }
  0xfd   : > { %s3660_s0 = scalar_select %p37_p8, %s3221_s19, %s39_s25  }
  0xfe   : > { %p3662_p1 = por %p47_p9, %p46_p7  ;;  %p5685_p3 = scmp.eq.s32.totalorder %s3417_s23, 0 }
  0xff   : > { %p286_p10 = scmp.eq.s32.totalorder %s3417_s23, 1  ;;  %p292_p11 = scmp.eq.s32.totalorder %s2433_s29, 1 }
 0x100   : > { %p3668_p6 = por %p5685_p3, %p52_p4  ;;  %p2588_p12 = scmp.lt.s32.totalorder %s3225_s20, 2 }
 0x101   : > { %s430_s11 = sand.u32 1, %s3221_s19   ;;  %p3675_p13 = por %p286_p10, %p46_p7 }
 0x102   : > { %p3679_p0 = por %p292_p11, %p52_p4  ;;  %s2446_s26 = sshll.u32 %s430_s11, 5 }
 0x103   : > { %s5687_s1 = scalar_select %p3675_p13, 1, 0 }
 0x104   : > { %s5688_s21 = scalar_select %p3679_p0, 1, 0 }
 0x105   : > { %s2477_s3 = sshll.u32 %s3225_s20, 9  ;;  %s5689_s12 = sld [smem:[#allocation114_spill]] }
 0x106   : > { %s434_s13 = scalar_lea.vmem [#allocation2], %s2446_s26  ;;  %p3693_p2 = pnand %p2588_p12, %p3662_p1 }
 0x107   : > { %s442_s15 = sshll.u32 %s434_s13, 4  ;;  %s431_s14 = scalar_lea.sflag [#allocation3], %s430_s11  ;;  %s3689_s15 = int_to_ptr.vmem [resolvable:$true] %s442_s15 }
 0x108   : > { %p3111_p8 = pneg %p3693_p2 }
 0x10b   : > { %s3687_s28 = scalar_lea.hbm %s5689_s12, %s2477_s3  ;;  %s3114_s24 = scalar_lea.hbm %s5689_s12, 1024 }
 0x10c   : > { %s3109_s25 = scalar_lea.hbm %s3687_s28, 512  ;;  %p3115_p4 = scmp.lt.u32.totalorder %s3687_s28, %s5689_s12 }
 0x10d   : > { %p3110_p5 = scmp.ne.s32.totalorder %s3687_s28, %s3109_s25  ;;  %p3116_p1 = scmp.lt.u32.totalorder %s3114_s24, %s3109_s25 }
 0x10e   : > { %p3118_p10 = scmp.lt.u32.totalorder %s3109_s25, %s3687_s28 }
 0x10f   : > { %p3112_p7 = pnand %p3111_p8, %p3110_p5  ;;  %p3117_p3 = por %p3116_p1, %p3115_p4 }
 0x111   : > { %p3113_p9 = pneg %p3112_p7  ;;  %p3119_p11 = por %p3118_p10, %p3117_p3 }
 0x113   : > { %p3120_p12 = pnand %p3119_p11, %p3113_p9 }
 0x115   : > { %3123 = shalt.err (!%p3120_p12)
}
 0x116   : > { %s3124_s11 = scalar_lea.vmem %s3689_s15, 512  ;;  %s3239_s13 = smov [#allocation2]  }
 0x117   : > { %p3125_p5 = scmp.ne.s32.totalorder %s3689_s15, %s3124_s11  ;;  %s3129_s26 = sshll.u32 %s3239_s13, 4  ;;  %s3130_s26 = int_to_ptr.vmem [resolvable:$false] %s3129_s26 }
 0x118   : > { %s3131_s3 = scalar_lea.vmem %s3130_s26, 1024  ;;  %p3132_p13 = scmp.lt.s32.totalorder %s3689_s15, %s3130_s26 }
 0x119   : > { %p3127_p7 = pnand %p3125_p5, %p3111_p8  ;;  %p3133_p4 = scmp.lt.s32.totalorder %s3131_s3, %s3124_s11 }
 0x11b   : > { %p3128_p0 = pneg %p3127_p7  ;;  %p3134_p1 = por %p3133_p4, %p3132_p13 }
 0x11d   : > { %p3135_p3 = pnand %p3134_p1, %p3128_p0 }
 0x11f   : > { %3138 = shalt.err (!%p3135_p3)
}
 0x120   : > { %2573 = dma.hbm_to_vmem [thread:$0]  (!%p3693_p2), %s3687_s28, 512, %s3689_s15, %s431_s14  }
 0x121   : > { %s5691_s25 = sld [smem:[#allocation28_spill]] }
 0x127   : > { %p5692_p9 = scmp.ne.s32.totalorder %s5691_s25, 0 }
 0x129   : > { %451 = sbr.rel (%p5692_p9) target bundleno = 2065 (0x811), region = 64 }
 0x130   : > { %s3725_s24 = sand.u32 1, %s3217_s18  }
 0x131   : > { %s5575_s27 = sshll.u32 %s3725_s24, 5  ;;  %s454_s30 = scalar_lea.sflag [#allocation3], %s3725_s24 }
 0x132   : > { %s3731_s11 = scalar_lea.vmem [#allocation2], %s5575_s27 }
 0x133   : > { %3184 = dma.done.wait (%p3668_p6), %s454_s30, 512  }
 0x134   : > { %3186 = vsyncadd (%p3668_p6), %s454_s30, 4294966784  ;;  %p5693_p13 = scmp.eq.s32.totalorder %s3417_s23, 0 }
 0x136   : > { %3188 = dma.done.wait (%p5693_p13), [#allocation6], 192   ;;  %p5694_p0 = pmov %p5693_p13 }
 0x138   : > { %3190 = vsyncadd (%p5694_p0), [#allocation6], 4294967104  ;;  %p5695_p2 = pmov %p5694_p0 }
 0x139   : > { %p5696_p8 = pmov %p5694_p0 }
 0x13a   : > { %3192 = dma.done.wait (%p5695_p2), [#allocation9], 256  }
 0x13b   : > { %3194 = vsyncadd (%p5696_p8), [#allocation9], 4294967040  ;;  %p5697_p10 = pmov %p5694_p0 }
 0x13c   : > { %p5698_p11 = pmov %p5694_p0 }
 0x13d   : > { %3196 = dma.done.wait (%p5697_p10), [#allocation12], 1024  }
 0x13e   : > { %3198 = vsyncadd (%p5698_p11), [#allocation12], 4294966272  ;;  %p5699_p6 = pmov %p5694_p0 }
 0x13f   : > { %p5700_p12 = pmov %p5694_p0 }
 0x140   : > { %3200 = dma.done.wait (%p5699_p6), [#allocation15], 256  }
 0x141   : > { %3202 = vsyncadd (%p5700_p12), [#allocation15], 4294967040  ;;  %p5701_p5 = pmov %p5694_p0 }
 0x142   : > { %p5702_p7 = pmov %p5694_p0 }
 0x143   : > { %3204 = dma.done.wait (%p5701_p5), [#allocation18], 1024  }
 0x144   : > { %3206 = vsyncadd (%p5702_p7), [#allocation18], 4294966272  ;;  %v3240_v0 = vmov 2   ;;  %v5578_v1 = vmov 0   ;;  %v3758_v2 = vld [vmem:[#allocation7] sm:$0xff]  ;;  %v3242_v3 = vmov 3  }
 0x145   : > { %2741 = vset.pattern.permute.xlu1 %v3240_v0  ;;  %2739 = vset.pattern.permute.xlu0 %v5578_v1  ;;  %v3243_v4 = vmov 1   ;;  %v3765_v5 = vld [vmem:[%s3731_s11 + $0x8] sm:$0xff]  ;;  %v3768_v6 = vld [vmem:[%s3731_s11] sm:$0xff]  ;;  %s3244_s22 = smov 127   ;;  %v3245_v7 = vmov 4   ;;  %v3773_v8 = vld [vmem:[%s3731_s11 + $0x10] sm:$0xff] }
 0x146   : > { %596 = vperm.xlu1 %2741, %v3758_v2   ;;  %544 = vperm.xlu0 %2739, %v3758_v2   ;;  %v3778_v9 = vld [vmem:[%s3731_s11 + $0x18] sm:$0xff]  ;;  %s3246_s28 = smov 126   ;;  %v3247_v10 = vmov 5   ;;  %s3248_s15 = smov 125   ;;  %v3249_v11 = vmov 6   ;;  %v3251_v12 = vmov 7  }
 0x147   : > { %s3250_s29 = smov 124   ;;  %s3252_s14 = smov 123   ;;  %v3253_v13 = vmov 8   ;;  %v3255_v14 = vmov 9   ;;  %v3257_v15 = vmov 10   ;;  %v3259_v16 = vmov 11  }
 0x148   : > { %s3254_s13 = smov 122   ;;  %s3256_s26 = smov 106   ;;  %v3261_v17 = vmov 12   ;;  %v3263_v18 = vmov 13   ;;  %v3265_v19 = vmov 14   ;;  %v3267_v20 = vmov 15  }
 0x149   : > { %s3258_s3 = smov 105   ;;  %s3260_s25 = smov 104   ;;  %v3269_v21 = vmov 16   ;;  %v3271_v22 = vmov 17   ;;  %v3273_v23 = vmov 18   ;;  %v3275_v26 = vmov 19  }
 0x14a   : > { %2742 = vset.pattern.permute.xlu1 %v3242_v3  ;;  %2740 = vset.pattern.permute.xlu0 %v3243_v4  ;;  %s3262_s30 = smov 103   ;;  %v3277_v31 = vmov 20   ;;  %v3279_v36 = vmov 21   ;;  %v3281_v41 = vmov 22   ;;  %v3283_v45 = vmov 23   ;;  %s3296_s27 = smov 56  }
 0x14b   : > { %621 = vperm.xlu1 %2742, %v3758_v2   ;;  %571 = vperm.xlu0 %2740, %v3758_v2   ;;  %v3285_v49 = vmov 24   ;;  %v3287_v54 = vmov 25   ;;  %v3289_v58 = vmov 26   ;;  %v3291_v62 = vmov 27   ;;  %p5883_p1 = scmp.ne.s32.totalorder %s5687_s1, 0 }
 0x14c   : > { %v3307_v1 = vmov 35  }
 0x14f   : > { %557 = vrot.lane.b32.xlu0 %v3765_v5, %s3244_s22  ;;  %555 = vrot.lane.b32.xlu1 %v3768_v6, %s3244_s22 }
 0x150   : > { %2743 = vset.pattern.permute.xlu0 %v3245_v7  ;;  %v3293_v7 = vmov 28  }
 0x153   : > { %646 = vperm.xlu0 %2743, %v3758_v2   ;;  %559 = vrot.lane.b32.xlu1 %v3773_v8, %s3244_s22 }
 0x157   : > { %584 = vrot.lane.b32.xlu0 %v3765_v5, %s3246_s28  ;;  %561 = vrot.lane.b32.xlu1 %v3778_v9, %s3244_s22  ;;  %s3264_s22 = smov 102  }
 0x158   : > { %2744 = vset.pattern.permute.xlu0 %v3247_v10 }
 0x15b   : > { %671 = vperm.xlu0 %2744, %v3758_v2   ;;  %582 = vrot.lane.b32.xlu1 %v3768_v6, %s3246_s28 }
 0x15f   : > { %609 = vrot.lane.b32.xlu0 %v3765_v5, %s3248_s15  ;;  %586 = vrot.lane.b32.xlu1 %v3773_v8, %s3246_s28 }
 0x160   : > { %2745 = vset.pattern.permute.xlu0 %v3249_v11 }
 0x163   : > { %696 = vperm.xlu0 %2745, %v3758_v2   ;;  %588 = vrot.lane.b32.xlu1 %v3778_v9, %s3246_s28  ;;  %s3266_s28 = smov 101  }
 0x167   : > { %634 = vrot.lane.b32.xlu0 %v3765_v5, %s3250_s29  ;;  %607 = vrot.lane.b32.xlu1 %v3768_v6, %s3248_s15 }
 0x168   : > { %2746 = vset.pattern.permute.xlu0 %v3251_v12 }
 0x16b   : > { %721 = vperm.xlu0 %2746, %v3758_v2   ;;  %611 = vrot.lane.b32.xlu1 %v3773_v8, %s3248_s15 }
 0x16f   : > { %659 = vrot.lane.b32.xlu0 %v3765_v5, %s3252_s14  ;;  %613 = vrot.lane.b32.xlu1 %v3778_v9, %s3248_s15  ;;  %s3268_s15 = smov 100  }
 0x170   : > { %2747 = vset.pattern.permute.xlu0 %v3253_v13  ;;  %v3295_v13 = vmov 29  }
 0x173   : > { %746 = vperm.xlu0 %2747, %v3758_v2   ;;  %632 = vrot.lane.b32.xlu1 %v3768_v6, %s3250_s29 }
 0x177   : > { %684 = vrot.lane.b32.xlu0 %v3765_v5, %s3254_s13  ;;  %636 = vrot.lane.b32.xlu1 %v3773_v8, %s3250_s29 }
 0x178   : > { %2748 = vset.pattern.permute.xlu0 %v3255_v14 }
 0x17b   : > { %771 = vperm.xlu0 %2748, %v3758_v2   ;;  %638 = vrot.lane.b32.xlu1 %v3778_v9, %s3250_s29  ;;  %s3270_s29 = smov 84  }
 0x17f   : > { %709 = vrot.lane.b32.xlu0 %v3765_v5, %s3256_s26  ;;  %657 = vrot.lane.b32.xlu1 %v3768_v6, %s3252_s14 }
 0x180   : > { %2749 = vset.pattern.permute.xlu0 %v3257_v15 }
 0x183   : > { %796 = vperm.xlu0 %2749, %v3758_v2   ;;  %661 = vrot.lane.b32.xlu1 %v3773_v8, %s3252_s14 }
 0x187   : > { %734 = vrot.lane.b32.xlu0 %v3765_v5, %s3258_s3  ;;  %663 = vrot.lane.b32.xlu1 %v3778_v9, %s3252_s14  ;;  %s3272_s14 = smov 83  }
 0x188   : > { %2750 = vset.pattern.permute.xlu0 %v3259_v16 }
 0x18b   : > { %821 = vperm.xlu0 %2750, %v3758_v2   ;;  %682 = vrot.lane.b32.xlu1 %v3768_v6, %s3254_s13 }
 0x18f   : > { %759 = vrot.lane.b32.xlu0 %v3765_v5, %s3260_s25  ;;  %686 = vrot.lane.b32.xlu1 %v3773_v8, %s3254_s13 }
 0x190   : > { %2751 = vset.pattern.permute.xlu0 %v3261_v17  ;;  %v3297_v17 = vmov 30  }
 0x193   : > { %846 = vperm.xlu0 %2751, %v3758_v2   ;;  %688 = vrot.lane.b32.xlu1 %v3778_v9, %s3254_s13  ;;  %s3274_s13 = smov 82  }
 0x197   : > { %784 = vrot.lane.b32.xlu0 %v3765_v5, %s3262_s30  ;;  %707 = vrot.lane.b32.xlu1 %v3768_v6, %s3256_s26 }
 0x198   : > { %2752 = vset.pattern.permute.xlu0 %v3263_v18 }
 0x19b   : > { %871 = vperm.xlu0 %2752, %v3758_v2   ;;  %711 = vrot.lane.b32.xlu1 %v3773_v8, %s3256_s26 }
 0x19f   : > { %809 = vrot.lane.b32.xlu0 %v3765_v5, %s3264_s22  ;;  %713 = vrot.lane.b32.xlu1 %v3778_v9, %s3256_s26  ;;  %s3276_s26 = smov 81  }
 0x1a0   : > { %2753 = vset.pattern.permute.xlu0 %v3265_v19 }
 0x1a3   : > { %896 = vperm.xlu0 %2753, %v3758_v2   ;;  %732 = vrot.lane.b32.xlu1 %v3768_v6, %s3258_s3 }
 0x1a7   : > { %834 = vrot.lane.b32.xlu0 %v3765_v5, %s3266_s28  ;;  %736 = vrot.lane.b32.xlu1 %v3773_v8, %s3258_s3 }
 0x1a8   : > { %2754 = vset.pattern.permute.xlu0 %v3267_v20 }
 0x1ab   : > { %921 = vperm.xlu0 %2754, %v3758_v2   ;;  %738 = vrot.lane.b32.xlu1 %v3778_v9, %s3258_s3  ;;  %s3278_s3 = smov 80  }
 0x1af   : > { %859 = vrot.lane.b32.xlu0 %v3765_v5, %s3268_s15  ;;  %757 = vrot.lane.b32.xlu1 %v3768_v6, %s3260_s25 }
 0x1b0   : > { %2755 = vset.pattern.permute.xlu0 %v3269_v21 }
 0x1b3   : > { %946 = vperm.xlu0 %2755, %v3758_v2   ;;  %761 = vrot.lane.b32.xlu1 %v3773_v8, %s3260_s25 }
 0x1b7   : > { %884 = vrot.lane.b32.xlu0 %v3765_v5, %s3270_s29  ;;  %763 = vrot.lane.b32.xlu1 %v3778_v9, %s3260_s25  ;;  %s3280_s25 = smov 79  }
 0x1b8   : > { %2756 = vset.pattern.permute.xlu0 %v3271_v22  ;;  %v3299_v22 = vmov 31  }
 0x1bb   : > { %971 = vperm.xlu0 %2756, %v3758_v2   ;;  %782 = vrot.lane.b32.xlu1 %v3768_v6, %s3262_s30 }
 0x1bf   : > { %909 = vrot.lane.b32.xlu0 %v3765_v5, %s3272_s14  ;;  %786 = vrot.lane.b32.xlu1 %v3773_v8, %s3262_s30 }
 0x1c0   : > { %2757 = vset.pattern.permute.xlu0 %v3273_v23 }
 0x1c3   : > { %996 = vperm.xlu0 %2757, %v3758_v2   ;;  %788 = vrot.lane.b32.xlu1 %v3778_v9, %s3262_s30  ;;  %s3282_s30 = smov 78  }
 0x1c5   : > { %v3857_v24 = vpop.permute.xlu1 %596  ;;  %v3859_v25 = vpop.permute.xlu0 %544 }
 0x1c7   : > { %934 = vrot.lane.b32.xlu0 %v3765_v5, %s3274_s13  ;;  %807 = vrot.lane.b32.xlu1 %v3768_v6, %s3264_s22 }
 0x1c8   : > { %2758 = vset.pattern.permute.xlu0 %v3275_v26 }
 0x1ca   : > { %v3865_v27 = vpop.permute.xlu1 %621  ;;  %v3867_v28 = vpop.permute.xlu0 %571 }
 0x1cb   : > { %1021 = vperm.xlu0 %2758, %v3758_v2   ;;  %811 = vrot.lane.b32.xlu1 %v3773_v8, %s3264_s22 }
 0x1ce   : > { %v3872_v29 = vpop.permute.xlu0 %557  ;;  %v3874_v30 = vpop.permute.xlu1 %555 }
 0x1cf   : > { %959 = vrot.lane.b32.xlu0 %v3765_v5, %s3276_s26  ;;  %813 = vrot.lane.b32.xlu1 %v3778_v9, %s3264_s22  ;;  %s3284_s22 = smov 62  }
 0x1d0   : > { %2759 = vset.pattern.permute.xlu0 %v3277_v31 }
 0x1d2   : > { %v3880_v32 = vpop.permute.xlu0 %646  ;;  %v3882_v33 = vpop.permute.xlu1 %559 }
 0x1d3   : > { %1046 = vperm.xlu0 %2759, %v3758_v2   ;;  %832 = vrot.lane.b32.xlu1 %v3768_v6, %s3266_s28 }
 0x1d6   : > { %v3887_v34 = vpop.permute.xlu0 %584  ;;  %v3889_v35 = vpop.permute.xlu1 %561 }
 0x1d7   : > { %984 = vrot.lane.b32.xlu0 %v3765_v5, %s3278_s3  ;;  %836 = vrot.lane.b32.xlu1 %v3773_v8, %s3266_s28 }
 0x1d8   : > { %2760 = vset.pattern.permute.xlu0 %v3279_v36  ;;  %v3301_v36 = vmov 32  }
 0x1da   : > { %v3895_v37 = vpop.permute.xlu0 %671  ;;  %v3897_v38 = vpop.permute.xlu1 %582 }
 0x1db   : > { %1071 = vperm.xlu0 %2760, %v3758_v2   ;;  %838 = vrot.lane.b32.xlu1 %v3778_v9, %s3266_s28  ;;  %s3286_s28 = smov 61  }
 0x1de   : > { %v3902_v39 = vpop.permute.xlu1 %586  ;;  %v3904_v40 = vpop.permute.xlu0 %609 }
 0x1df   : > { %1009 = vrot.lane.b32.xlu0 %v3765_v5, %s3280_s25  ;;  %857 = vrot.lane.b32.xlu1 %v3768_v6, %s3268_s15 }
 0x1e0   : > { %2761 = vset.pattern.permute.xlu0 %v3281_v41 }
 0x1e2   : > { %v3910_v42 = vpop.permute.xlu1 %588  ;;  %v3915_v43 = vpop.permute.xlu0 %696 }
 0x1e3   : > { %1096 = vperm.xlu0 %2761, %v3758_v2   ;;  %861 = vrot.lane.b32.xlu1 %v3773_v8, %s3268_s15 }
 0x1e6   : > { %v3917_v44 = vpop.permute.xlu1 %607  ;;  %v3925_v47 = vpop.permute.xlu0 %634 }
 0x1e7   : > { %1034 = vrot.lane.b32.xlu0 %v3765_v5, %s3282_s30  ;;  %863 = vrot.lane.b32.xlu1 %v3778_v9, %s3268_s15  ;;  %s3288_s15 = smov 60  }
 0x1e8   : > { %2762 = vset.pattern.permute.xlu0 %v3283_v45 }
 0x1ea   : > { %v3923_v46 = vpop.permute.xlu1 %611  ;;  %v3936_v50 = vpop.permute.xlu0 %721 }
 0x1eb   : > { %1121 = vperm.xlu0 %2762, %v3758_v2   ;;  %882 = vrot.lane.b32.xlu1 %v3768_v6, %s3270_s29 }
 0x1ee   : > { %v3930_v48 = vpop.permute.xlu1 %613  ;;  %v3945_v53 = vpop.permute.xlu0 %659 }
 0x1ef   : > { %1059 = vrot.lane.b32.xlu0 %v3765_v5, %s3284_s22  ;;  %886 = vrot.lane.b32.xlu1 %v3773_v8, %s3270_s29 }
 0x1f0   : > { %2763 = vset.pattern.permute.xlu0 %v3285_v49 }
 0x1f2   : > { %v3938_v51 = vpop.permute.xlu1 %632  ;;  %v3956_v56 = vpop.permute.xlu0 %746 }
 0x1f3   : > { %1146 = vperm.xlu0 %2763, %v3758_v2   ;;  %888 = vrot.lane.b32.xlu1 %v3778_v9, %s3270_s29  ;;  %s3290_s29 = smov 59  }
 0x1f6   : > { %v3943_v52 = vpop.permute.xlu1 %636  ;;  %v3966_v60 = vpop.permute.xlu0 %684 }
 0x1f7   : > { %1084 = vrot.lane.b32.xlu0 %v3765_v5, %s3286_s28  ;;  %907 = vrot.lane.b32.xlu1 %v3768_v6, %s3272_s14 }
 0x1f8   : > { %2764 = vset.pattern.permute.xlu0 %v3287_v54  ;;  %v3303_v54 = vmov 33  }
 0x1fa   : > { %v3951_v55 = vpop.permute.xlu1 %638  ;;  %v3977_v63 = vpop.permute.xlu0 %771 }
 0x1fb   : > { %1171 = vperm.xlu0 %2764, %v3758_v2   ;;  %911 = vrot.lane.b32.xlu1 %v3773_v8, %s3272_s14 }
 0x1fe   : > { %v3958_v57 = vpop.permute.xlu1 %657  ;;  %v3986_v4 = vpop.permute.xlu0 %709 }
 0x1ff   : > { %1109 = vrot.lane.b32.xlu0 %v3765_v5, %s3288_s15  ;;  %913 = vrot.lane.b32.xlu1 %v3778_v9, %s3272_s14  ;;  %s3292_s14 = smov 58  }
 0x200   : > { %2765 = vset.pattern.permute.xlu0 %v3289_v58 }
 0x202   : > { %v3964_v59 = vpop.permute.xlu1 %661  ;;  %v3997_v11 = vpop.permute.xlu0 %796 }
 0x203   : > { %1196 = vperm.xlu0 %2765, %v3758_v2   ;;  %932 = vrot.lane.b32.xlu1 %v3768_v6, %s3274_s13  ;;  %5703 = vst [vmem:[#allocation29_spill] sm:$0xff] %v3997_v11 }
 0x206   : > { %v3971_v61 = vpop.permute.xlu1 %663  ;;  %v4007_v15 = vpop.permute.xlu0 %734 }
 0x207   : > { %1134 = vrot.lane.b32.xlu0 %v3765_v5, %s3290_s29  ;;  %936 = vrot.lane.b32.xlu1 %v3773_v8, %s3274_s13 }
 0x208   : > { %2766 = vset.pattern.permute.xlu0 %v3291_v62 }
 0x20a   : > { %v3979_v0 = vpop.permute.xlu1 %682  ;;  %v4018_v18 = vpop.permute.xlu0 %821 }
 0x20b   : > { %1221 = vperm.xlu0 %2766, %v3758_v2   ;;  %938 = vrot.lane.b32.xlu1 %v3778_v9, %s3274_s13  ;;  %s3294_s13 = smov 57   ;;  %5704 = vst [vmem:[#allocation30_spill] sm:$0xff] %v4018_v18 }
 0x20e   : > { %v3984_v3 = vpop.permute.xlu1 %686  ;;  %v4027_v21 = vpop.permute.xlu0 %759 }
 0x20f   : > { %1159 = vrot.lane.b32.xlu0 %v3765_v5, %s3292_s14  ;;  %957 = vrot.lane.b32.xlu1 %v3768_v6, %s3276_s26 }
 0x210   : > { %2767 = vset.pattern.permute.xlu0 %v3293_v7 }
 0x212   : > { %v3992_v10 = vpop.permute.xlu1 %688  ;;  %v4038_v26 = vpop.permute.xlu0 %846 }
 0x213   : > { %1246 = vperm.xlu0 %2767, %v3758_v2   ;;  %961 = vrot.lane.b32.xlu1 %v3773_v8, %s3276_s26  ;;  %5705 = vst [vmem:[#allocation31_spill] sm:$0xff] %v4038_v26  ;;  %v3309_v26 = vmov 36  }
 0x216   : > { %v3999_v12 = vpop.permute.xlu1 %707  ;;  %v4048_v45 = vpop.permute.xlu0 %784 }
 0x217   : > { %1184 = vrot.lane.b32.xlu0 %v3765_v5, %s3294_s13  ;;  %963 = vrot.lane.b32.xlu1 %v3778_v9, %s3276_s26  ;;  %s5576_s26 = smov 40  }
 0x218   : > { %2768 = vset.pattern.permute.xlu0 %v3295_v13 }
 0x21a   : > { %v4005_v14 = vpop.permute.xlu1 %711  ;;  %v4059_v58 = vpop.permute.xlu0 %871 }
 0x21b   : > { %1271 = vperm.xlu0 %2768, %v3758_v2   ;;  %982 = vrot.lane.b32.xlu1 %v3768_v6, %s3278_s3  ;;  %5706 = vst [vmem:[#allocation32_spill] sm:$0xff] %v4059_v58 }
 0x21e   : > { %v4012_v16 = vpop.permute.xlu1 %713  ;;  %v4068_v13 = vpop.permute.xlu0 %809 }
 0x21f   : > { %1209 = vrot.lane.b32.xlu0 %v3765_v5, %s3296_s27  ;;  %986 = vrot.lane.b32.xlu1 %v3773_v8, %s3278_s3  ;;  %5707 = vst [vmem:[#allocation33_spill] sm:$0xff] %v4068_v13 }
 0x220   : > { %2769 = vset.pattern.permute.xlu0 %v3297_v17  ;;  %v3305_v17 = vmov 34  }
 0x222   : > { %v4020_v19 = vpop.permute.xlu1 %732 }
 0x223   : > { %1296 = vperm.xlu0 %2769, %v3758_v2   ;;  %988 = vrot.lane.b32.xlu1 %v3778_v9, %s3278_s3  ;;  %s3300_s3 = smov 39  }
 0x226   : > { %v4025_v20 = vpop.permute.xlu1 %736 }
 0x227   : > { %1234 = vrot.lane.b32.xlu0 %v3765_v5, %s5576_s26  ;;  %1007 = vrot.lane.b32.xlu1 %v3768_v6, %s3280_s25  ;;  %s3302_s26 = smov 38  }
 0x228   : > { %2770 = vset.pattern.permute.xlu0 %v3299_v22 }
 0x22a   : > { %v4033_v23 = vpop.permute.xlu1 %738 }
 0x22b   : > { %1321 = vperm.xlu0 %2770, %v3758_v2   ;;  %1011 = vrot.lane.b32.xlu1 %v3773_v8, %s3280_s25 }
 0x22e   : > { %v4040_v31 = vpop.permute.xlu1 %757 }
 0x22f   : > { %1259 = vrot.lane.b32.xlu0 %v3765_v5, %s3300_s3  ;;  %1013 = vrot.lane.b32.xlu1 %v3778_v9, %s3280_s25  ;;  %s5582_s25 = smov 37  }
 0x230   : > { %2771 = vset.pattern.permute.xlu0 %v3301_v36  ;;  %v4079_v36 = vpop.permute.xlu0 %896 }
 0x231   : > { %5708 = vst [vmem:[#allocation34_spill] sm:$0xff] %v4079_v36 }
 0x232   : > { %v4046_v41 = vpop.permute.xlu1 %761 }
 0x233   : > { %1346 = vperm.xlu0 %2771, %v3758_v2   ;;  %1032 = vrot.lane.b32.xlu1 %v3768_v6, %s3282_s30 }
 0x234   : > { %v4089_v58 = vpop.permute.xlu0 %834 }
 0x235   : > { %5711 = vst [vmem:[#allocation37_spill] sm:$0xff] %v4089_v58 }
 0x236   : > { %v4053_v49 = vpop.permute.xlu1 %763 }
 0x237   : > { %1284 = vrot.lane.b32.xlu0 %v3765_v5, %s3302_s26  ;;  %1036 = vrot.lane.b32.xlu1 %v3773_v8, %s3282_s30 }
 0x238   : > { %2772 = vset.pattern.permute.xlu0 %v3303_v54 }
 0x23a   : > { %v4061_v62 = vpop.permute.xlu1 %782 }
 0x23b   : > { %1371 = vperm.xlu0 %2772, %v3758_v2   ;;  %1038 = vrot.lane.b32.xlu1 %v3778_v9, %s3282_s30  ;;  %s3306_s30 = smov 36  }
 0x23e   : > { %v4066_v7 = vpop.permute.xlu1 %786 }
 0x23f   : > { %1309 = vrot.lane.b32.xlu0 %v3765_v5, %s5582_s25  ;;  %1057 = vrot.lane.b32.xlu1 %v3768_v6, %s3284_s22  ;;  %s3308_s25 = smov 35  }
 0x240   : > { %2773 = vset.pattern.permute.xlu0 %v3305_v17 }
 0x242   : > { %v4074_v22 = vpop.permute.xlu1 %788 }
 0x243   : > { %1396 = vperm.xlu0 %2773, %v3758_v2   ;;  %1061 = vrot.lane.b32.xlu1 %v3773_v8, %s3284_s22 }
 0x246   : > { %v4081_v54 = vpop.permute.xlu1 %807 }
 0x247   : > { %5709 = vst [vmem:[#allocation35_spill] sm:$0xff] %v4081_v54  ;;  %1334 = vrot.lane.b32.xlu0 %v3765_v5, %s3306_s30  ;;  %1063 = vrot.lane.b32.xlu1 %v3778_v9, %s3284_s22  ;;  %s5594_s22 = smov 34  }
 0x248   : > { %2774 = vset.pattern.permute.xlu0 %v3307_v1  ;;  %v4100_v1 = vpop.permute.xlu0 %921 }
 0x249   : > { %5713 = vst [vmem:[#allocation39_spill] sm:$0xff] %v4100_v1 }
 0x24a   : > { %v4087_v17 = vpop.permute.xlu1 %811 }
 0x24b   : > { %5710 = vst [vmem:[#allocation36_spill] sm:$0xff] %v4087_v17  ;;  %1421 = vperm.xlu0 %2774, %v3758_v2   ;;  %1082 = vrot.lane.b32.xlu1 %v3768_v6, %s3286_s28 }
 0x24e   : > { %v4094_v36 = vpop.permute.xlu1 %813 }
 0x24f   : > { %5712 = vst [vmem:[#allocation38_spill] sm:$0xff] %v4094_v36  ;;  %1359 = vrot.lane.b32.xlu0 %v3765_v5, %s3308_s25  ;;  %1086 = vrot.lane.b32.xlu1 %v3773_v8, %s3286_s28  ;;  %v4109_v36 = vpop.permute.xlu0 %859 }
 0x250   : > { %2775 = vset.pattern.permute.xlu0 %v3309_v26  ;;  %5716 = vst [vmem:[#allocation42_spill] sm:$0xff] %v4109_v36  ;;  %v3311_v26 = vmov 37   ;;  %v3313_v36 = vmov 38  }
 0x252   : > { %v4102_v18 = vpop.permute.xlu1 %832 }
 0x253   : > { %5714 = vst [vmem:[#allocation40_spill] sm:$0xff] %v4102_v18  ;;  %1446 = vperm.xlu0 %2775, %v3758_v2   ;;  %1088 = vrot.lane.b32.xlu1 %v3778_v9, %s3286_s28  ;;  %v4120_v18 = vpop.permute.xlu0 %946  ;;  %s3312_s28 = smov 18  }
 0x254   : > { %5718 = vst [vmem:[#allocation44_spill] sm:$0xff] %v4120_v18 }
 0x256   : > { %v4107_v58 = vpop.permute.xlu1 %836 }
 0x257   : > { %5715 = vst [vmem:[#allocation41_spill] sm:$0xff] %v4107_v58  ;;  %1384 = vrot.lane.b32.xlu0 %v3765_v5, %s5594_s22  ;;  %1107 = vrot.lane.b32.xlu1 %v3768_v6, %s3288_s15  ;;  %s3314_s22 = smov 17  }
 0x258   : > { %2776 = vset.pattern.permute.xlu0 %v3311_v26 }
 0x25a   : > { %v4115_v1 = vpop.permute.xlu1 %838 }
 0x25b   : > { %5717 = vst [vmem:[#allocation43_spill] sm:$0xff] %v4115_v1  ;;  %1471 = vperm.xlu0 %2776, %v3758_v2   ;;  %1111 = vrot.lane.b32.xlu1 %v3773_v8, %s3288_s15  ;;  %v4130_v1 = vpop.permute.xlu0 %884 }
 0x25c   : > { %5721 = vst [vmem:[#allocation47_spill] sm:$0xff] %v4130_v1 }
 0x25e   : > { %v4122_v58 = vpop.permute.xlu1 %857 }
 0x25f   : > { %5719 = vst [vmem:[#allocation45_spill] sm:$0xff] %v4122_v58  ;;  %1409 = vrot.lane.b32.xlu0 %v3765_v5, %s3312_s28  ;;  %1113 = vrot.lane.b32.xlu1 %v3778_v9, %s3288_s15  ;;  %v3315_v58 = vmov 39   ;;  %s5606_s15 = smov 16  }
 0x260   : > { %2777 = vset.pattern.permute.xlu0 %v3313_v36  ;;  %v4141_v36 = vpop.permute.xlu0 %971 }
 0x261   : > { %5723 = vst [vmem:[#allocation49_spill] sm:$0xff] %v4141_v36 }
 0x262   : > { %v4128_v26 = vpop.permute.xlu1 %861 }
 0x263   : > { %5720 = vst [vmem:[#allocation46_spill] sm:$0xff] %v4128_v26  ;;  %1496 = vperm.xlu0 %2777, %v3758_v2   ;;  %1132 = vrot.lane.b32.xlu1 %v3768_v6, %s3290_s29 }
 0x266   : > { %v4135_v18 = vpop.permute.xlu1 %863 }
 0x267   : > { %5722 = vst [vmem:[#allocation48_spill] sm:$0xff] %v4135_v18  ;;  %1434 = vrot.lane.b32.xlu0 %v3765_v5, %s3314_s22  ;;  %1136 = vrot.lane.b32.xlu1 %v3773_v8, %s3290_s29  ;;  %v4150_v18 = vpop.permute.xlu0 %909 }
 0x268   : > { %2778 = vset.pattern.permute.xlu0 %v3315_v58  ;;  %5726 = vst [vmem:[#allocation52_spill] sm:$0xff] %v4150_v18  ;;  %v3317_v58 = vmov 40   ;;  %v3319_v18 = vmov 41  }
 0x26a   : > { %v4143_v26 = vpop.permute.xlu1 %882 }
 0x26b   : > { %5724 = vst [vmem:[#allocation50_spill] sm:$0xff] %v4143_v26  ;;  %1521 = vperm.xlu0 %2778, %v3758_v2   ;;  %1138 = vrot.lane.b32.xlu1 %v3778_v9, %s3290_s29  ;;  %v4161_v26 = vpop.permute.xlu0 %996  ;;  %s3318_s29 = smov 15  }
 0x26c   : > { %5728 = vst [vmem:[#allocation54_spill] sm:$0xff] %v4161_v26 }
 0x26e   : > { %v4148_v1 = vpop.permute.xlu1 %886 }
 0x26f   : > { %5725 = vst [vmem:[#allocation51_spill] sm:$0xff] %v4148_v1  ;;  %1459 = vrot.lane.b32.xlu0 %v3765_v5, %s5606_s15  ;;  %1157 = vrot.lane.b32.xlu1 %v3768_v6, %s3292_s14  ;;  %s3320_s15 = smov 14  }
 0x270   : > { %2779 = vset.pattern.permute.xlu0 %v3317_v58 }
 0x272   : > { %v4156_v36 = vpop.permute.xlu1 %888 }
 0x273   : > { %5727 = vst [vmem:[#allocation53_spill] sm:$0xff] %v4156_v36  ;;  %1546 = vperm.xlu0 %2779, %v3758_v2   ;;  %1161 = vrot.lane.b32.xlu1 %v3773_v8, %s3292_s14  ;;  %v4171_v36 = vpop.permute.xlu0 %934 }
 0x274   : > { %5731 = vst [vmem:[#allocation57_spill] sm:$0xff] %v4171_v36 }
 0x276   : > { %v4163_v1 = vpop.permute.xlu1 %907 }
 0x277   : > { %5729 = vst [vmem:[#allocation55_spill] sm:$0xff] %v4163_v1  ;;  %1484 = vrot.lane.b32.xlu0 %v3765_v5, %s3318_s29  ;;  %1163 = vrot.lane.b32.xlu1 %v3778_v9, %s3292_s14  ;;  %v3321_v1 = vmov 42   ;;  %s5617_s14 = smov 13  }
 0x278   : > { %2780 = vset.pattern.permute.xlu0 %v3319_v18  ;;  %v4182_v18 = vpop.permute.xlu0 %1021 }
 0x279   : > { %5733 = vst [vmem:[#allocation59_spill] sm:$0xff] %v4182_v18 }
 0x27a   : > { %v4169_v58 = vpop.permute.xlu1 %911 }
 0x27b   : > { %5730 = vst [vmem:[#allocation56_spill] sm:$0xff] %v4169_v58  ;;  %1571 = vperm.xlu0 %2780, %v3758_v2   ;;  %1182 = vrot.lane.b32.xlu1 %v3768_v6, %s3294_s13 }
 0x27e   : > { %v4176_v26 = vpop.permute.xlu1 %913 }
 0x27f   : > { %5732 = vst [vmem:[#allocation58_spill] sm:$0xff] %v4176_v26  ;;  %1509 = vrot.lane.b32.xlu0 %v3765_v5, %s3320_s15  ;;  %1186 = vrot.lane.b32.xlu1 %v3773_v8, %s3294_s13  ;;  %v4191_v26 = vpop.permute.xlu0 %959 }
 0x280   : > { %2781 = vset.pattern.permute.xlu0 %v3321_v1  ;;  %5736 = vst [vmem:[#allocation62_spill] sm:$0xff] %v4191_v26  ;;  %v3323_v1 = vmov 43   ;;  %v3325_v26 = vmov 44  }
 0x282   : > { %v4184_v58 = vpop.permute.xlu1 %932 }
 0x283   : > { %5734 = vst [vmem:[#allocation60_spill] sm:$0xff] %v4184_v58  ;;  %1583 = vperm.xlu0 %2781, %v3758_v2   ;;  %1188 = vrot.lane.b32.xlu1 %v3778_v9, %s3294_s13  ;;  %v4202_v58 = vpop.permute.xlu0 %1046  ;;  %s3324_s13 = smov 12  }
 0x284   : > { %5738 = vst [vmem:[#allocation64_spill] sm:$0xff] %v4202_v58 }
 0x286   : > { %v4189_v36 = vpop.permute.xlu1 %936 }
 0x287   : > { %5735 = vst [vmem:[#allocation61_spill] sm:$0xff] %v4189_v36  ;;  %1534 = vrot.lane.b32.xlu0 %v3765_v5, %s5617_s14  ;;  %1207 = vrot.lane.b32.xlu1 %v3768_v6, %s3296_s27  ;;  %s5742_s14 = smov 40  }
 0x288   : > { %2782 = vset.pattern.permute.xlu0 %v3323_v1 }
 0x28a   : > { %v4197_v18 = vpop.permute.xlu1 %938 }
 0x28b   : > { %5737 = vst [vmem:[#allocation63_spill] sm:$0xff] %v4197_v18  ;;  %1595 = vperm.xlu0 %2782, %v3758_v2   ;;  %1211 = vrot.lane.b32.xlu1 %v3773_v8, %s3296_s27  ;;  %v4212_v18 = vpop.permute.xlu0 %984 }
 0x28c   : > { %5741 = vst [vmem:[#allocation67_spill] sm:$0xff] %v4212_v18 }
 0x28e   : > { %v4204_v36 = vpop.permute.xlu1 %957 }
 0x28f   : > { %5739 = vst [vmem:[#allocation65_spill] sm:$0xff] %v4204_v36  ;;  %1559 = vrot.lane.b32.xlu0 %v3765_v5, %s3324_s13  ;;  %1213 = vrot.lane.b32.xlu1 %v3778_v9, %s3296_s27  ;;  %v4221_v36 = vpop.permute.xlu0 %1071  ;;  %s5758_s27 = smov 37  }
 0x290   : > { %2783 = vset.pattern.permute.xlu0 %v3325_v26  ;;  %5744 = vst [vmem:[#allocation69_spill] sm:$0xff] %v4221_v36 }
 0x292   : > { %v4210_v1 = vpop.permute.xlu1 %961 }
 0x293   : > { %5740 = vst [vmem:[#allocation66_spill] sm:$0xff] %v4210_v1  ;;  %1607 = vperm.xlu0 %2783, %v3758_v2   ;;  %1232 = vrot.lane.b32.xlu1 %v3768_v6, %s5742_s14  ;;  %v4229_v18 = vpop.permute.xlu0 %1009 }
 0x294   : > { %5747 = vst [vmem:[#allocation72_spill] sm:$0xff] %v4229_v18 }
 0x296   : > { %v4217_v58 = vpop.permute.xlu1 %963 }
 0x297   : > { %5743 = vst [vmem:[#allocation68_spill] sm:$0xff] %v4217_v58  ;;  %1236 = vrot.lane.b32.xlu1 %v3773_v8, %s5742_s14  ;;  %v4237_v58 = vpop.permute.xlu0 %1096 }
 0x298   : > { %5749 = vst [vmem:[#allocation74_spill] sm:$0xff] %v4237_v58 }
 0x29a   : > { %v4223_v17 = vpop.permute.xlu1 %982 }
 0x29b   : > { %5745 = vst [vmem:[#allocation70_spill] sm:$0xff] %v4223_v17  ;;  %1238 = vrot.lane.b32.xlu1 %v3778_v9, %s5742_s14  ;;  %s3332_s14 = smov 118  }
 0x29e   : > { %v4227_v26 = vpop.permute.xlu1 %986 }
 0x29f   : > { %5746 = vst [vmem:[#allocation71_spill] sm:$0xff] %v4227_v26  ;;  %1257 = vrot.lane.b32.xlu1 %v3768_v6, %s3300_s3  ;;  %v4245_v26 = vpop.permute.xlu0 %1034 }
 0x2a0   : > { %5752 = vst [vmem:[#allocation77_spill] sm:$0xff] %v4245_v26  ;;  %v3326_v26 = vmov 46  }
 0x2a1   : > { %2785 = vset.pattern.permute.xlu0 %v3326_v26 }
 0x2a2   : > { %v4233_v1 = vpop.permute.xlu1 %988  ;;  %1657 = vperm.xlu0 %2785, %v3758_v2  }
 0x2a3   : > { %5748 = vst [vmem:[#allocation73_spill] sm:$0xff] %v4233_v1  ;;  %1261 = vrot.lane.b32.xlu1 %v3773_v8, %s3300_s3  ;;  %v4253_v1 = vpop.permute.xlu0 %1121 }
 0x2a4   : > { %5754 = vst [vmem:[#allocation79_spill] sm:$0xff] %v4253_v1  ;;  %v3327_v1 = vmov 45  }
 0x2a5   : > { %2784 = vset.pattern.permute.xlu1 %v3327_v1  ;;  %v3329_v1 = vmov 48  }
 0x2a6   : > { %v4239_v36 = vpop.permute.xlu1 %1007  ;;  %2787 = vset.pattern.permute.xlu0 %v3329_v1 }
 0x2a7   : > { %5750 = vst [vmem:[#allocation75_spill] sm:$0xff] %v4239_v36  ;;  %1263 = vrot.lane.b32.xlu1 %v3778_v9, %s3300_s3  ;;  %s3330_s3 = smov 120  }
 0x2aa   : > { %v4243_v17 = vpop.permute.xlu1 %1011 }
 0x2ab   : > { %5751 = vst [vmem:[#allocation76_spill] sm:$0xff] %v4243_v17  ;;  %1282 = vrot.lane.b32.xlu1 %v3768_v6, %s3302_s26  ;;  %v4261_v17 = vpop.permute.xlu0 %1059 }
 0x2ac   : > { %5757 = vst [vmem:[#allocation82_spill] sm:$0xff] %v4261_v17 }
 0x2ae   : > { %v4249_v18 = vpop.permute.xlu1 %1013 }
 0x2af   : > { %5753 = vst [vmem:[#allocation78_spill] sm:$0xff] %v4249_v18  ;;  %1286 = vrot.lane.b32.xlu1 %v3773_v8, %s3302_s26 }
 0x2b2   : > { %v4255_v58 = vpop.permute.xlu1 %1032 }
 0x2b3   : > { %5755 = vst [vmem:[#allocation80_spill] sm:$0xff] %v4255_v58  ;;  %1288 = vrot.lane.b32.xlu1 %v3778_v9, %s3302_s26  ;;  %v4270_v58 = vpop.permute.xlu0 %1146  ;;  %s3328_s26 = smov 121  }
 0x2b4   : > { %5760 = vst [vmem:[#allocation84_spill] sm:$0xff] %v4270_v58  ;;  %1622 = vrot.lane.b32.xlu0 %v3773_v8, %s3328_s26 }
 0x2b6   : > { %v4259_v36 = vpop.permute.xlu1 %1036 }
 0x2b7   : > { %5756 = vst [vmem:[#allocation81_spill] sm:$0xff] %v4259_v36  ;;  %1307 = vrot.lane.b32.xlu1 %v3768_v6, %s5758_s27  ;;  %v4278_v36 = vpop.permute.xlu0 %1084 }
 0x2b8   : > { %5763 = vst [vmem:[#allocation87_spill] sm:$0xff] %v4278_v36  ;;  %1707 = vperm.xlu0 %2787, %v3758_v2   ;;  %v5767_v36 = vmov 0  }
 0x2ba   : > { %v4265_v18 = vpop.permute.xlu1 %1038 }
 0x2bb   : > { %5759 = vst [vmem:[#allocation83_spill] sm:$0xff] %v4265_v18  ;;  %1311 = vrot.lane.b32.xlu1 %v3773_v8, %s5758_s27  ;;  %v4288_v58 = vpop.permute.xlu0 %1171 }
 0x2bc   : > { %5765 = vst [vmem:[#allocation89_spill] sm:$0xff] %v4288_v58  ;;  %2788 = vset.pattern.permute.xlu0 %v5767_v36 }
 0x2bd   : > { %1647 = vrot.lane.b32.xlu0 %v3773_v8, %s3330_s3 }
 0x2be   : > { %v4272_v54 = vpop.permute.xlu1 %1057 }
 0x2bf   : > { %5761 = vst [vmem:[#allocation85_spill] sm:$0xff] %v4272_v54  ;;  %1313 = vrot.lane.b32.xlu1 %v3778_v9, %s5758_s27  ;;  %v4298_v18 = vpop.permute.xlu0 %1109 }
 0x2c0   : > { %5769 = vst [vmem:[#allocation92_spill] sm:$0xff] %v4298_v18 }
 0x2c1   : > { %1643 = vrot.lane.b32.xlu0 %v3768_v6, %s3330_s3 }
 0x2c2   : > { %v4276_v17 = vpop.permute.xlu1 %1061 }
 0x2c3   : > { %5762 = vst [vmem:[#allocation86_spill] sm:$0xff] %v4276_v17  ;;  %1332 = vrot.lane.b32.xlu1 %v3768_v6, %s3306_s30  ;;  %v4306_v2 = vpop.permute.xlu0 %1196 }
 0x2c4   : > { %5771 = vst [vmem:[#allocation94_spill] sm:$0xff] %v4306_v2  ;;  %v5655_v2 = vlaneseq }
 0x2c6   : > { %v4284_v26 = vpop.permute.xlu1 %1063 }
 0x2c7   : > { %5764 = vst [vmem:[#allocation88_spill] sm:$0xff] %v4284_v26  ;;  %1336 = vrot.lane.b32.xlu1 %v3773_v8, %s3306_s30  ;;  %v4316_v58 = vpop.permute.xlu0 %1134 }
 0x2c8   : > { %5774 = vst [vmem:[#allocation97_spill] sm:$0xff] %v4316_v58  ;;  %v4335_v58 = vand.u32 127, %v5655_v2 }
 0x2ca   : > { %v4291_v17 = vpop.permute.xlu1 %1082  ;;  %vm565_vm0 = vcmp.lt.s32.totalorder %v4335_v58, 127  ;;  %vm590_vm1 = vcmp.lt.s32.totalorder %v4335_v58, 126  ;;  %vm615_vm2 = vcmp.lt.s32.totalorder %v4335_v58, 125  ;;  %vm640_vm3 = vcmp.lt.s32.totalorder %v4335_v58, 124 }
 0x2cb   : > { %5766 = vst [vmem:[#allocation90_spill] sm:$0xff] %v4291_v17  ;;  %1338 = vrot.lane.b32.xlu1 %v3778_v9, %s3306_s30  ;;  %s5775_s30 = smov 34   ;;  %v568_v2 = vsel %vm565_vm0, %v3874_v30, %v3872_v29  ;;  %v593_v11 = vsel %vm590_vm1, %v3897_v38, %v3887_v34  ;;  %vm665_vm4 = vcmp.lt.s32.totalorder %v4335_v58, 123  ;;  %vm690_vm5 = vcmp.lt.s32.totalorder %v4335_v58, 122 }
 0x2cc   : > { %v574_v17 = vmul.f32 %v3867_v28, %v568_v2  ;;  %v591_v2 = vsel %vm590_vm1, %v3902_v39, %v3910_v42  ;;  %vm715_vm6 = vcmp.lt.s32.totalorder %v4335_v58, 106  ;;  %vm740_vm7 = vcmp.lt.s32.totalorder %v4335_v58, 105 }
 0x2cd   : > { %vm765_vm8 = vcmp.lt.s32.totalorder %v4335_v58, 104  ;;  %vm790_vm9 = vcmp.lt.s32.totalorder %v4335_v58, 103  ;;  %vm815_vm10 = vcmp.lt.s32.totalorder %v4335_v58, 102  ;;  %vm840_vm11 = vcmp.lt.s32.totalorder %v4335_v58, 101 }
 0x2ce   : > { %v4296_v54 = vpop.permute.xlu1 %1086  ;;  %vm865_vm12 = vcmp.lt.s32.totalorder %v4335_v58, 100  ;;  %vm890_vm13 = vcmp.lt.s32.totalorder %v4335_v58, 84  ;;  %vm915_vm14 = vcmp.lt.s32.totalorder %v4335_v58, 83  ;;  %vm940_vm15 = vcmp.lt.s32.totalorder %v4335_v58, 82 }
 0x2cf   : > { %5768 = vst [vmem:[#allocation91_spill] sm:$0xff] %v4296_v54  ;;  %1357 = vrot.lane.b32.xlu1 %v3768_v6, %s3308_s25  ;;  %v569_v54 = vsel %vm565_vm0, %v3889_v35, %v3874_v30  ;;  %v549_v30 = vmul.f32 %v3859_v25, %v3773_v8 }
 0x2d2   : > { %v4302_v26 = vpop.permute.xlu1 %1088 }
 0x2d3   : > { %5770 = vst [vmem:[#allocation93_spill] sm:$0xff] %v4302_v26  ;;  %1361 = vrot.lane.b32.xlu1 %v3773_v8, %s3308_s25 }
 0x2d6   : > { %v4308_v1 = vpop.permute.xlu1 %1107 }
 0x2d7   : > { %5772 = vst [vmem:[#allocation95_spill] sm:$0xff] %v4308_v1  ;;  %1363 = vrot.lane.b32.xlu1 %v3778_v9, %s3308_s25  ;;  %v4326_v1 = vpop.permute.xlu0 %1221  ;;  %s3331_s25 = smov 119  }
 0x2d8   : > { %5777 = vst [vmem:[#allocation99_spill] sm:$0xff] %v4326_v1  ;;  %1672 = vrot.lane.b32.xlu0 %v3773_v8, %s3331_s25 }
 0x2da   : > { %v4312_v36 = vpop.permute.xlu1 %1111 }
 0x2db   : > { %5773 = vst [vmem:[#allocation96_spill] sm:$0xff] %v4312_v36  ;;  %1382 = vrot.lane.b32.xlu1 %v3768_v6, %s5775_s30  ;;  %v4341_v26 = vpop.permute.xlu0 %1159 }
 0x2dc   : > { %1668 = vrot.lane.b32.xlu0 %v3768_v6, %s3331_s25  ;;  %5780 = vst [vmem:[#allocation102_spill] sm:$0xff] %v4341_v26  ;;  %v547_v26 = vmul.f32 %v3859_v25, %v3768_v6 }
 0x2de   : > { %v4320_v18 = vpop.permute.xlu1 %1113 }
 0x2df   : > { %5776 = vst [vmem:[#allocation98_spill] sm:$0xff] %v4320_v18  ;;  %1386 = vrot.lane.b32.xlu1 %v3773_v8, %s5775_s30 }
 0x2e0   : > { %1697 = vrot.lane.b32.xlu0 %v3773_v8, %s3332_s14 }
 0x2e2   : > { %v4328_v36 = vpop.permute.xlu1 %1132 }
 0x2e3   : > { %5778 = vst [vmem:[#allocation100_spill] sm:$0xff] %v4328_v36  ;;  %1388 = vrot.lane.b32.xlu1 %v3778_v9, %s5775_s30  ;;  %v566_v36 = vsel %vm565_vm0, %v3882_v33, %v3889_v35  ;;  %v550_v35 = vmul.f32 %v3859_v25, %v3778_v9 }
 0x2e4   : > { %1693 = vrot.lane.b32.xlu0 %v3768_v6, %s3332_s14 }
 0x2e6   : > { %v4337_v18 = vpop.permute.xlu1 %1136 }
 0x2e7   : > { %5779 = vst [vmem:[#allocation101_spill] sm:$0xff] %v4337_v18  ;;  %1407 = vrot.lane.b32.xlu1 %v3768_v6, %s3312_s28  ;;  %v567_v18 = vsel %vm565_vm0, %v3872_v29, %v3882_v33  ;;  %v4366_v29 = vpop.permute.xlu0 %1246  ;;  %vm965_vm0 = vcmp.lt.s32.totalorder %v4335_v58, 81 }
 0x2e8   : > { %5782 = vst [vmem:[#allocation104_spill] sm:$0xff] %v4366_v29  ;;  %v575_v13 = vmul.f32 %v3867_v28, %v567_v18  ;;  %v577_v18 = vmul.f32 %v3867_v28, %v569_v54  ;;  %v599_v29 = vmul.f32 %v3857_v24, %v593_v11 }
 0x2ea   : > { %v4346_v1 = vpop.permute.xlu1 %1138 }
 0x2eb   : > { %5781 = vst [vmem:[#allocation103_spill] sm:$0xff] %v4346_v1  ;;  %1411 = vrot.lane.b32.xlu1 %v3773_v8, %s3312_s28  ;;  %v548_v1 = vmul.f32 %v3859_v25, %v3765_v5  ;;  %v592_v5 = vsel %vm590_vm1, %v3887_v34, %v3902_v39  ;;  %v576_v34 = vmul.f32 %v3867_v28, %v566_v36 }
 0x2ec   : > { %v594_v25 = vsel %vm590_vm1, %v3910_v42, %v3897_v38  ;;  %v617_v28 = vsel %vm615_vm2, %v3904_v40, %v3923_v46  ;;  %v578_v39 = vadd.f32 %v574_v17, %v547_v26  ;;  %v601_v42 = vmul.f32 %v3857_v24, %v591_v2 }
 0x2ed   : > { %v579_v54 = vadd.f32 %v575_v13, %v548_v1  ;;  %v602_v11 = vmul.f32 %v3857_v24, %v594_v25  ;;  %v616_v36 = vsel %vm615_vm2, %v3923_v46, %v3930_v48  ;;  %v4424_v13 = vpop.permute.xlu0 %1184  ;;  %v625_v26 = vmul.f32 %v3865_v27, %v617_v28 }
 0x2ee   : > { %v4378_v33 = vpop.permute.xlu1 %1157  ;;  %v580_v46 = vadd.f32 %v576_v34, %v549_v30  ;;  %v603_v1 = vadd.f32 %v599_v29, %v578_v39  ;;  %v4449_v25 = vsel %vm640_vm3, %v3943_v52, %v3951_v55  ;;  %vm990_vm1 = vcmp.lt.s32.totalorder %v4335_v58, 80 }
 0x2ef   : > { %5783 = vst [vmem:[#allocation105_spill] sm:$0xff] %v4378_v33  ;;  %1413 = vrot.lane.b32.xlu1 %v3778_v9, %s3312_s28  ;;  %v600_v33 = vmul.f32 %v3857_v24, %v592_v5  ;;  %v618_v9 = vsel %vm615_vm2, %v3917_v44, %v3904_v40  ;;  %v619_v40 = vsel %vm615_vm2, %v3930_v48, %v3917_v44  ;;  %vm1015_vm2 = vcmp.lt.s32.totalorder %v4335_v58, 79  ;;  %s5838_s28 = smov 13  }
 0x2f0   : > { %v624_v17 = vmul.f32 %v3865_v27, %v618_v9  ;;  %v4434_v24 = vsel %vm640_vm3, %v3938_v51, %v3925_v47  ;;  %v4440_v44 = vsel %vm640_vm3, %v3925_v47, %v3943_v52  ;;  %v581_v48 = vadd.f32 %v577_v18, %v550_v35 }
 0x2f1   : > { %v626_v5 = vmul.f32 %v3865_v27, %v616_v36  ;;  %v627_v2 = vmul.f32 %v3865_v27, %v619_v40  ;;  %v4455_v47 = vsel %vm640_vm3, %v3951_v55, %v3938_v51  ;;  %v650_v27 = vmul.f32 %v3880_v32, %v4440_v44  ;;  %v4494_v28 = vpop.permute.xlu0 %1271  ;;  %v4516_v40 = vld [vmem:[%s3731_s11 + $0x18] sm:$0xff] }
 0x2f2   : > { %v4412_v38 = vpop.permute.xlu1 %1161  ;;  %v4467_v52 = vsel %vm665_vm4, %v3958_v57, %v3945_v53  ;;  %v4473_v51 = vsel %vm665_vm4, %v3945_v53, %v3964_v59  ;;  %v605_v55 = vadd.f32 %v601_v42, %v580_v46  ;;  %v606_v30 = vadd.f32 %v602_v11, %v581_v48 }
 0x2f3   : > { %1432 = vrot.lane.b32.xlu1 %v3768_v6, %s3314_s22  ;;  %v604_v6 = vadd.f32 %v600_v33, %v579_v54  ;;  %v649_v33 = vmul.f32 %v3880_v32, %v4434_v24  ;;  %5784 = vst [vmem:[#allocation106_spill] sm:$0xff] %v4467_v52  ;;  %5785 = vst [vmem:[#allocation107_spill] sm:$0xff] %v4473_v51  ;;  %v628_v35 = vadd.f32 %v624_v17, %v603_v1 }
 0x2f4   : > { %v651_v18 = vmul.f32 %v3880_v32, %v4449_v25  ;;  %v652_v9 = vmul.f32 %v3880_v32, %v4455_v47  ;;  %v4486_v53 = vsel %vm665_vm4, %v3964_v59, %v3971_v61  ;;  %v674_v39 = vmul.f32 %v3895_v37, %v4467_v52  ;;  %v5859_v52 = vld [vmem:[#allocation97_spill] sm:$0xff] }
 0x2f5   : > { %v629_v34 = vadd.f32 %v625_v26, %v604_v6  ;;  %5786 = vst [vmem:[#allocation108_spill] sm:$0xff] %v4486_v53  ;;  %v675_v32 = vmul.f32 %v3895_v37, %v4473_v51  ;;  %v4504_v59 = vsel %vm690_vm5, %v3979_v0, %v3966_v60  ;;  %v630_v54 = vadd.f32 %v626_v5, %v605_v55 }
 0x2f6   : > { %v4457_v29 = vpop.permute.xlu1 %1163  ;;  %5788 = vst [vmem:[#allocation110_spill] sm:$0xff] %v4504_v59  ;;  %v631_v42 = vadd.f32 %v627_v2, %v606_v30  ;;  %v653_v11 = vadd.f32 %v649_v33, %v628_v35  ;;  %v676_v17 = vmul.f32 %v3895_v37, %v4486_v53  ;;  %v4528_v26 = vsel %vm690_vm5, %v3984_v3, %v3992_v10  ;;  %v4563_v30 = vpop.permute.xlu0 %1209  ;;  %v4566_v35 = vld [vmem:[%s3731_s11] sm:$0xff] }
 0x2f7   : > { %1436 = vrot.lane.b32.xlu1 %v3773_v8, %s3314_s22  ;;  %v4492_v8 = vsel %vm665_vm4, %v3971_v61, %v3958_v57  ;;  %v4510_v57 = vsel %vm690_vm5, %v3966_v60, %v3984_v3  ;;  %v654_v36 = vadd.f32 %v650_v27, %v629_v34  ;;  %5790 = vst [vmem:[#allocation112_spill] sm:$0xff] %v4528_v26  ;;  %vm1040_vm3 = vcmp.lt.s32.totalorder %v4335_v58, 78 }
 0x2f8   : > { %5787 = vst [vmem:[#allocation109_spill] sm:$0xff] %v4492_v8  ;;  %5789 = vst [vmem:[#allocation111_spill] sm:$0xff] %v4510_v57  ;;  %v677_v60 = vmul.f32 %v3895_v37, %v4492_v8  ;;  %v4534_v46 = vsel %vm690_vm5, %v3992_v10, %v3979_v0  ;;  %v699_v48 = vmul.f32 %v3915_v43, %v4504_v59  ;;  %vm1065_vm4 = vcmp.lt.s32.totalorder %v4335_v58, 62  ;;  %v5860_v8 = vld [vmem:[#allocation100_spill] sm:$0xff] }
 0x2f9   : > { %5791 = vst [vmem:[#allocation113_spill] sm:$0xff] %v4534_v46  ;;  %v700_v1 = vmul.f32 %v3915_v43, %v4510_v57  ;;  %v718_v37 = vsel %vm715_vm6, %v3999_v12, %v3986_v4  ;;  %v717_v3 = vsel %vm715_vm6, %v3986_v4, %v4005_v14  ;;  %v655_v6 = vadd.f32 %v651_v18, %v630_v54 }
 0x2fa   : > { %v4512_v61 = vpop.permute.xlu1 %1182  ;;  %v656_v0 = vadd.f32 %v652_v9, %v631_v42  ;;  %v678_v10 = vadd.f32 %v674_v39, %v653_v11  ;;  %v679_v5 = vadd.f32 %v675_v32, %v654_v36  ;;  %v701_v33 = vmul.f32 %v3915_v43, %v4528_v26 }
 0x2fb   : > { %1438 = vrot.lane.b32.xlu1 %v4516_v40, %s3314_s22  ;;  %v702_v27 = vmul.f32 %v3915_v43, %v4534_v46  ;;  %v716_v55 = vsel %vm715_vm6, %v4005_v14, %v4012_v16  ;;  %v719_v4 = vsel %vm715_vm6, %v4012_v16, %v3999_v12  ;;  %s5792_s22 = smov 16   ;;  %v724_v34 = vmul.f32 %v3936_v50, %v718_v37  ;;  %v5843_v46 = vld [vmem:[#allocation83_spill] sm:$0xff] }
 0x2fc   : > { %v725_v43 = vmul.f32 %v3936_v50, %v717_v3  ;;  %v743_v14 = vsel %vm740_vm7, %v4020_v19, %v4007_v15  ;;  %v742_v12 = vsel %vm740_vm7, %v4007_v15, %v4025_v20  ;;  %v680_v16 = vadd.f32 %v676_v17, %v655_v6 }
 0x2fd   : > { %v681_v18 = vadd.f32 %v677_v60, %v656_v0  ;;  %v703_v9 = vadd.f32 %v699_v48, %v678_v10  ;;  %v704_v39 = vadd.f32 %v700_v1, %v679_v5  ;;  %v726_v32 = vmul.f32 %v3936_v50, %v716_v55  ;;  %v4604_v60 = vld [vmem:[%s3731_s11 + $0x10] sm:$0xff]  ;;  %v4619_v0 = vpop.permute.xlu0 %1296 }
 0x2fe   : > { %v4549_v2 = vpop.permute.xlu1 %1186  ;;  %v727_v54 = vmul.f32 %v3936_v50, %v719_v4  ;;  %v741_v42 = vsel %vm740_vm7, %v4025_v20, %v4033_v23  ;;  %v744_v15 = vsel %vm740_vm7, %v4033_v23, %v4020_v19  ;;  %v749_v36 = vmul.f32 %v3956_v56, %v743_v14  ;;  %v5793_v14 = vld [vmem:[#allocation29_spill] sm:$0xff] }
 0x2ff   : > { %1457 = vrot.lane.b32.xlu1 %v4566_v35, %s5792_s22  ;;  %v750_v17 = vmul.f32 %v3956_v56, %v742_v12  ;;  %v768_v50 = vsel %vm765_vm8, %v4040_v31, %v4027_v21  ;;  %v767_v20 = vsel %vm765_vm8, %v4027_v21, %v4046_v41  ;;  %v705_v19 = vadd.f32 %v701_v33, %v680_v16 }
 0x300   : > { %v706_v23 = vadd.f32 %v702_v27, %v681_v18  ;;  %v728_v48 = vadd.f32 %v724_v34, %v703_v9  ;;  %v729_v1 = vadd.f32 %v725_v43, %v704_v39  ;;  %v751_v37 = vmul.f32 %v3956_v56, %v741_v42  ;;  %v5794_v18 = vld [vmem:[#allocation33_spill] sm:$0xff]  ;;  %v5795_v9 = vld [vmem:[#allocation35_spill] sm:$0xff] }
 0x301   : > { %v752_v3 = vmul.f32 %v3956_v56, %v744_v15  ;;  %v766_v21 = vsel %vm765_vm8, %v4046_v41, %v4053_v49  ;;  %v769_v6 = vsel %vm765_vm8, %v4053_v49, %v4040_v31  ;;  %v774_v10 = vmul.f32 %v3977_v63, %v768_v50 }
 0x302   : > { %v4591_v11 = vpop.permute.xlu1 %1188  ;;  %v775_v5 = vmul.f32 %v3977_v63, %v767_v20  ;;  %v793_v56 = vsel %vm790_vm9, %v4061_v62, %v4048_v45  ;;  %v792_v41 = vsel %vm790_vm9, %v4048_v45, %v4066_v7  ;;  %v730_v27 = vadd.f32 %v726_v32, %v705_v19  ;;  %v4669_v19 = vpop.permute.xlu0 %1234 }
 0x303   : > { %1461 = vrot.lane.b32.xlu1 %v4604_v60, %s5792_s22  ;;  %v731_v31 = vadd.f32 %v727_v54, %v706_v23  ;;  %v753_v49 = vadd.f32 %v749_v36, %v728_v48  ;;  %v754_v55 = vadd.f32 %v750_v17, %v729_v1  ;;  %v776_v4 = vmul.f32 %v3977_v63, %v766_v21  ;;  %v5797_v17 = vld [vmem:[#allocation38_spill] sm:$0xff] }
 0x304   : > { %v777_v34 = vmul.f32 %v3977_v63, %v769_v6  ;;  %v791_v45 = vsel %vm790_vm9, %v4066_v7, %v4074_v22  ;;  %v794_v43 = vsel %vm790_vm9, %v4074_v22, %v4061_v62  ;;  %v799_v12 = vmul.f32 %v5793_v14, %v793_v56  ;;  %v5796_v63 = vld [vmem:[#allocation36_spill] sm:$0xff]  ;;  %v5798_v23 = vld [vmem:[#allocation30_spill] sm:$0xff]  ;;  %v5801_v6 = vld [vmem:[#allocation41_spill] sm:$0xff] }
 0x305   : > { %v800_v16 = vmul.f32 %v5793_v14, %v792_v41  ;;  %v818_v39 = vsel %vm815_vm10, %v5795_v9, %v5794_v18  ;;  %v817_v32 = vsel %vm815_vm10, %v5794_v18, %v5796_v63  ;;  %v755_v7 = vadd.f32 %v751_v37, %v730_v27  ;;  %v5799_v37 = vld [vmem:[#allocation37_spill] sm:$0xff] }
 0x306   : > { %v4631_v33 = vpop.permute.xlu1 %1207  ;;  %v756_v54 = vadd.f32 %v752_v3, %v731_v31  ;;  %v778_v42 = vadd.f32 %v774_v10, %v753_v49  ;;  %v779_v15 = vadd.f32 %v775_v5, %v754_v55  ;;  %v801_v22 = vmul.f32 %v5793_v14, %v791_v45  ;;  %v5800_v3 = vld [vmem:[#allocation40_spill] sm:$0xff]  ;;  %v5802_v55 = vld [vmem:[#allocation43_spill] sm:$0xff]  ;;  %v5805_v18 = vld [vmem:[#allocation45_spill] sm:$0xff] }
 0x307   : > { %1463 = vrot.lane.b32.xlu1 %v4516_v40, %s5792_s22  ;;  %v802_v36 = vmul.f32 %v5793_v14, %v794_v43  ;;  %v816_v50 = vsel %vm815_vm10, %v5796_v63, %v5797_v17  ;;  %v819_v20 = vsel %vm815_vm10, %v5797_v17, %v5795_v9  ;;  %v824_v48 = vmul.f32 %v5798_v23, %v818_v39  ;;  %v5806_v39 = vld [vmem:[#allocation46_spill] sm:$0xff] }
 0x308   : > { %v825_v1 = vmul.f32 %v5798_v23, %v817_v32  ;;  %v843_v21 = vsel %vm840_vm11, %v5800_v3, %v5799_v37  ;;  %v842_v10 = vsel %vm840_vm11, %v5799_v37, %v5801_v6  ;;  %v780_v5 = vadd.f32 %v776_v4, %v755_v7  ;;  %v5809_v37 = vld [vmem:[#allocation47_spill] sm:$0xff] }
 0x309   : > { %v781_v56 = vadd.f32 %v777_v34, %v756_v54  ;;  %v803_v41 = vadd.f32 %v799_v12, %v778_v42  ;;  %v804_v27 = vadd.f32 %v800_v16, %v779_v15  ;;  %v826_v31 = vmul.f32 %v5798_v23, %v816_v50  ;;  %v5803_v34 = vld [vmem:[#allocation31_spill] sm:$0xff]  ;;  %v5804_v16 = vld [vmem:[#allocation42_spill] sm:$0xff]  ;;  %v5807_v50 = vld [vmem:[#allocation48_spill] sm:$0xff] }
 0x30a   : > { %v4657_v62 = vpop.permute.xlu1 %1211  ;;  %v827_v49 = vmul.f32 %v5798_v23, %v819_v20  ;;  %v841_v45 = vsel %vm840_vm11, %v5801_v6, %v5802_v55  ;;  %v844_v43 = vsel %vm840_vm11, %v5802_v55, %v5800_v3  ;;  %v849_v14 = vmul.f32 %v5803_v34, %v843_v21  ;;  %v5810_v3 = vld [vmem:[#allocation50_spill] sm:$0xff]  ;;  %v5811_v6 = vld [vmem:[#allocation51_spill] sm:$0xff] }
 0x30b   : > { %1482 = vrot.lane.b32.xlu1 %v4566_v35, %s3318_s29  ;;  %v850_v12 = vmul.f32 %v5803_v34, %v842_v10  ;;  %v868_v9 = vsel %vm865_vm12, %v5805_v18, %v5804_v16  ;;  %v867_v63 = vsel %vm865_vm12, %v5804_v16, %v5806_v39  ;;  %v805_v32 = vadd.f32 %v801_v22, %v780_v5  ;;  %v4719_v22 = vpop.permute.xlu0 %1321 }
 0x30c   : > { %v806_v7 = vadd.f32 %v802_v36, %v781_v56  ;;  %v828_v54 = vadd.f32 %v824_v48, %v803_v41  ;;  %v829_v42 = vadd.f32 %v825_v1, %v804_v27  ;;  %v851_v15 = vmul.f32 %v5803_v34, %v841_v45  ;;  %v5808_v36 = vld [vmem:[#allocation32_spill] sm:$0xff] }
 0x30d   : > { %v852_v17 = vmul.f32 %v5803_v34, %v844_v43  ;;  %v866_v20 = vsel %vm865_vm12, %v5806_v39, %v5807_v50  ;;  %v869_v23 = vsel %vm865_vm12, %v5807_v50, %v5805_v18  ;;  %v874_v48 = vmul.f32 %v5808_v36, %v868_v9  ;;  %v5812_v34 = vld [vmem:[#allocation53_spill] sm:$0xff]  ;;  %v5814_v18 = vld [vmem:[#allocation52_spill] sm:$0xff]  ;;  %v5815_v9 = vld [vmem:[#allocation55_spill] sm:$0xff] }
 0x30e   : > { %v4694_v4 = vpop.permute.xlu1 %1213  ;;  %v875_v1 = vmul.f32 %v5808_v36, %v867_v63  ;;  %v893_v21 = vsel %vm890_vm13, %v5810_v3, %v5809_v37  ;;  %v892_v10 = vsel %vm890_vm13, %v5809_v37, %v5811_v6  ;;  %v830_v56 = vadd.f32 %v826_v31, %v805_v32  ;;  %v5816_v63 = vld [vmem:[#allocation56_spill] sm:$0xff]  ;;  %v5817_v37 = vld [vmem:[#allocation58_spill] sm:$0xff] }
 0x30f   : > { %1486 = vrot.lane.b32.xlu1 %v4604_v60, %s3318_s29  ;;  %v831_v41 = vadd.f32 %v827_v49, %v806_v7  ;;  %v853_v27 = vadd.f32 %v849_v14, %v828_v54  ;;  %v854_v55 = vadd.f32 %v850_v12, %v829_v42  ;;  %v876_v45 = vmul.f32 %v5808_v36, %v866_v20  ;;  %v5813_v49 = vld [vmem:[#allocation34_spill] sm:$0xff] }
 0x310   : > { %v877_v43 = vmul.f32 %v5808_v36, %v869_v23  ;;  %v891_v16 = vsel %vm890_vm13, %v5811_v6, %v5812_v34  ;;  %v894_v31 = vsel %vm890_vm13, %v5812_v34, %v5810_v3  ;;  %v899_v14 = vmul.f32 %v5813_v49, %v893_v21  ;;  %v5819_v6 = vld [vmem:[#allocation57_spill] sm:$0xff] }
 0x311   : > { %v900_v12 = vmul.f32 %v5813_v49, %v892_v10  ;;  %v918_v39 = vsel %vm915_vm14, %v5815_v9, %v5814_v18  ;;  %v917_v32 = vsel %vm915_vm14, %v5814_v18, %v5816_v63  ;;  %v855_v7 = vadd.f32 %v851_v15, %v830_v56  ;;  %v5820_v10 = vld [vmem:[#allocation60_spill] sm:$0xff] }
 0x312   : > { %v4731_v5 = vpop.permute.xlu1 %1232  ;;  %v856_v54 = vadd.f32 %v852_v17, %v831_v41  ;;  %v878_v42 = vadd.f32 %v874_v48, %v853_v27  ;;  %v879_v50 = vadd.f32 %v875_v1, %v854_v55  ;;  %v901_v23 = vmul.f32 %v5813_v49, %v891_v16  ;;  %v4769_v17 = vpop.permute.xlu0 %1259  ;;  %v5818_v48 = vld [vmem:[#allocation39_spill] sm:$0xff]  ;;  %v5821_v41 = vld [vmem:[#allocation61_spill] sm:$0xff] }
 0x313   : > { %1488 = vrot.lane.b32.xlu1 %v4516_v40, %s3318_s29  ;;  %v902_v36 = vmul.f32 %v5813_v49, %v894_v31  ;;  %v916_v3 = vsel %vm915_vm14, %v5816_v63, %v5817_v37  ;;  %v919_v15 = vsel %vm915_vm14, %v5817_v37, %v5815_v9  ;;  %v924_v1 = vmul.f32 %v5818_v48, %v918_v39  ;;  %v5822_v9 = vld [vmem:[#allocation63_spill] sm:$0xff]  ;;  %s2478_s29 = sshll.u32 %s3417_s23, 9  ;;  %s2254_s23 = scalar_lea.sflag [#allocation4], %s3725_s24 }
 0x314   : > { %v925_v21 = vmul.f32 %v5818_v48, %v917_v32  ;;  %v943_v56 = vsel %vm940_vm15, %v5820_v10, %v5819_v6  ;;  %v942_v27 = vsel %vm940_vm15, %v5819_v6, %v5821_v41  ;;  %v880_v55 = vadd.f32 %v876_v45, %v855_v7  ;;  %v5824_v32 = vld [vmem:[#allocation62_spill] sm:$0xff]  ;;  %v5825_v7 = vld [vmem:[#allocation65_spill] sm:$0xff] }
 0x315   : > { %v881_v34 = vadd.f32 %v877_v43, %v856_v54  ;;  %v903_v16 = vadd.f32 %v899_v14, %v878_v42  ;;  %v904_v31 = vadd.f32 %v900_v12, %v879_v50  ;;  %v926_v49 = vmul.f32 %v5818_v48, %v916_v3  ;;  %v5823_v43 = vld [vmem:[#allocation44_spill] sm:$0xff]  ;;  %v5826_v42 = vld [vmem:[#allocation66_spill] sm:$0xff] }
 0x316   : > { %v4757_v20 = vpop.permute.xlu1 %1236  ;;  %v927_v18 = vmul.f32 %v5818_v48, %v919_v15  ;;  %v941_v39 = vsel %vm940_vm15, %v5821_v41, %v5822_v9  ;;  %v944_v63 = vsel %vm940_vm15, %v5822_v9, %v5820_v10  ;;  %v949_v14 = vmul.f32 %v5823_v43, %v943_v56  ;;  %v5827_v56 = vld [vmem:[#allocation68_spill] sm:$0xff]  ;;  %v4818_v9 = vpop.permute.xlu0 %1346 }
 0x317   : > { %1507 = vrot.lane.b32.xlu1 %v4566_v35, %s3320_s15  ;;  %v950_v12 = vmul.f32 %v5823_v43, %v942_v27  ;;  %v968_v54 = vsel %vm965_vm0, %v5825_v7, %v5824_v32  ;;  %v967_v50 = vsel %vm965_vm0, %v5824_v32, %v5826_v42  ;;  %v905_v37 = vadd.f32 %v901_v23, %v880_v55  ;;  %v5828_v23 = vld [vmem:[#allocation49_spill] sm:$0xff]  ;;  %v5830_v55 = vld [vmem:[#allocation70_spill] sm:$0xff] }
 0x318   : > { %v906_v3 = vadd.f32 %v902_v36, %v881_v34  ;;  %v928_v15 = vadd.f32 %v924_v1, %v903_v16  ;;  %v929_v48 = vadd.f32 %v925_v21, %v904_v31  ;;  %v951_v6 = vmul.f32 %v5823_v43, %v941_v39  ;;  %v5829_v21 = vld [vmem:[#allocation67_spill] sm:$0xff] }
 0x319   : > { %v952_v10 = vmul.f32 %v5823_v43, %v944_v63  ;;  %v966_v41 = vsel %vm965_vm0, %v5826_v42, %v5827_v56  ;;  %v969_v27 = vsel %vm965_vm0, %v5827_v56, %v5825_v7  ;;  %v974_v36 = vmul.f32 %v5828_v23, %v968_v54  ;;  %v5831_v16 = vld [vmem:[#allocation71_spill] sm:$0xff] }
 0x31a   : > { %v4794_v45 = vpop.permute.xlu1 %1238  ;;  %v975_v1 = vmul.f32 %v5828_v23, %v967_v50  ;;  %v993_v34 = vsel %vm990_vm1, %v5830_v55, %v5829_v21  ;;  %v992_v31 = vsel %vm990_vm1, %v5829_v21, %v5831_v16  ;;  %v930_v63 = vadd.f32 %v926_v49, %v905_v37  ;;  %v5832_v50 = vld [vmem:[#allocation73_spill] sm:$0xff]  ;;  %v5834_v37 = vld [vmem:[#allocation72_spill] sm:$0xff] }
 0x31b   : > { %1511 = vrot.lane.b32.xlu1 %v4604_v60, %s3320_s15  ;;  %v931_v43 = vadd.f32 %v927_v18, %v906_v3  ;;  %v953_v32 = vadd.f32 %v949_v14, %v928_v15  ;;  %v954_v7 = vadd.f32 %v950_v12, %v929_v48  ;;  %v976_v54 = vmul.f32 %v5828_v23, %v966_v41  ;;  %v5833_v18 = vld [vmem:[#allocation54_spill] sm:$0xff]  ;;  %v5835_v3 = vld [vmem:[#allocation75_spill] sm:$0xff]  ;;  %v5836_v48 = vld [vmem:[#allocation76_spill] sm:$0xff] }
 0x31c   : > { %v977_v42 = vmul.f32 %v5828_v23, %v969_v27  ;;  %v991_v56 = vsel %vm990_vm1, %v5831_v16, %v5832_v50  ;;  %v994_v49 = vsel %vm990_vm1, %v5832_v50, %v5830_v55  ;;  %vm1090_vm5 = vcmp.lt.s32.totalorder %v4335_v58, 61  ;;  %v5837_v50 = vld [vmem:[#allocation78_spill] sm:$0xff] }
 0x31d   : > { %v999_v14 = vmul.f32 %v5833_v18, %v993_v34  ;;  %v1000_v12 = vmul.f32 %v5833_v18, %v992_v31  ;;  %v1018_v15 = vsel %vm1015_vm2, %v5835_v3, %v5834_v37  ;;  %v1017_v41 = vsel %vm1015_vm2, %v5834_v37, %v5836_v48 }
 0x31e   : > { %v4831_v39 = vpop.permute.xlu1 %1257  ;;  %v955_v27 = vadd.f32 %v951_v6, %v930_v63  ;;  %v956_v23 = vadd.f32 %v952_v10, %v931_v43  ;;  %v978_v21 = vadd.f32 %v974_v36, %v953_v32  ;;  %v979_v55 = vadd.f32 %v975_v1, %v954_v7  ;;  %v4868_v6 = vpop.permute.xlu0 %1284  ;;  %v5839_v10 = vld [vmem:[#allocation59_spill] sm:$0xff]  ;;  %v5840_v63 = vld [vmem:[#allocation77_spill] sm:$0xff]  ;;  %v5841_v43 = vld [vmem:[#allocation80_spill] sm:$0xff] }
 0x31f   : > { %1513 = vrot.lane.b32.xlu1 %v4516_v40, %s3320_s15  ;;  %v1001_v34 = vmul.f32 %v5833_v18, %v991_v56  ;;  %v1002_v31 = vmul.f32 %v5833_v18, %v994_v49  ;;  %v1016_v59 = vsel %vm1015_vm2, %v5836_v48, %v5837_v50  ;;  %v1019_v37 = vsel %vm1015_vm2, %v5837_v50, %v5835_v3  ;;  %v5842_v7 = vld [vmem:[#allocation81_spill] sm:$0xff] }
 0x320   : > { %vm1115_vm6 = vcmp.lt.s32.totalorder %v4335_v58, 60  ;;  %v1024_v36 = vmul.f32 %v5839_v10, %v1018_v15  ;;  %v1025_v1 = vmul.f32 %v5839_v10, %v1017_v41  ;;  %v1043_v32 = vsel %vm1040_vm3, %v5841_v43, %v5840_v63 }
 0x321   : > { %v1042_v56 = vsel %vm1040_vm3, %v5840_v63, %v5842_v7  ;;  %v980_v49 = vadd.f32 %v976_v54, %v955_v27  ;;  %v981_v18 = vadd.f32 %v977_v42, %v956_v23  ;;  %v1003_v3 = vadd.f32 %v999_v14, %v978_v21  ;;  %v5844_v42 = vld [vmem:[#allocation64_spill] sm:$0xff]  ;;  %v5845_v21 = vld [vmem:[#allocation82_spill] sm:$0xff] }
 0x322   : > { %v4856_v16 = vpop.permute.xlu1 %1261  ;;  %v1004_v48 = vadd.f32 %v1000_v12, %v979_v55  ;;  %v1026_v50 = vmul.f32 %v5839_v10, %v1016_v59  ;;  %v1027_v15 = vmul.f32 %v5839_v10, %v1019_v37  ;;  %v1041_v41 = vsel %vm1040_vm3, %v5842_v7, %v5843_v46  ;;  %v5846_v55 = vld [vmem:[#allocation85_spill] sm:$0xff]  ;;  %v4904_v37 = vpop.permute.xlu0 %1371  ;;  %v5847_v63 = vld [vmem:[#allocation86_spill] sm:$0xff] }
 0x323   : > { %1532 = vrot.lane.b32.xlu1 %v4566_v35, %s5838_s28  ;;  %v1044_v26 = vsel %vm1040_vm3, %v5843_v46, %v5841_v43  ;;  %v1005_v54 = vadd.f32 %v1001_v34, %v980_v49  ;;  %v1049_v14 = vmul.f32 %v5844_v42, %v1043_v32  ;;  %v1050_v12 = vmul.f32 %v5844_v42, %v1042_v56  ;;  %v5848_v32 = vld [vmem:[#allocation88_spill] sm:$0xff] }
 0x324   : > { %vm1140_vm7 = vcmp.lt.s32.totalorder %v4335_v58, 59  ;;  %v1006_v59 = vadd.f32 %v1002_v31, %v981_v18  ;;  %v1028_v27 = vadd.f32 %v1024_v36, %v1003_v3  ;;  %v1029_v23 = vadd.f32 %v1025_v1, %v1004_v48  ;;  %v5849_v18 = vld [vmem:[#allocation69_spill] sm:$0xff]  ;;  %v5850_v48 = vld [vmem:[#allocation87_spill] sm:$0xff] }
 0x325   : > { %v1068_v46 = vsel %vm1065_vm4, %v5846_v55, %v5845_v21  ;;  %v1051_v34 = vmul.f32 %v5844_v42, %v1041_v41  ;;  %v1052_v10 = vmul.f32 %v5844_v42, %v1044_v26  ;;  %v1067_v43 = vsel %vm1065_vm4, %v5845_v21, %v5847_v63  ;;  %v5851_v41 = vld [vmem:[#allocation90_spill] sm:$0xff] }
 0x326   : > { %v4893_v57 = vpop.permute.xlu1 %1263  ;;  %v1066_v31 = vsel %vm1065_vm4, %v5847_v63, %v5848_v32  ;;  %v1030_v36 = vadd.f32 %v1026_v50, %v1005_v54  ;;  %v1031_v1 = vadd.f32 %v1027_v15, %v1006_v59  ;;  %v1069_v7 = vsel %vm1065_vm4, %v5848_v32, %v5846_v55  ;;  %v5852_v54 = vld [vmem:[#allocation91_spill] sm:$0xff] }
 0x327   : > { %1536 = vrot.lane.b32.xlu1 %v4604_v60, %s5838_s28  ;;  %vm1165_vm8 = vcmp.lt.s32.totalorder %v4335_v58, 58  ;;  %v1053_v56 = vadd.f32 %v1049_v14, %v1028_v27  ;;  %v1054_v49 = vadd.f32 %v1050_v12, %v1029_v23  ;;  %v1074_v3 = vmul.f32 %v5849_v18, %v1068_v46  ;;  %v5853_v12 = vld [vmem:[#allocation93_spill] sm:$0xff]  ;;  %v5854_v46 = vld [vmem:[#allocation74_spill] sm:$0xff]  ;;  %v5856_v32 = vld [vmem:[#allocation95_spill] sm:$0xff] }
 0x328   : > { %v1093_v42 = vsel %vm1090_vm5, %v5851_v41, %v5850_v48  ;;  %v1075_v50 = vmul.f32 %v5849_v18, %v1067_v43  ;;  %v1076_v15 = vmul.f32 %v5849_v18, %v1066_v31  ;;  %v1092_v14 = vsel %vm1090_vm5, %v5850_v48, %v5852_v54  ;;  %v5855_v43 = vld [vmem:[#allocation92_spill] sm:$0xff] }
 0x329   : > { %v1091_v59 = vsel %vm1090_vm5, %v5852_v54, %v5853_v12  ;;  %vm1190_vm9 = vcmp.lt.s32.totalorder %v4335_v58, 57  ;;  %v1055_v27 = vadd.f32 %v1051_v34, %v1030_v36  ;;  %v1056_v23 = vadd.f32 %v1052_v10, %v1031_v1  ;;  %v5857_v48 = vld [vmem:[#allocation96_spill] sm:$0xff]  ;;  %v5858_v10 = vld [vmem:[#allocation98_spill] sm:$0xff] }
 0x32a   : > { %v4921_v26 = vpop.permute.xlu1 %1282  ;;  %v1077_v21 = vmul.f32 %v5849_v18, %v1069_v7  ;;  %v1094_v55 = vsel %vm1090_vm5, %v5853_v12, %v5851_v41  ;;  %v1099_v63 = vmul.f32 %v5854_v46, %v1093_v42  ;;  %v1118_v31 = vsel %vm1115_vm6, %v5856_v32, %v5855_v43  ;;  %v4962_v7 = vpop.permute.xlu0 %1309 }
 0x32b   : > { %1538 = vrot.lane.b32.xlu1 %v4516_v40, %s5838_s28  ;;  %v1117_v34 = vsel %vm1115_vm6, %v5855_v43, %v5857_v48  ;;  %v1116_v36 = vsel %vm1115_vm6, %v5857_v48, %v5858_v10  ;;  %vm1215_vm10 = vcmp.lt.s32.totalorder %v4335_v58, 56  ;;  %v1078_v18 = vadd.f32 %v1074_v3, %v1053_v56  ;;  %v5861_v3 = vld [vmem:[#allocation79_spill] sm:$0xff] }
 0x32c   : > { %v1100_v41 = vmul.f32 %v5854_v46, %v1092_v14  ;;  %v1101_v42 = vmul.f32 %v5854_v46, %v1091_v59  ;;  %v1119_v54 = vsel %vm1115_vm6, %v5858_v10, %v5856_v32  ;;  %v1079_v12 = vadd.f32 %v1075_v50, %v1054_v49  ;;  %v5862_v32 = vld [vmem:[#allocation101_spill] sm:$0xff] }
 0x32d   : > { %v1080_v43 = vadd.f32 %v1076_v15, %v1055_v27  ;;  %v1102_v48 = vmul.f32 %v5854_v46, %v1094_v55  ;;  %v4977_v56 = vsel %vm1140_vm7, %v5860_v8, %v5859_v52  ;;  %v1124_v14 = vmul.f32 %v5861_v3, %v1118_v31 }
 0x32e   : > { %v4960_v1 = vpop.permute.xlu1 %1286  ;;  %v1125_v59 = vmul.f32 %v5861_v3, %v1117_v34  ;;  %v1126_v53 = vmul.f32 %v5861_v3, %v1116_v36  ;;  %v4986_v49 = vsel %vm1140_vm7, %v5859_v52, %v5862_v32  ;;  %v1081_v50 = vadd.f32 %v1077_v21, %v1056_v23  ;;  %v5863_v34 = vld [vmem:[#allocation84_spill] sm:$0xff]  ;;  %v5864_v36 = vld [vmem:[#allocation103_spill] sm:$0xff] }
 0x32f   : > { %1557 = vrot.lane.b32.xlu1 %v4566_v35, %s3324_s13  ;;  %v1103_v15 = vadd.f32 %v1099_v63, %v1078_v18  ;;  %v1127_v27 = vmul.f32 %v5861_v3, %v1119_v54  ;;  %vm1240_vm11 = vcmp.lt.s32.totalorder %v4335_v58, 40  ;;  %v1104_v46 = vadd.f32 %v1100_v41, %v1079_v12  ;;  %v5010_v63 = vpop.permute.xlu0 %1396  ;;  %v5865_v54 = vld [vmem:[#allocation102_spill] sm:$0xff]  ;;  %v5866_v12 = vld [vmem:[#allocation105_spill] sm:$0xff] }
 0x330   : > { %v1105_v31 = vadd.f32 %v1101_v42, %v1080_v43  ;;  %v1149_v10 = vmul.f32 %v5863_v34, %v4977_v56  ;;  %v4998_v51 = vsel %vm1140_vm7, %v5862_v32, %v5864_v36  ;;  %v1106_v52 = vadd.f32 %v1102_v48, %v1081_v50 }
 0x331   : > { %v1150_v23 = vmul.f32 %v5863_v34, %v4986_v49  ;;  %v5008_v21 = vsel %vm1140_vm7, %v5864_v36, %v5860_v8  ;;  %v1128_v18 = vadd.f32 %v1124_v14, %v1103_v15  ;;  %v1129_v41 = vadd.f32 %v1125_v59, %v1104_v46  ;;  %v5867_v15 = vld [vmem:[#allocation89_spill] sm:$0xff] }
 0x332   : > { %v4990_v55 = vpop.permute.xlu1 %1288  ;;  %v1130_v42 = vadd.f32 %v1126_v53, %v1105_v31  ;;  %v1131_v43 = vadd.f32 %v1127_v27, %v1106_v52  ;;  %v1151_v48 = vmul.f32 %v5863_v34, %v4998_v51  ;;  %v1167_v8 = vsel %vm1165_vm8, %v5865_v54, %v4412_v38 }
 0x333   : > { %1561 = vrot.lane.b32.xlu1 %v4604_v60, %s3324_s13  ;;  %v1168_v60 = vsel %vm1165_vm8, %v5866_v12, %v5865_v54  ;;  %v1166_v3 = vsel %vm1165_vm8, %v4412_v38, %v4457_v29  ;;  %vm1265_vm12 = vcmp.lt.s32.totalorder %v4335_v58, 39  ;;  %v1153_v14 = vadd.f32 %v1149_v10, %v1128_v18  ;;  %v5069_v54 = vpop.permute.xlu0 %1334 }
 0x334   : > { %v1152_v59 = vmul.f32 %v5863_v34, %v5008_v21  ;;  %v1169_v32 = vsel %vm1165_vm8, %v4457_v29, %v5866_v12  ;;  %v1193_v50 = vsel %vm1190_vm9, %v4512_v61, %v4424_v13  ;;  %v1154_v38 = vadd.f32 %v1150_v23, %v1129_v41 }
 0x335   : > { %v1174_v27 = vmul.f32 %v5867_v15, %v1168_v60  ;;  %v1192_v46 = vsel %vm1190_vm9, %v4424_v13, %v4549_v2  ;;  %v1191_v29 = vsel %vm1190_vm9, %v4549_v2, %v4591_v11  ;;  %vm1290_vm13 = vcmp.lt.s32.totalorder %v4335_v58, 38  ;;  %v5868_v2 = vld [vmem:[#allocation94_spill] sm:$0xff]  ;;  %v2827_v60 = vld [vmem:[#allocation7] sm:$0xff] }
 0x336   : > { %v5027_v53 = vpop.permute.xlu1 %1307  ;;  %v1175_v31 = vmul.f32 %v5867_v15, %v1167_v8  ;;  %v1176_v34 = vmul.f32 %v5867_v15, %v1166_v3  ;;  %v1194_v10 = vsel %vm1190_vm9, %v4591_v11, %v4512_v61  ;;  %v1218_v13 = vsel %vm1215_vm10, %v4631_v33, %v4563_v30  ;;  %v5869_v8 = vld [vmem:[#allocation99_spill] sm:$0xff] }
 0x337   : > { %1563 = vrot.lane.b32.xlu1 %v4516_v40, %s3324_s13  ;;  %v1155_v36 = vadd.f32 %v1151_v48, %v1130_v42  ;;  %v1177_v52 = vmul.f32 %v5867_v15, %v1169_v32  ;;  %v1199_v23 = vmul.f32 %v5868_v2, %v1193_v50  ;;  %v1217_v18 = vsel %vm1215_vm10, %v4563_v30, %v4657_v62 }
 0x338   : > { %v1156_v61 = vadd.f32 %v1152_v59, %v1131_v43  ;;  %v1200_v11 = vmul.f32 %v5868_v2, %v1192_v46  ;;  %v1201_v12 = vmul.f32 %v5868_v2, %v1191_v29  ;;  %v1216_v42 = vsel %vm1215_vm10, %v4657_v62, %v4694_v4 }
 0x339   : > { %vm1315_vm14 = vcmp.lt.s32.totalorder %v4335_v58, 37  ;;  %v1178_v48 = vadd.f32 %v1174_v27, %v1153_v14  ;;  %v1202_v30 = vmul.f32 %v5868_v2, %v1194_v10  ;;  %v1224_v3 = vmul.f32 %v5869_v8, %v1218_v13 }
 0x33a   : > { %v5067_v41 = vpop.permute.xlu1 %1311  ;;  %v1219_v43 = vsel %vm1215_vm10, %v4694_v4, %v4631_v33  ;;  %v1179_v59 = vadd.f32 %v1175_v31, %v1154_v38  ;;  %v1180_v32 = vadd.f32 %v1176_v34, %v1155_v36  ;;  %v1225_v50 = vmul.f32 %v5869_v8, %v1217_v18  ;;  %v5870_v36 = vld [vmem:[#allocation104_spill] sm:$0xff] }
 0x33b   : > { %1632 = vperm.xlu1 %2784, %v2827_v60   ;;  %v1243_v62 = vsel %vm1240_vm11, %v4731_v5, %v4669_v19  ;;  %v1181_v15 = vadd.f32 %v1177_v52, %v1156_v61  ;;  %v1203_v14 = vadd.f32 %v1199_v23, %v1178_v48  ;;  %v1226_v27 = vmul.f32 %v5869_v8, %v1216_v42  ;;  %v5105_v23 = vpop.permute.xlu0 %1421 }
 0x33c   : > { %v1241_v46 = vsel %vm1240_vm11, %v4757_v20, %v4794_v45  ;;  %vm1340_vm15 = vcmp.lt.s32.totalorder %v4335_v58, 36  ;;  %v1204_v33 = vadd.f32 %v1200_v11, %v1179_v59  ;;  %v1205_v4 = vadd.f32 %v1201_v12, %v1180_v32  ;;  %v5140_v59 = vld [vmem:[%s3731_s11 + $0x8] sm:$0xff]  ;;  %s5881_s11 = sshll.u32 %s3725_s24, 5 }
 0x33d   : > { %v1227_v38 = vmul.f32 %v5869_v8, %v1219_v43  ;;  %v1244_v31 = vsel %vm1240_vm11, %v4794_v45, %v4731_v5  ;;  %v3333_v34 = vmov 47   ;;  %v1206_v10 = vadd.f32 %v1202_v30, %v1181_v15  ;;  %s5488_s15 = scalar_lea.vmem [#allocation20], %s5881_s11 }
 0x33e   : > { %v1314_v29 = vpop.permute.xlu1 %1313  ;;  %v1228_v13 = vadd.f32 %v1224_v3, %v1203_v14  ;;  %v1249_v52 = vmul.f32 %v5870_v36, %v1243_v62  ;;  %v1266_v2 = vsel %vm1265_vm12, %v4856_v16, %v4893_v57  ;;  %v1229_v18 = vadd.f32 %v1225_v50, %v1204_v33  ;;  %s2268_s13 = sshll.u32 %s5488_s15, 4  ;;  %s5513_s13 = int_to_ptr.vmem [resolvable:$true] %s2268_s13 }
 0x33f   : > { %2786 = vset.pattern.permute.xlu1 %v3333_v34  ;;  %v1251_v61 = vmul.f32 %v5870_v36, %v1241_v46  ;;  %v1268_v5 = vsel %vm1265_vm12, %v4831_v39, %v4769_v17  ;;  %v1269_v45 = vsel %vm1265_vm12, %v4893_v57, %v4831_v39  ;;  %v1230_v11 = vadd.f32 %v1226_v27, %v1205_v4  ;;  %v1360_v4 = vpop.permute.xlu0 %1359 }
 0x340   : > { %1682 = vperm.xlu1 %2786, %v2827_v60   ;;  %v1242_v12 = vsel %vm1240_vm11, %v4669_v19, %v4757_v20  ;;  %v1252_v42 = vmul.f32 %v5870_v36, %v1244_v31  ;;  %v1291_v60 = vsel %vm1290_vm13, %v4960_v1, %v4990_v55  ;;  %v1231_v30 = vadd.f32 %v1227_v38, %v1206_v10 }
 0x341   : > { %v1276_v8 = vmul.f32 %v4494_v28, %v1266_v2  ;;  %v1293_v57 = vsel %vm1290_vm13, %v4921_v26, %v4868_v6  ;;  %v1294_v19 = vsel %vm1290_vm13, %v4990_v55, %v4921_v26  ;;  %v1253_v20 = vadd.f32 %v1249_v52, %v1228_v13 }
 0x342   : > { %v1333_v48 = vpop.permute.xlu1 %1332  ;;  %v1274_v39 = vmul.f32 %v4494_v28, %v1268_v5  ;;  %v1277_v3 = vmul.f32 %v4494_v28, %v1269_v45  ;;  %v1316_v43 = vsel %vm1315_vm14, %v5067_v41, %v1314_v29  ;;  %v1250_v32 = vmul.f32 %v5870_v36, %v1242_v12 }
 0x343   : > { %v1255_v50 = vadd.f32 %v1251_v61, %v1230_v11  ;;  %v1301_v62 = vmul.f32 %v4619_v0, %v1291_v60  ;;  %v1319_v26 = vsel %vm1315_vm14, %v1314_v29, %v5027_v53  ;;  %v5871_v55 = vmov 0  }
 0x344   : > { %1620 = vrot.lane.b32.xlu1 %v5140_v59, %s3328_s26  ;;  %v1256_v15 = vadd.f32 %v1252_v42, %v1231_v30  ;;  %v1267_v14 = vsel %vm1265_vm12, %v4769_v17, %v4856_v16  ;;  %v1299_v27 = vmul.f32 %v4619_v0, %v1293_v57  ;;  %v1302_v46 = vmul.f32 %v4619_v0, %v1294_v19  ;;  %v5188_v30 = vpop.permute.xlu0 %1446 }
 0x345   : > { %2789 = vset.pattern.permute.xlu1 %v5871_v55  ;;  %v1280_v38 = vadd.f32 %v1276_v8, %v1255_v50  ;;  %v1292_v29 = vsel %vm1290_vm13, %v4868_v6, %v4960_v1  ;;  %v1318_v31 = vsel %vm1315_vm14, %v5027_v53, %v4962_v7  ;;  %v1326_v34 = vmul.f32 %v4719_v22, %v1316_v43 }
 0x346   : > { %v1337_v33 = vpop.permute.xlu1 %1336  ;;  %v1278_v17 = vadd.f32 %v1274_v39, %v1253_v20  ;;  %v1281_v16 = vadd.f32 %v1277_v3, %v1256_v15  ;;  %v1327_v10 = vmul.f32 %v4719_v22, %v1319_v26  ;;  %vm1365_vm0 = vcmp.lt.s32.totalorder %v4335_v58, 35 }
 0x347   : > { %v1254_v13 = vadd.f32 %v1250_v32, %v1229_v18  ;;  %v1275_v36 = vmul.f32 %v4494_v28, %v1267_v14  ;;  %v1305_v6 = vadd.f32 %v1301_v62, %v1280_v38  ;;  %v1343_v1 = vsel %vm1340_vm15, %v1333_v48, %v5069_v54 }
 0x348   : > { %1624 = vrot.lane.b32.xlu1 %v4516_v40, %s3328_s26  ;;  %v1303_v53 = vadd.f32 %v1299_v27, %v1278_v17  ;;  %v1300_v52 = vmul.f32 %v4619_v0, %v1292_v29  ;;  %v1306_v2 = vadd.f32 %v1302_v46, %v1281_v16  ;;  %v1324_v61 = vmul.f32 %v4719_v22, %v1318_v31  ;;  %v1385_v26 = vpop.permute.xlu0 %1384 }
 0x349   : > { %v1317_v45 = vsel %vm1315_vm14, %v4962_v7, %v5067_v41  ;;  %v1330_v18 = vadd.f32 %v1326_v34, %v1305_v6  ;;  %v1349_v42 = vmul.f32 %v4818_v9, %v1343_v1  ;;  %v1279_v7 = vadd.f32 %v1275_v36, %v1254_v13 }
 0x34a   : > { %v1339_v5 = vpop.permute.xlu1 %1338  ;;  %v1331_v12 = vadd.f32 %v1327_v10, %v1306_v2  ;;  %v1342_v41 = vsel %vm1340_vm15, %v5069_v54, %v1337_v33  ;;  %v1328_v8 = vadd.f32 %v1324_v61, %v1303_v53  ;;  %vm1390_vm1 = vcmp.lt.s32.totalorder %v4335_v58, 34 }
 0x34b   : > { %v1341_v28 = vsel %vm1340_vm15, %v1337_v33, %v1339_v5  ;;  %v1344_v11 = vsel %vm1340_vm15, %v1339_v5, %v1333_v48  ;;  %v1325_v48 = vmul.f32 %v4719_v22, %v1317_v45  ;;  %v1304_v3 = vadd.f32 %v1300_v52, %v1279_v7 }
 0x34c   : > { %v1351_v0 = vmul.f32 %v4818_v9, %v1341_v28  ;;  %v1352_v60 = vmul.f32 %v4818_v9, %v1344_v11  ;;  %1618 = vrot.lane.b32.xlu1 %v4566_v35, %s3328_s26  ;;  %v1353_v43 = vadd.f32 %v1349_v42, %v1328_v8  ;;  %v1350_v35 = vmul.f32 %v4818_v9, %v1342_v41 }
 0x34d   : > { %v1329_v50 = vadd.f32 %v1325_v48, %v1304_v3  ;;  %vm1415_vm2 = vcmp.lt.s32.totalorder %v4335_v58, 18  ;;  %vm1440_vm3 = vcmp.lt.s32.totalorder %v4335_v58, 17  ;;  %vm1465_vm4 = vcmp.lt.s32.totalorder %v4335_v58, 16 }
 0x34e   : > { %v1355_v57 = vadd.f32 %v1351_v0, %v1330_v18  ;;  %v1356_v19 = vadd.f32 %v1352_v60, %v1331_v12  ;;  %v1358_v20 = vpop.permute.xlu1 %1357  ;;  %vm1490_vm5 = vcmp.lt.s32.totalorder %v4335_v58, 15  ;;  %vm1515_vm6 = vcmp.lt.s32.totalorder %v4335_v58, 14 }
 0x34f   : > { %v1368_v39 = vsel %vm1365_vm0, %v1358_v20, %v1360_v4  ;;  %v1354_v55 = vadd.f32 %v1350_v35, %v1329_v50  ;;  %vm1540_vm7 = vcmp.lt.s32.totalorder %v4335_v58, 13  ;;  %vm1565_vm8 = vcmp.lt.s32.totalorder %v4335_v58, 12 }
 0x350   : > { %v1374_v32 = vmul.f32 %v4904_v37, %v1368_v39  ;;  %1645 = vrot.lane.b32.xlu1 %v5140_v59, %s3330_s3  ;;  %vm1626_vm9 = vcmp.lt.s32.totalorder %v4335_v58, 121  ;;  %vm1651_vm10 = vcmp.lt.s32.totalorder %v4335_v58, 120  ;;  %vm1676_vm11 = vcmp.lt.s32.totalorder %v4335_v58, 119 }
 0x351   : > { %vm1701_vm12 = vcmp.lt.s32.totalorder %v4335_v58, 118  ;;  %vm1823_vm13 = vcmask 64512   ;;  %vm1970_vm14 = vcmask 261120  }
 0x352   : > { %v1378_v54 = vadd.f32 %v1374_v32, %v1353_v43  ;;  %v1362_v62 = vpop.permute.xlu1 %1361 }
 0x353   : > { %v1367_v22 = vsel %vm1365_vm0, %v1360_v4, %v1362_v62  ;;  %v5214_v4 = vpop.permute.xlu0 %1471 }
 0x354   : > { %v1375_v15 = vmul.f32 %v4904_v37, %v1367_v22  ;;  %1649 = vrot.lane.b32.xlu1 %v4516_v40, %s3330_s3  ;;  %s5882_s3 = sld [smem:[#allocation117_spill]] }
 0x356   : > { %v1379_v14 = vadd.f32 %v1375_v15, %v1354_v55  ;;  %v1364_v9 = vpop.permute.xlu1 %1363 }
 0x357   : > { %v1366_v27 = vsel %vm1365_vm0, %v1362_v62, %v1364_v9  ;;  %v1369_v46 = vsel %vm1365_vm0, %v1364_v9, %v1358_v20  ;;  %v1410_v13 = vpop.permute.xlu0 %1409 }
 0x358   : > { %v1376_v33 = vmul.f32 %v4904_v37, %v1366_v27  ;;  %v1377_v38 = vmul.f32 %v4904_v37, %v1369_v46  ;;  %1670 = vrot.lane.b32.xlu1 %v5140_v59, %s3331_s25 }
 0x35a   : > { %v1380_v29 = vadd.f32 %v1376_v33, %v1355_v57  ;;  %v1381_v31 = vadd.f32 %v1377_v38, %v1356_v19  ;;  %v1383_v34 = vpop.permute.xlu1 %1382  ;;  %s5511_s30 = scalar_lea.hbm %s5882_s3, %s2478_s29 }
 0x35b   : > { %v1393_v17 = vsel %vm1390_vm1, %v1383_v34, %v1385_v26  ;;  %v5235_v45 = vpop.permute.xlu0 %1496 }
 0x35c   : > { %v1399_v16 = vmul.f32 %v5010_v63, %v1393_v17  ;;  %1674 = vrot.lane.b32.xlu1 %v4516_v40, %s3331_s25  ;;  %s3139_s25 = scalar_lea.vmem %s5513_s13, 512 }
 0x35d   : > { %p3140_p4 = scmp.ne.s32.totalorder %s5513_s13, %s3139_s25 }
 0x35e   : > { %v1403_v10 = vadd.f32 %v1399_v16, %v1378_v54  ;;  %v1387_v37 = vpop.permute.xlu1 %1386 }
 0x35f   : > { %v1392_v36 = vsel %vm1390_vm1, %v1385_v26, %v1387_v37  ;;  %v1435_v60 = vpop.permute.xlu0 %1434  ;;  %p3141_p3 = pnand %p3140_p4, %p5883_p1 }
 0x360   : > { %v1400_v6 = vmul.f32 %v5010_v63, %v1392_v36  ;;  %1695 = vrot.lane.b32.xlu1 %v5140_v59, %s3332_s14 }
 0x361   : > { %p3142_p9 = pneg %p3141_p3 }
 0x362   : > { %v1404_v1 = vadd.f32 %v1400_v6, %v1379_v14  ;;  %v1389_v53 = vpop.permute.xlu1 %1388 }
 0x363   : > { %v1391_v52 = vsel %vm1390_vm1, %v1387_v37, %v1389_v53  ;;  %v1394_v2 = vsel %vm1390_vm1, %v1389_v53, %v1383_v34  ;;  %v5250_v20 = vpop.permute.xlu0 %1521 }
 0x364   : > { %v1401_v61 = vmul.f32 %v5010_v63, %v1391_v52  ;;  %v1402_v5 = vmul.f32 %v5010_v63, %v1394_v2  ;;  %1699 = vrot.lane.b32.xlu1 %v4516_v40, %s3332_s14  ;;  %s3335_s14 = smov [#allocation20]  }
 0x365   : > { %s3143_s22 = sshll.u32 %s3335_s14, 4  ;;  %s3144_s22 = int_to_ptr.vmem [resolvable:$false] %s3143_s22 }
 0x366   : > { %v1405_v59 = vadd.f32 %v1401_v61, %v1380_v29  ;;  %v1406_v18 = vadd.f32 %v1402_v5, %v1381_v31  ;;  %v1408_v28 = vpop.permute.xlu1 %1407  ;;  %s3145_s28 = scalar_lea.vmem %s3144_s22, 1024  ;;  %p3146_p13 = scmp.lt.s32.totalorder %s5513_s13, %s3144_s22 }
 0x367   : > { %v1418_v11 = vsel %vm1415_vm2, %v1408_v28, %v1410_v13  ;;  %v1460_v62 = vpop.permute.xlu0 %1459  ;;  %p3147_p0 = scmp.lt.s32.totalorder %s3145_s28, %s3139_s25 }
 0x368   : > { %v1424_v12 = vmul.f32 %v5105_v23, %v1418_v11 }
 0x369   : > { %p3148_p2 = por %p3147_p0, %p3146_p13 }
 0x36a   : > { %v1428_v42 = vadd.f32 %v1424_v12, %v1403_v10  ;;  %v1412_v0 = vpop.permute.xlu1 %1411 }
 0x36b   : > { %v1417_v63 = vsel %vm1415_vm2, %v1410_v13, %v1412_v0  ;;  %v5257_v46 = vpop.permute.xlu0 %1546  ;;  %p3149_p8 = pnand %p3148_p2, %p3142_p9 }
 0x36c   : > { %v1425_v7 = vmul.f32 %v5105_v23, %v1417_v63 }
 0x36e   : > { %v1429_v41 = vadd.f32 %v1425_v7, %v1404_v1  ;;  %v1414_v40 = vpop.permute.xlu1 %1413 }
 0x36f   : > { %v1416_v8 = vsel %vm1415_vm2, %v1412_v0, %v1414_v40  ;;  %v1419_v48 = vsel %vm1415_vm2, %v1414_v40, %v1408_v28  ;;  %v1485_v10 = vpop.permute.xlu0 %1484 }
 0x370   : > { %v1426_v57 = vmul.f32 %v5105_v23, %v1416_v8  ;;  %v1427_v19 = vmul.f32 %v5105_v23, %v1419_v48 }
 0x372   : > { %v1430_v39 = vadd.f32 %v1426_v57, %v1405_v59  ;;  %v1431_v3 = vadd.f32 %v1427_v19, %v1406_v18  ;;  %v1433_v43 = vpop.permute.xlu1 %1432 }
 0x373   : > { %v1443_v35 = vsel %vm1440_vm3, %v1433_v43, %v1435_v60  ;;  %v5264_v2 = vpop.permute.xlu0 %1571 }
 0x374   : > { %v1449_v32 = vmul.f32 %v5188_v30, %v1443_v35 }
 0x376   : > { %v1453_v50 = vadd.f32 %v1449_v32, %v1428_v42  ;;  %v1437_v54 = vpop.permute.xlu1 %1436 }
 0x377   : > { %v1442_v26 = vsel %vm1440_vm3, %v1435_v60, %v1437_v54  ;;  %v1510_v42 = vpop.permute.xlu0 %1509 }
 0x378   : > { %v1450_v22 = vmul.f32 %v5188_v30, %v1442_v26 }
 0x37a   : > { %v1454_v55 = vadd.f32 %v1450_v22, %v1429_v41  ;;  %v1439_v15 = vpop.permute.xlu1 %1438 }
 0x37b   : > { %v1441_v14 = vsel %vm1440_vm3, %v1437_v54, %v1439_v15  ;;  %v1444_v23 = vsel %vm1440_vm3, %v1439_v15, %v1433_v43  ;;  %v5270_v48 = vpop.permute.xlu0 %1583 }
 0x37c   : > { %v1451_v9 = vmul.f32 %v5188_v30, %v1441_v14  ;;  %v1452_v27 = vmul.f32 %v5188_v30, %v1444_v23 }
 0x37e   : > { %v1455_v33 = vadd.f32 %v1451_v9, %v1430_v39  ;;  %v1456_v38 = vadd.f32 %v1452_v27, %v1431_v3  ;;  %v1458_v29 = vpop.permute.xlu1 %1457 }
 0x37f   : > { %v1468_v31 = vsel %vm1465_vm4, %v1458_v29, %v1460_v62  ;;  %v1535_v43 = vpop.permute.xlu0 %1534 }
 0x380   : > { %v1474_v34 = vmul.f32 %v5214_v4, %v1468_v31 }
 0x382   : > { %v1478_v17 = vadd.f32 %v1474_v34, %v1453_v50  ;;  %v1462_v16 = vpop.permute.xlu1 %1461 }
 0x383   : > { %v1467_v37 = vsel %vm1465_vm4, %v1460_v62, %v1462_v16  ;;  %v5272_v32 = vpop.permute.xlu0 %1595 }
 0x384   : > { %v1475_v13 = vmul.f32 %v5214_v4, %v1467_v37 }
 0x386   : > { %v1479_v36 = vadd.f32 %v1475_v13, %v1454_v55  ;;  %v1464_v6 = vpop.permute.xlu1 %1463 }
 0x387   : > { %v1466_v1 = vsel %vm1465_vm4, %v1462_v16, %v1464_v6  ;;  %v1469_v30 = vsel %vm1465_vm4, %v1464_v6, %v1458_v29  ;;  %v1560_v62 = vpop.permute.xlu0 %1559 }
 0x388   : > { %v1476_v53 = vmul.f32 %v5214_v4, %v1466_v1  ;;  %v1477_v52 = vmul.f32 %v5214_v4, %v1469_v30 }
 0x38a   : > { %v1480_v61 = vadd.f32 %v1476_v53, %v1455_v33  ;;  %v1481_v5 = vadd.f32 %v1477_v52, %v1456_v38  ;;  %v1483_v59 = vpop.permute.xlu1 %1482 }
 0x38b   : > { %v1493_v18 = vsel %vm1490_vm5, %v1483_v59, %v1485_v10  ;;  %v5274_v22 = vpop.permute.xlu0 %1607 }
 0x38c   : > { %v1499_v28 = vmul.f32 %v5235_v45, %v1493_v18 }
 0x38e   : > { %v1503_v11 = vadd.f32 %v1499_v28, %v1478_v17  ;;  %v1487_v12 = vpop.permute.xlu1 %1486 }
 0x38f   : > { %v1492_v0 = vsel %vm1490_vm5, %v1485_v10, %v1487_v12  ;;  %v5276_v15 = vpop.permute.xlu0 %1657 }
 0x390   : > { %v1500_v60 = vmul.f32 %v5235_v45, %v1492_v0 }
 0x392   : > { %v1504_v63 = vadd.f32 %v1500_v60, %v1479_v36  ;;  %v1489_v7 = vpop.permute.xlu1 %1488 }
 0x393   : > { %v1491_v41 = vsel %vm1490_vm5, %v1487_v12, %v1489_v7  ;;  %v1494_v4 = vsel %vm1490_vm5, %v1489_v7, %v1483_v59  ;;  %v5278_v23 = vpop.permute.xlu0 %1622 }
 0x394   : > { %v1501_v40 = vmul.f32 %v5235_v45, %v1491_v41  ;;  %v1502_v8 = vmul.f32 %v5235_v45, %v1494_v4 }
 0x396   : > { %v1505_v57 = vadd.f32 %v1501_v40, %v1480_v61  ;;  %v1506_v19 = vadd.f32 %v1502_v8, %v1481_v5  ;;  %v1508_v39 = vpop.permute.xlu1 %1507 }
 0x397   : > { %v5282_v27 = vpop.permute.xlu0 %1707  ;;  %v1518_v38 = vsel %vm1515_vm6, %v1508_v39, %v1510_v42 }
 0x398   : > { %v1524_v17 = vmul.f32 %v5250_v20, %v1518_v38  ;;  %v1588_v38 = vmul.f32 %v5270_v48, %v4455_v47  ;;  %v5875_v47 = vld [vmem:[#allocation106_spill] sm:$0xff] }
 0x39a   : > { %v1512_v3 = vpop.permute.xlu1 %1511  ;;  %v1528_v61 = vadd.f32 %v1524_v17, %v1503_v11  ;;  %v5872_v17 = vld [vmem:[#allocation107_spill] sm:$0xff] }
 0x39b   : > { %v5288_v29 = vpop.permute.xlu0 %1647  ;;  %v1517_v31 = vsel %vm1515_vm6, %v1510_v42, %v1512_v3 }
 0x39c   : > { %v1525_v37 = vmul.f32 %v5250_v20, %v1517_v31 }
 0x39e   : > { %v1514_v35 = vpop.permute.xlu1 %1513  ;;  %v1529_v11 = vadd.f32 %v1525_v37, %v1504_v63  ;;  %v1586_v63 = vmul.f32 %v5270_v48, %v4440_v44 }
 0x39f   : > { %v1516_v10 = vsel %vm1515_vm6, %v1512_v3, %v1514_v35  ;;  %v1519_v36 = vsel %vm1515_vm6, %v1514_v35, %v1508_v39  ;;  %v5304_v52 = vpop.permute.xlu0 %1643 }
 0x3a0   : > { %v1526_v5 = vmul.f32 %v5250_v20, %v1516_v10  ;;  %v1527_v42 = vmul.f32 %v5250_v20, %v1519_v36 }
 0x3a2   : > { %v1533_v50 = vpop.permute.xlu1 %1532  ;;  %v1530_v40 = vadd.f32 %v1526_v5, %v1505_v57  ;;  %v1531_v20 = vadd.f32 %v1527_v42, %v1506_v19  ;;  %v1589_v19 = vmul.f32 %v5270_v48, %v4434_v24  ;;  %v5880_v42 = vld [vmem:[#allocation110_spill] sm:$0xff] }
 0x3a3   : > { %v1543_v16 = vsel %vm1540_vm7, %v1533_v50, %v1535_v43  ;;  %v1673_v35 = vpop.permute.xlu0 %1672 }
 0x3a4   : > { %v1549_v6 = vmul.f32 %v5257_v46, %v1543_v16  ;;  %v5873_v16 = vld [vmem:[#allocation108_spill] sm:$0xff] }
 0x3a5   : > { %v1599_v44 = vmul.f32 %v5272_v32, %v5873_v16 }
 0x3a6   : > { %v1537_v54 = vpop.permute.xlu1 %1536  ;;  %v1553_v7 = vadd.f32 %v1549_v6, %v1528_v61  ;;  %v5877_v61 = vlaneseq }
 0x3a7   : > { %v1542_v1 = vsel %vm1540_vm7, %v1535_v43, %v1537_v54  ;;  %v1669_v37 = vpop.permute.xlu0 %1668 }
 0x3a8   : > { %v1550_v0 = vmul.f32 %v5257_v46, %v1542_v1  ;;  %v1601_v1 = vmul.f32 %v5272_v32, %v5875_v47  ;;  %v5343_v5 = vshrl.u32 %v5877_v61, 7 }
 0x3aa   : > { %v1539_v26 = vpop.permute.xlu1 %1538 }
 0x3ab   : > { %v1541_v30 = vsel %vm1540_vm7, %v1537_v54, %v1539_v26  ;;  %v1544_v59 = vsel %vm1540_vm7, %v1539_v26, %v1533_v50  ;;  %v1554_v50 = vadd.f32 %v1550_v0, %v1529_v11  ;;  %v1613_v0 = vmul.f32 %v5274_v22, %v5880_v42 }
 0x3ac   : > { %v1551_v60 = vmul.f32 %v5257_v46, %v1541_v30  ;;  %v1552_v8 = vmul.f32 %v5257_v46, %v1544_v59  ;;  %v1587_v46 = vmul.f32 %v5270_v48, %v4449_v25  ;;  %v5876_v30 = vld [vmem:[#allocation111_spill] sm:$0xff]  ;;  %v5878_v59 = vld [vmem:[#allocation112_spill] sm:$0xff] }
 0x3ad   : > { %v1610_v24 = vmul.f32 %v5274_v22, %v5876_v30 }
 0x3ae   : > { %v1558_v55 = vpop.permute.xlu1 %1557  ;;  %v1555_v54 = vadd.f32 %v1551_v60, %v1530_v40 }
 0x3af   : > { %v1568_v13 = vsel %vm1565_vm8, %v1558_v55, %v1560_v62 }
 0x3b0   : > { %v1574_v18 = vmul.f32 %v5264_v2, %v1568_v13  ;;  %v5874_v13 = vld [vmem:[#allocation109_spill] sm:$0xff] }
 0x3b1   : > { %v1600_v36 = vmul.f32 %v5272_v32, %v5874_v13 }
 0x3b2   : > { %v1562_v45 = vpop.permute.xlu1 %1561  ;;  %v1578_v43 = vadd.f32 %v1574_v18, %v1553_v7  ;;  %v1611_v18 = vmul.f32 %v5274_v22, %v5878_v59 }
 0x3b3   : > { %v1567_v28 = vsel %vm1565_vm8, %v1560_v62, %v1562_v45 }
 0x3b4   : > { %v1575_v39 = vmul.f32 %v5264_v2, %v1567_v28  ;;  %v5879_v28 = vld [vmem:[#allocation113_spill] sm:$0xff] }
 0x3b6   : > { %v1564_v14 = vpop.permute.xlu1 %1563 }
 0x3b7   : > { %v1566_v12 = vsel %vm1565_vm8, %v1562_v45, %v1564_v14  ;;  %v1569_v41 = vsel %vm1565_vm8, %v1564_v14, %v1558_v55  ;;  %v1556_v55 = vadd.f32 %v1552_v8, %v1531_v20  ;;  %v1579_v45 = vadd.f32 %v1575_v39, %v1554_v50  ;;  %v1698_v39 = vpop.permute.xlu0 %1697 }
 0x3b8   : > { %v1576_v3 = vmul.f32 %v5264_v2, %v1566_v12  ;;  %v1577_v62 = vmul.f32 %v5264_v2, %v1569_v41  ;;  %v1590_v14 = vadd.f32 %v1586_v63, %v1578_v43  ;;  %v1598_v2 = vmul.f32 %v5272_v32, %v5872_v17 }
 0x3b9   : > { %v1591_v6 = vadd.f32 %v1587_v46, %v1579_v45  ;;  %v1612_v12 = vmul.f32 %v5274_v22, %v5879_v28  ;;  %v1725_v43 = vsub.s32 1, %v5343_v5  ;;  %v1733_v20 = vsub.s32 3, %v5343_v5 }
 0x3ba   : > { %v5280_v9 = vpop.permute.xlu1 %1632  ;;  %v1580_v57 = vadd.f32 %v1576_v3, %v1555_v54  ;;  %v1581_v31 = vadd.f32 %v1577_v62, %v1556_v55  ;;  %v1602_v48 = vadd.f32 %v1598_v2, %v1590_v14  ;;  %v1721_v3 = vsub.s32 0, %v5343_v5 }
 0x3bb   : > { %v1603_v7 = vadd.f32 %v1599_v44, %v1591_v6  ;;  %v1729_v28 = vsub.s32 2, %v5343_v5 }
 0x3bc   : > { %v1592_v25 = vadd.f32 %v1588_v38, %v1580_v57  ;;  %v1593_v60 = vadd.f32 %v1589_v19, %v1581_v31  ;;  %v1614_v8 = vadd.f32 %v1610_v24, %v1602_v48 }
 0x3bd   : > { %v1615_v14 = vadd.f32 %v1611_v18, %v1603_v7 }
 0x3be   : > { %v1604_v40 = vadd.f32 %v1600_v36, %v1592_v25  ;;  %v1605_v54 = vadd.f32 %v1601_v1, %v1593_v60  ;;  %v1694_v36 = vpop.permute.xlu0 %1693 }
 0x3bf   : > { %v5285_v33 = vpop.permute.xlu1 %1682 }
 0x3c0   : > { %v1616_v46 = vadd.f32 %v1612_v12, %v1604_v40  ;;  %v1617_v2 = vadd.f32 %v1613_v0, %v1605_v54 }
 0x3c3   : > { %v5291_v34 = vpop.permute.xlu1 %1620 }
 0x3c4   : > { %v1628_v32 = vsel %vm1626_vm9, %v5291_v34, %v5278_v23 }
 0x3c5   : > { %v1635_v50 = vmul.f32 %v5280_v9, %v1628_v32 }
 0x3c7   : > { %v1625_v53 = vpop.permute.xlu1 %1624  ;;  %v1639_v17 = vadd.f32 %v1635_v50, %v1614_v8 }
 0x3c8   : > { %v1627_v41 = vsel %vm1626_vm9, %v5278_v23, %v1625_v53 }
 0x3cb   : > { %v1619_v4 = vpop.permute.xlu1 %1618 }
 0x3cc   : > { %v1630_v22 = vsel %vm1626_vm9, %v1625_v53, %v1619_v4  ;;  %v1629_v62 = vsel %vm1626_vm9, %v1619_v4, %v5291_v34  ;;  %v1636_v53 = vmul.f32 %v5280_v9, %v1627_v41 }
 0x3cd   : > { %v1637_v63 = vmul.f32 %v5280_v9, %v1630_v22  ;;  %v1638_v38 = vmul.f32 %v5280_v9, %v1629_v62 }
 0x3cf   : > { %v1646_v26 = vpop.permute.xlu1 %1645  ;;  %v1642_v30 = vadd.f32 %v1638_v38, %v1617_v2 }
 0x3d0   : > { %v1653_v23 = vsel %vm1651_vm10, %v1646_v26, %v5288_v29  ;;  %v1654_v34 = vsel %vm1651_vm10, %v5304_v52, %v1646_v26  ;;  %v1640_v26 = vadd.f32 %v1636_v53, %v1615_v14  ;;  %v1797_v14 = vld [vmem:[#allocation13] sm:$0xff] }
 0x3d1   : > { %v1660_v31 = vmul.f32 %v5276_v15, %v1653_v23  ;;  %v1663_v13 = vmul.f32 %v5276_v15, %v1654_v34  ;;  %v1800_v34 = vld [vmem:[#allocation13 + $0x18] sm:$0xff] }
 0x3d3   : > { %v1650_v10 = vpop.permute.xlu1 %1649  ;;  %v1664_v24 = vadd.f32 %v1660_v31, %v1639_v17 }
 0x3d4   : > { %v1652_v55 = vsel %vm1651_vm10, %v5288_v29, %v1650_v10  ;;  %v1655_v45 = vsel %vm1651_vm10, %v1650_v10, %v5304_v52  ;;  %v540_v52 = vld [vmem:[#allocation5] sm:$0xf]  ;;  %v1641_v10 = vadd.f32 %v1637_v63, %v1616_v46  ;;  %v1798_v46 = vld [vmem:[#allocation13 + $0x8] sm:$0xff] }
 0x3d5   : > { %v1661_v16 = vmul.f32 %v5276_v15, %v1652_v55  ;;  %v1662_v44 = vmul.f32 %v5276_v15, %v1655_v45  ;;  %v1722_v48 = vrot.slane %v540_v52, %v1721_v3  ;;  %v1726_v0 = vrot.slane %v540_v52, %v1725_v43 }
 0x3d6   : > { %v1734_v53 = vrot.slane %v540_v52, %v1733_v20 }
 0x3d7   : > { %v1671_v11 = vpop.permute.xlu1 %1670  ;;  %v1665_v15 = vadd.f32 %v1661_v16, %v1640_v26  ;;  %v1666_v59 = vadd.f32 %v1662_v44, %v1641_v10 }
 0x3d8   : > { %v1678_v4 = vsel %vm1676_vm11, %v1671_v11, %v1673_v35 }
 0x3d9   : > { %v1685_v9 = vmul.f32 %v5285_v33, %v1678_v4  ;;  %v1802_v4 = vld [vmem:[#allocation16] sm:$0xff] }
 0x3db   : > { %v1675_v57 = vpop.permute.xlu1 %1674  ;;  %v1689_v42 = vadd.f32 %v1685_v9, %v1664_v24 }
 0x3dc   : > { %v1677_v29 = vsel %vm1676_vm11, %v1673_v35, %v1675_v57  ;;  %v1680_v19 = vsel %vm1676_vm11, %v1675_v57, %v1669_v37  ;;  %v1679_v35 = vsel %vm1676_vm11, %v1669_v37, %v1671_v11  ;;  %v1667_v37 = vadd.f32 %v1663_v13, %v1642_v30  ;;  %v1783_v57 = vld [vmem:[#allocation10] sm:$0xff] }
 0x3dd   : > { %v1686_v25 = vmul.f32 %v5285_v33, %v1677_v29  ;;  %v1687_v47 = vmul.f32 %v5285_v33, %v1680_v19  ;;  %v1688_v12 = vmul.f32 %v5285_v33, %v1679_v35  ;;  %v1730_v33 = vrot.slane %v540_v52, %v1729_v28 }
 0x3df   : > { %v1696_v6 = vpop.permute.xlu1 %1695  ;;  %v1690_v32 = vadd.f32 %v1686_v25, %v1665_v15  ;;  %v1691_v11 = vadd.f32 %v1687_v47, %v1666_v59  ;;  %v1692_v3 = vadd.f32 %v1688_v12, %v1667_v37  ;;  %v1773_v25 = vld [vmem:[#allocation8] sm:$0xff]  ;;  %v3334_v47 = vmov 0.0  }
 0x3e0   : > { %v1703_v1 = vsel %vm1701_vm12, %v1696_v6, %v1698_v39  ;;  %v1704_v18 = vsel %vm1701_vm12, %v1694_v36, %v1696_v6  ;;  %1900 = vmatprep.mubr.f32.mxu0 %v3334_v47  ;;  %2038 = vmatprep.mubr.f32.mxu1 %v3334_v47 }
 0x3e1   : > { %v1710_v61 = vmul.f32 %v5282_v27, %v1703_v1  ;;  %v1713_v40 = vmul.f32 %v5282_v27, %v1704_v18 }
 0x3e3   : > { %v1700_v60 = vpop.permute.xlu1 %1699  ;;  %v1714_v22 = vadd.f32 %v1710_v61, %v1689_v42  ;;  %v1717_v54 = vadd.f32 %v1713_v40, %v1692_v3  ;;  %v5434_v40 = vld [vmem:[#allocation11 + $0x10] sm:$0xff] }
 0x3e4   : > { %v1702_v7 = vsel %vm1701_vm12, %v1698_v39, %v1700_v60  ;;  %v1705_v41 = vsel %vm1701_vm12, %v1700_v60, %v1694_v36 }
 0x3e5   : > { %v1711_v8 = vmul.f32 %v5282_v27, %v1702_v7  ;;  %v1712_v5 = vmul.f32 %v5282_v27, %v1705_v41  ;;  %v1739_v62 = vmul.f32 %v1722_v48, %v1714_v22  ;;  %v1742_v55 = vmul.f32 %v1734_v53, %v1717_v54  ;;  %v1799_v27 = vld [vmem:[#allocation13 + $0x10] sm:$0xff]  ;;  %v5424_v7 = vld [vmem:[#allocation11] sm:$0xff]  ;;  %v5429_v41 = vld [vmem:[#allocation11 + $0x8] sm:$0xff] }
 0x3e6   : > { %v5439_v22 = vld [vmem:[#allocation11 + $0x18] sm:$0xff] }
 0x3e7   : > { %v1715_v50 = vadd.f32 %v1711_v8, %v1690_v32  ;;  %v1716_v43 = vadd.f32 %v1712_v5, %v1691_v11 }
 0x3e9   : > { %v1740_v23 = vmul.f32 %v1726_v0, %v1715_v50  ;;  %v1741_v63 = vmul.f32 %v1730_v33, %v1716_v43 }
 0x3eb   : > { %v1743_v39 = vadd.f32 %v1740_v23, %v1739_v62 }
 0x3ed   : > { %v1744_v58 = vadd.f32 %v1743_v39, %v1741_v63 }
 0x3ef   : > { %v1745_v45 = vadd.f32 %v1744_v58, %v1742_v55 }
 0x3f1   : > { %1746 = vadd.xlane.f32.xlu1 %v1745_v45 }
 0x402   : > { %1786 = vperm.xlu1 %2789, %v1783_v57  }
 0x406   : > { %1805 = vperm.xlu1 %2789, %v1797_v14  }
 0x40a   : > { %1810 = vperm.xlu1 %2789, %v1798_v46  }
 0x40e   : > { %1815 = vperm.xlu1 %2789, %v1799_v27  }
 0x412   : > { %1820 = vperm.xlu1 %2789, %v1800_v34  }
 0x416   : > { %1967 = vperm.xlu1 %2789, %v1802_v4  }
 0x47e   : > { %v1747_v38 = vpop.xlane.xlu1 %1746 }
 0x47f   : > { %v1748_v20 = vmul.f32 0.00390625, %v1747_v38 }
 0x481   : > { %v1749_v31 = vsub.f32 %v1739_v62, %v1748_v20  ;;  %v1750_v29 = vsub.f32 %v1740_v23, %v1748_v20  ;;  %v1751_v19 = vsub.f32 %v1741_v63, %v1748_v20  ;;  %v1752_v17 = vsub.f32 %v1742_v55, %v1748_v20 }
 0x482   : > { %v5420_v60 = vpop.permute.xlu1 %1786 }
 0x483   : > { %v1753_v2 = vmul.f32 %v1749_v31, %v1722_v48  ;;  %v1754_v16 = vmul.f32 %v1750_v29, %v1726_v0  ;;  %v1755_v44 = vmul.f32 %v1751_v19, %v1730_v33  ;;  %v1756_v52 = vmul.f32 %v1752_v17, %v1734_v53 }
 0x485   : > { %v1757_v26 = vmul.f32 %v1753_v2, %v1753_v2  ;;  %v1758_v10 = vmul.f32 %v1754_v16, %v1754_v16  ;;  %v1759_v13 = vmul.f32 %v1755_v44, %v1755_v44  ;;  %v1760_v36 = vmul.f32 %v1756_v52, %v1756_v52 }
 0x486   : > { %v5444_v8 = vpop.permute.xlu1 %1805 }
 0x487   : > { %v1761_v9 = vadd.f32 %v1758_v10, %v1757_v26 }
 0x489   : > { %v1762_v6 = vadd.f32 %v1761_v9, %v1759_v13 }
 0x48a   : > { %v5446_v5 = vpop.permute.xlu1 %1810 }
 0x48b   : > { %v1763_v35 = vadd.f32 %v1762_v6, %v1760_v36 }
 0x48d   : > { %1764 = vadd.xlane.f32.xlu0 %v1763_v35 }
 0x48e   : > { %v5451_v39 = vpop.permute.xlu1 %1815 }
 0x492   : > { %v5456_v4 = vpop.permute.xlu1 %1820 }
 0x4a3   : > { %1776 = vperm.xlu0 %2788, %v1773_v25  }
 0x51a   : > { %v1765_v1 = vpop.xlane.xlu0 %1764 }
 0x51b   : > { %v1766_v30 = vmul.f32 0.00390625, %v1765_v1 }
 0x51d   : > { %v1767_v24 = vadd.f32 1e-05, %v1766_v30 }
 0x51f   : > { %2790 = vrsqrt.f32 %v1767_v24 }
 0x522   : > { %v1777_v61 = vpop.permute.xlu0 %1776 }
 0x529   : > { %v2791_v48 = vpop.eup %2790 }
 0x52a   : > { %v1771_v15 = vmul.f32 %v2791_v48, %v1751_v19  ;;  %v1772_v59 = vmul.f32 %v2791_v48, %v1752_v17  ;;  %v1770_v18 = vmul.f32 %v2791_v48, %v1750_v29  ;;  %v1769_v28 = vmul.f32 %v2791_v48, %v1749_v31 }
 0x52c   : > { %v5416_v37 = vmul.f32 %v1777_v61, %v1771_v15  ;;  %v5418_v12 = vmul.f32 %v1777_v61, %v1772_v59  ;;  %v1780_v42 = vmul.f32 %v1777_v61, %v1770_v18  ;;  %v1779_v0 = vmul.f32 %v1777_v61, %v1769_v28 }
 0x52e   : > { %v1790_v32 = vadd.f32 %v5420_v60, %v1780_v42  ;;  %v1789_v11 = vadd.f32 %v5420_v60, %v1779_v0 }
 0x530   : > { %1836 = vmatprep.subr.mxu0 %v1790_v32 }
 0x531   : > { %1837 = vmatpush1.msra.mxu0 %v1789_v11 }
 0x532   : > { %2462 = vmatmul.mubr.msk.f32.vlgmr.msra.gmra.mrb[0].mxu0 %vm1823_vm13, %v5424_v7 }
 0x533   : > { %1906 = vmatprep.mubr.f32.mxu0 %v3334_v47 }
 0x536   : > { %2463 = vmatmul.mubr.msk.f32.gmra.mrb[2].mxu0 %vm1823_vm13, %v5429_v41 }
 0x537   : > { %1912 = vmatprep.mubr.f32.mxu0 %v3334_v47 }
 0x53a   : > { %2464 = vmatmul.mubr.msk.f32.gmra.mrb[4].mxu0 %vm1823_vm13, %v5434_v40 }
 0x53b   : > { %1918 = vmatprep.mubr.f32.mxu0 %v3334_v47 }
 0x53e   : > { %2465 = vmatmul.mubr.msk.f32.gmra.mrb[6].mxu0 %vm1823_vm13, %v5439_v22 }
 0x53f   : > { %2242 = vmatprep.mubr.f32.mxu0 %v3334_v47 }
 0x605   : > { %v1902_v3 = vpop.f32.mrb[0].mxu0 }
 0x606   : > { %v1903_v33 = vadd.f32 %v1902_v3, %v5444_v8  ;;  %v1904_v50 = vpop.f32.mrb[1].mxu0 }
 0x607   : > { %v1905_v43 = vadd.f32 %v1904_v50, %v5444_v8 }
 0x608   : > { %v1933_v54 = vmul.f32 0.70710677, %v1903_v33  ;;  %v1925_v9 = vmul.f32 0.5, %v1903_v33 }
 0x609   : > { %v1934_v62 = vmul.f32 0.70710677, %v1905_v43  ;;  %v1908_v23 = vpop.f32.mrb[2].mxu0  ;;  %v1926_v35 = vmul.f32 0.5, %v1905_v43 }
 0x60a   : > { %2792 = verf.f32 %v1933_v54  ;;  %v1909_v53 = vadd.f32 %v1908_v23, %v5446_v5  ;;  %v1910_v63 = vpop.f32.mrb[3].mxu0 }
 0x60b   : > { %2794 = verf.f32 %v1934_v62  ;;  %v1911_v55 = vadd.f32 %v1910_v63, %v5446_v5 }
 0x60c   : > { %v1935_v58 = vmul.f32 0.70710677, %v1909_v53  ;;  %v1927_v36 = vmul.f32 0.5, %v1909_v53 }
 0x60d   : > { %v1936_v45 = vmul.f32 0.70710677, %v1911_v55  ;;  %v1914_v57 = vpop.f32.mrb[4].mxu0  ;;  %v1928_v25 = vmul.f32 0.5, %v1911_v55 }
 0x60e   : > { %2796 = verf.f32 %v1935_v58  ;;  %v1915_v14 = vadd.f32 %v1914_v57, %v5451_v39  ;;  %v1916_v46 = vpop.f32.mrb[5].mxu0  ;;  %v1792_v57 = vadd.f32 %v5420_v60, %v5418_v12 }
 0x60f   : > { %2798 = verf.f32 %v1936_v45  ;;  %v1917_v27 = vadd.f32 %v1916_v46, %v5451_v39  ;;  %v5462_v46 = vld [vmem:[#allocation14] sm:$0xff] }
 0x610   : > { %v1937_v34 = vmul.f32 0.70710677, %v1915_v14  ;;  %v1929_v3 = vmul.f32 0.5, %v1915_v14  ;;  %v1791_v14 = vadd.f32 %v5420_v60, %v5416_v37  ;;  %v5480_v37 = vpop.permute.xlu1 %1967 }
 0x611   : > { %v1938_v38 = vmul.f32 0.70710677, %v1917_v27  ;;  %v1920_v20 = vpop.f32.mrb[6].mxu0  ;;  %v1930_v43 = vmul.f32 0.5, %v1917_v27 }
 0x612   : > { %2800 = verf.f32 %v1937_v34  ;;  %v1921_v31 = vadd.f32 %v1920_v20, %v5456_v4  ;;  %v1922_v29 = vpop.f32.mrb[7].mxu0 }
 0x613   : > { %2802 = verf.f32 %v1938_v38  ;;  %v1923_v19 = vadd.f32 %v1922_v29, %v5456_v4 }
 0x614   : > { %v2793_v17 = vpop.eup %2792  ;;  %v1939_v2 = vmul.f32 0.70710677, %v1921_v31  ;;  %v1931_v33 = vmul.f32 0.5, %v1921_v31 }
 0x615   : > { %v2795_v16 = vpop.eup %2794  ;;  %v1940_v44 = vmul.f32 0.70710677, %v1923_v19  ;;  %v1949_v52 = vadd.f32 1.0, %v2793_v17  ;;  %v1932_v54 = vmul.f32 0.5, %v1923_v19 }
 0x616   : > { %2804 = verf.f32 %v1939_v2  ;;  %v1950_v10 = vadd.f32 1.0, %v2795_v16 }
 0x617   : > { %2806 = verf.f32 %v1940_v44  ;;  %v1957_v30 = vmul.f32 %v1949_v52, %v1925_v9 }
 0x618   : > { %v2797_v26 = vpop.eup %2796  ;;  %v1958_v61 = vmul.f32 %v1950_v10, %v1926_v35 }
 0x619   : > { %v2799_v13 = vpop.eup %2798  ;;  %v1951_v6 = vadd.f32 1.0, %v2797_v26 }
 0x61a   : > { %v1952_v1 = vadd.f32 1.0, %v2799_v13 }
 0x61b   : > { %v1959_v24 = vmul.f32 %v1951_v6, %v1927_v36 }
 0x61c   : > { %v2801_v48 = vpop.eup %2800  ;;  %v1960_v15 = vmul.f32 %v1952_v1, %v1928_v25 }
 0x61d   : > { %v2803_v59 = vpop.eup %2802  ;;  %v2481_v18 = vpack.c.bf16 %v1959_v24, %v1957_v30  ;;  %v1953_v42 = vadd.f32 1.0, %v2801_v48 }
 0x61e   : > { %v2479_v28 = vpack.c.bf16 %v1960_v15, %v1958_v61  ;;  %v1954_v32 = vadd.f32 1.0, %v2803_v59 }
 0x61f   : > { %v1961_v23 = vmul.f32 %v1953_v42, %v1929_v3 }
 0x620   : > { %v2805_v0 = vpop.eup %2804  ;;  %2480 = vmatprep.subr.bf16.mxu1 %v2479_v28  ;;  %v1962_v63 = vmul.f32 %v1954_v32, %v1930_v43 }
 0x621   : > { %v2807_v11 = vpop.eup %2806  ;;  %v1955_v50 = vadd.f32 1.0, %v2805_v0  ;;  %2482 = vmatpush1.bf16.msra.mxu1 %v2481_v18 }
 0x622   : > { %v1956_v62 = vadd.f32 1.0, %v2807_v11 }
 0x623   : > { %v1963_v53 = vmul.f32 %v1955_v50, %v1931_v33 }
 0x624   : > { %v1964_v55 = vmul.f32 %v1956_v62, %v1932_v54 }
 0x625   : > { %v2485_v58 = vpack.c.bf16 %v1963_v53, %v1961_v23 }
 0x626   : > { %v2483_v45 = vpack.c.bf16 %v1964_v55, %v1962_v63 }
 0x628   : > { %2484 = vmatprep.subr.bf16.mxu1 %v2483_v45 }
 0x629   : > { %2486 = vmatpush1.bf16.msra.mxu1 %v2485_v58 }
 0x62a   : > { %2049 = vmatprep.subr.mxu1 %v1792_v57 }
 0x62c   : > { %2466 = vmatmul.mubr.msk.f32.vlgmr.msra.gmra.mrb[0].mxu1 %vm1970_vm14, %v5462_v46 }
 0x62d   : > { %2050 = vmatpush1.msra.mxu1 %v1791_v14  ;;  %2113 = vmatprep.mubr.f32.mxu1 %v3334_v47 }
 0x630   : > { %2467 = vmatmul.mubr.msk.f32.vlgmr.msra.gmra.mrb[2].mxu1 %vm1823_vm13, %v5424_v7 }
 0x631   : > { %2119 = vmatprep.mubr.f32.mxu1 %v3334_v47 }
 0x634   : > { %2468 = vmatmul.mubr.msk.f32.gmra.mrb[4].mxu1 %vm1823_vm13, %v5429_v41 }
 0x635   : > { %2125 = vmatprep.mubr.f32.mxu1 %v3334_v47 }
 0x638   : > { %2469 = vmatmul.mubr.msk.f32.gmra.mrb[6].mxu1 %vm1823_vm13, %v5434_v40 }
 0x639   : > { %2131 = vmatprep.mubr.f32.mxu1 %v3334_v47 }
 0x63c   : > { %2470 = vmatmul.mubr.msk.f32.gmra.mrb[8].mxu1 %vm1823_vm13, %v5439_v22 }
 0x6ff   : > { %v2040_v12 = vpop.f32.mrb[0].mxu1 }
 0x700   : > { %v2041_v60 = vadd.f32 %v2040_v12, %v5480_v37  ;;  %v2042_v7 = vpop.f32.mrb[1].mxu1 }
 0x701   : > { %v2043_v27 = vadd.f32 %v2042_v7, %v5480_v37 }
 0x702   : > { %v2045_v41 = vadd.f32 %v2041_v60, %v4977_v56 }
 0x703   : > { %v2046_v34 = vadd.f32 %v2043_v27, %v4986_v49  ;;  %v2115_v38 = vpop.f32.mrb[2].mxu1 }
 0x704   : > { %2047 = vst [vmem:[%s5488_s15] sm:$0xff] %v2045_v41  ;;  %v2116_v47 = vadd.f32 %v2115_v38, %v5444_v8  ;;  %v2117_v40 = vpop.f32.mrb[3].mxu1 }
 0x705   : > { %2048 = vst [vmem:[%s5488_s15 + $0x8] sm:$0xff] %v2046_v34  ;;  %v2118_v22 = vadd.f32 %v2117_v40, %v5444_v8 }
 0x706   : > { %v2146_v20 = vmul.f32 0.70710677, %v2116_v47  ;;  %v2138_v61 = vmul.f32 0.5, %v2116_v47 }
 0x707   : > { %v2147_v31 = vmul.f32 0.70710677, %v2118_v22  ;;  %v2121_v29 = vpop.f32.mrb[4].mxu1  ;;  %v2139_v18 = vmul.f32 0.5, %v2118_v22 }
 0x708   : > { %2808 = verf.f32 %v2146_v20  ;;  %v2122_v56 = vadd.f32 %v2121_v29, %v5446_v5  ;;  %v2123_v49 = vpop.f32.mrb[5].mxu1 }
 0x709   : > { %2810 = verf.f32 %v2147_v31  ;;  %v2124_v19 = vadd.f32 %v2123_v49, %v5446_v5 }
 0x70a   : > { %v2148_v17 = vmul.f32 0.70710677, %v2122_v56  ;;  %v2140_v15 = vmul.f32 0.5, %v2122_v56 }
 0x70b   : > { %v2149_v2 = vmul.f32 0.70710677, %v2124_v19  ;;  %v2127_v16 = vpop.f32.mrb[6].mxu1  ;;  %v2141_v28 = vmul.f32 0.5, %v2124_v19 }
 0x70c   : > { %2812 = verf.f32 %v2148_v17  ;;  %v2128_v44 = vadd.f32 %v2127_v16, %v5451_v39  ;;  %v2129_v52 = vpop.f32.mrb[7].mxu1 }
 0x70d   : > { %2814 = verf.f32 %v2149_v2  ;;  %v2130_v8 = vadd.f32 %v2129_v52, %v5451_v39 }
 0x70e   : > { %v2150_v26 = vmul.f32 0.70710677, %v2128_v44  ;;  %v2142_v63 = vmul.f32 0.5, %v2128_v44 }
 0x70f   : > { %v2151_v10 = vmul.f32 0.70710677, %v2130_v8  ;;  %v2133_v13 = vpop.f32.mrb[8].mxu1  ;;  %v2143_v45 = vmul.f32 0.5, %v2130_v8 }
 0x710   : > { %2816 = verf.f32 %v2150_v26  ;;  %v2134_v9 = vadd.f32 %v2133_v13, %v5456_v4  ;;  %v2135_v36 = vpop.f32.mrb[9].mxu1 }
 0x711   : > { %2818 = verf.f32 %v2151_v10  ;;  %v2136_v5 = vadd.f32 %v2135_v36, %v5456_v4 }
 0x712   : > { %v2809_v6 = vpop.eup %2808  ;;  %v2152_v35 = vmul.f32 0.70710677, %v2134_v9  ;;  %v2144_v55 = vmul.f32 0.5, %v2134_v9 }
 0x713   : > { %v2811_v25 = vpop.eup %2810  ;;  %v2153_v1 = vmul.f32 0.70710677, %v2136_v5  ;;  %v2162_v30 = vadd.f32 1.0, %v2809_v6  ;;  %v2145_v57 = vmul.f32 0.5, %v2136_v5 }
 0x714   : > { %2820 = verf.f32 %v2152_v35  ;;  %v2163_v48 = vadd.f32 1.0, %v2811_v25 }
 0x715   : > { %2822 = verf.f32 %v2153_v1  ;;  %v2170_v0 = vmul.f32 %v2162_v30, %v2138_v61 }
 0x716   : > { %v2813_v24 = vpop.eup %2812  ;;  %v2171_v4 = vmul.f32 %v2163_v48, %v2139_v18 }
 0x717   : > { %v2815_v39 = vpop.eup %2814  ;;  %v2164_v59 = vadd.f32 1.0, %v2813_v24 }
 0x718   : > { %v2165_v42 = vadd.f32 1.0, %v2815_v39 }
 0x719   : > { %v2172_v32 = vmul.f32 %v2164_v59, %v2140_v15 }
 0x71a   : > { %v2817_v11 = vpop.eup %2816  ;;  %v2173_v3 = vmul.f32 %v2165_v42, %v2141_v28 }
 0x71b   : > { %v2819_v33 = vpop.eup %2818  ;;  %v2489_v50 = vpack.c.bf16 %v2172_v32, %v2170_v0  ;;  %v2166_v54 = vadd.f32 1.0, %v2817_v11 }
 0x71c   : > { %v2487_v43 = vpack.c.bf16 %v2173_v3, %v2171_v4  ;;  %v2167_v23 = vadd.f32 1.0, %v2819_v33 }
 0x71d   : > { %v2174_v12 = vmul.f32 %v2166_v54, %v2142_v63 }
 0x71e   : > { %v2821_v62 = vpop.eup %2820  ;;  %2488 = vmatprep.subr.bf16.mxu0 %v2487_v43  ;;  %v2175_v7 = vmul.f32 %v2167_v23, %v2143_v45 }
 0x71f   : > { %v2823_v53 = vpop.eup %2822  ;;  %v2168_v58 = vadd.f32 1.0, %v2821_v62  ;;  %2490 = vmatpush1.bf16.msra.mxu0 %v2489_v50 }
 0x720   : > { %v2169_v14 = vadd.f32 1.0, %v2823_v53 }
 0x721   : > { %v2176_v60 = vmul.f32 %v2168_v58, %v2144_v55 }
 0x722   : > { %v2177_v27 = vmul.f32 %v2169_v14, %v2145_v57 }
 0x723   : > { %v2493_v41 = vpack.c.bf16 %v2176_v60, %v2174_v12 }
 0x724   : > { %v2491_v34 = vpack.c.bf16 %v2177_v27, %v2175_v7 }
 0x726   : > { %2492 = vmatprep.subr.bf16.mxu0 %v2491_v34 }
 0x727   : > { %2494 = vmatpush1.bf16.msra.mxu0 %v2493_v41 }
 0x72a   : > { %2471 = vmatmul.mubr.msk.f32.vlgmr.msra.gmra.mrb[8].mxu0 %vm1970_vm14, %v5462_v46 }
 0x7fd   : > { %v2244_v38 = vpop.f32.mrb[8].mxu0 }
 0x7fe   : > { %v2245_v47 = vadd.f32 %v2244_v38, %v5480_v37  ;;  %v2246_v40 = vpop.f32.mrb[9].mxu0 }
 0x7ff   : > { %v2247_v22 = vadd.f32 %v2246_v40, %v5480_v37 }
 0x800   : > { %v2249_v20 = vadd.f32 %v2245_v47, %v4998_v51 }
 0x801   : > { %v2250_v31 = vadd.f32 %v2247_v22, %v5008_v21 }
 0x802   : > { %2251 = vst [vmem:[%s5488_s15 + $0x10] sm:$0xff] %v2249_v20 }
 0x803   : > { %2252 = vst [vmem:[%s5488_s15 + $0x18] sm:$0xff] %v2250_v31 }
 0x804   : > { %3152 = shalt.err (!%p3149_p8)
}
 0x805   : > { %s3153_s24 = scalar_lea.hbm %s5511_s30, 512  ;;  %s3157_s29 = scalar_lea.hbm %s5882_s3, 1024 }
 0x806   : > { %p3154_p10 = scmp.ne.s32.totalorder %s5511_s30, %s3153_s24  ;;  %p3158_p12 = scmp.lt.u32.totalorder %s5511_s30, %s5882_s3 }
 0x807   : > { %p3159_p5 = scmp.lt.u32.totalorder %s3157_s29, %s3153_s24  ;;  %p3161_p4 = scmp.lt.u32.totalorder %s3153_s24, %s5511_s30 }
 0x808   : > { %p3155_p11 = pnand %p3154_p10, %p5883_p1 }
 0x809   : > { %p3160_p7 = por %p3159_p5, %p3158_p12 }
 0x80a   : > { %p3156_p6 = pneg %p3155_p11 }
 0x80b   : > { %p3162_p3 = por %p3161_p4, %p3160_p7 }
 0x80d   : > { %p3163_p9 = pnand %p3162_p3, %p3156_p6 }
 0x80f   : > { %3166 = shalt.err (!%p3163_p9)
}
 0x810   : > { %2537 = dma.vmem_to_hbm [thread:$0]  (%p5883_p1), %s5513_s13, 512, %s5511_s30, %s2254_s23  }
 0x811 PF: > { %s2280_s25 = sand.u32 1, %s3213_s17   ;;  %p5884_p13 = scmp.ne.s32.totalorder %s5688_s21, 0 }
 0x812   : > { %p5885_p0 = scmp.ge.s32.totalorder %s3225_s20, 2  ;;  %s2281_s14 = scalar_lea.sflag [#allocation4], %s2280_s25 }
 0x814   : > { %p2575_p2 = pnand %p5885_p0, %p5884_p13 }
 0x816   : > { %3208 = dma.done.wait (!%p2575_p2), %s2281_s14, 512  }
 0x817   : > { %3210 = vsyncadd (!%p2575_p2), %s2281_s14, 4294966784  ;;  %p29_p8 = scmp.ge.s32.totalorder %s3649_s16, 4   ;;  %s5886_s17 = smov %s3217_s18 }
 0x818   : > { %s5887_s18 = smov %s3221_s19  ;;  %s5888_s19 = smov %s3660_s0 }
 0x819   : > { %s5889_s20 = smov %s3649_s16  ;;  %31 = sbr.rel (!%p29_p8) target bundleno = 15 (0xf), region = 149 }
 0x820   :  { %2286 = vsyncpa [#allocation3], 1 }
 0x821   :  { %2288 = vsyncpa [#allocation3 + $0x1], 1 }
 0x822   :  { %2289 = vsyncpa [#allocation6], 1 }
 0x823   :  { %2290 = vsyncpa [#allocation9], 1 }
 0x824   :  { %2291 = vsyncpa [#allocation12], 1 }
 0x825   :  { %2292 = vsyncpa [#allocation15], 1 }
 0x826   :  { %2293 = vsyncpa [#allocation18], 1 }
 0x827   :  { %2294 = vsyncpa [#allocation4], 1 }
 0x828   :  { %2296 = vsyncpa [#allocation4 + $0x1], 1 }

</bundles_post_ra>
